<compile_context>
chip_gen: v7x
topology: tpu7x:2x2x1
jax: 0.10.0
libtpu: 0.0.40
codegen_flags: <defaults>
</compile_context>

<pallas_src>
import functools

import jax
import jax.numpy as jnp
from jax.experimental import pallas as pl
from jax.experimental.pallas import tpu as pltpu

HIDDEN = 256
STD_MIN = 0.1
STD_MAX = 10.0


def _softplus(x):
    # Matches F.softplus(x, beta=1, threshold=20): x for x > 20, else log1p(exp(x))
    safe = jnp.minimum(x, 20.0)
    return jnp.where(x > 20.0, x, jnp.log1p(jnp.exp(safe)))


def encoder_kernel(x_ref, w1_ref, b1_ref, w2_ref, b2_ref, w3_ref, b3_ref,
                   out_ref):
    L = out_ref.shape[-1] // 2  # latent_dims (static)

    # x arrives already in bf16 (cast done in the wrapper); MXU accumulates f32.
    x = x_ref[...]

    h1 = jnp.dot(x, w1_ref[...], preferred_element_type=jnp.float32) + b1_ref[...]
    h1 = jnp.maximum(h1, 0.0).astype(jnp.bfloat16)          # relu(fc1(x))

    h2 = jnp.dot(h1, w2_ref[...], preferred_element_type=jnp.float32) + b2_ref[...]
    h2 = jnp.maximum(h2, 0.0).astype(jnp.bfloat16)          # relu(fc2(x))

    out = jnp.dot(h2, w3_ref[...], preferred_element_type=jnp.float32) + b3_ref[...]

    if L % 128 == 0:
        # Lane-aligned halves: each activation computed only on its own half,
        # two unmasked lane-aligned stores (halves EUP transcendental work).
        mean = 30.0 * jnp.tanh(out[:, :L] * (1.0 / 30.0))
        s = STD_MAX - _softplus(STD_MAX - out[:, L:])
        s = STD_MIN + _softplus(s - STD_MIN)
        out_ref[:, :L] = mean.astype(out_ref.dtype)
        out_ref[:, L:] = s.astype(out_ref.dtype)
    else:
        # Sub-vreg halves (e.g. L=64 -> 2L=128 = one lane width): compute both
        # activations across the tile and lane-select; single unmasked store.
        mean = 30.0 * jnp.tanh(out * (1.0 / 30.0))
        s = STD_MAX - _softplus(STD_MAX - out)
        s = STD_MIN + _softplus(s - STD_MIN)
        col = jax.lax.broadcasted_iota(jnp.int32, out.shape, 1)
        fused = jnp.where(col < L, mean, s)
        out_ref[...] = fused.astype(out_ref.dtype)


def _pick_block_b(batch, block_b):
    """One grid step on 1-TC chips (v5e/v6e); two 'parallel' blocks on v7x."""
    if block_b is not None:
        bb = min(block_b, batch)
        return bb if bb == batch else max(8, (bb // 8) * 8)
    try:
        kind = jax.devices()[0].device_kind.lower()
    except Exception:  # device query is best-effort
        kind = ""
    if "v7" in kind and batch >= 16 and batch % 16 == 0:
        return min(batch // 2, 2048)      # feed both TensorCores
    return batch                          # single step: no grid bookkeeping


@functools.partial(jax.jit, static_argnames=("bb",))
def _encoder_forward(x, params, *, bb):
    B, D_in = x.shape
    w1, b1, w2, b2, w3, b3 = (params["w1"], params["b1"], params["w2"],
                              params["b2"], params["w3"], params["b3"])
    L2 = w3.shape[1]

    # bf16 cast in the wrapper: halves the x HBM->VMEM DMA and removes an
    # in-kernel VPU cast over the largest streamed activation.
    xb = x.astype(jnp.bfloat16)

    grid = (pl.cdiv(B, bb),)
    full = lambda i: (0, 0)

    fused = pl.pallas_call(
        encoder_kernel,
        out_shape=jax.ShapeDtypeStruct((B, L2), jnp.float32),
        grid=grid,
        in_specs=[
            pl.BlockSpec((bb, D_in), lambda i: (i, 0)),   # x tile (bf16)
            pl.BlockSpec((D_in, HIDDEN), full),           # w1 (grid-invariant)
            pl.BlockSpec((1, HIDDEN), full),              # b1
            pl.BlockSpec((HIDDEN, HIDDEN), full),         # w2
            pl.BlockSpec((1, HIDDEN), full),              # b2
            pl.BlockSpec((HIDDEN, L2), full),             # w3
            pl.BlockSpec((1, L2), full),                  # b3
        ],
        out_specs=pl.BlockSpec((bb, L2), lambda i: (i, 0)),
        compiler_params=pltpu.CompilerParams(
            dimension_semantics=("parallel",)),
    )(xb, w1, b1, w2, b2, w3, b3)

    # Return the lane-dense fused [B, 2L] tensor as-is; slicing mean/std here
    # would materialize two extra HBM copies + dispatches in XLA.
    return fused


def encoder_forward(x, params, *, block_b=None):
    """Returns fused [B, 2*latent_dims]: lanes [:L] = mean, lanes [L:] = std."""
    bb = _pick_block_b(x.shape[0], block_b)
    return _encoder_forward(x, params, bb=bb)


def split_mean_std(fused):
    """Consumer-side split (equivalent of torch.chunk(x, 2, -1))."""
    L = fused.shape[-1] // 2
    return fused[:, :L], fused[:, L:]


def init_params(key, input_shape, latent_dims):
    """Deterministic synthetic init (shapes match the nn.Linear layers).

    Weights are stored in bfloat16 (MXU-native on v6e/v7x); biases stay f32.
    """
    ks = jax.random.split(key, 6)

    def linear(kw, kb, fan_in, fan_out):
        bound = 1.0 / jnp.sqrt(float(fan_in))
        w = jax.random.uniform(kw, (fan_in, fan_out), jnp.float32, -bound, bound)
        b = jax.random.uniform(kb, (1, fan_out), jnp.float32, -bound, bound)
        return w.astype(jnp.bfloat16), b

    w1, b1 = linear(ks[0], ks[1], input_shape, HIDDEN)
    w2, b2 = linear(ks[2], ks[3], HIDDEN, HIDDEN)
    w3, b3 = linear(ks[4], ks[5], HIDDEN, 2 * latent_dims)
    return {"w1": w1, "b1": b1, "w2": w2, "b2": b2, "w3": w3, "b3": b3}


def reference_forward(x, params):
    """Pure-JAX reference mirroring the kernel's bf16-in / f32-acc numerics."""
    f32 = lambda a: a.astype(jnp.float32)
    hi = jax.lax.Precision.HIGHEST

    xb = f32(x.astype(jnp.bfloat16))
    h = jax.nn.relu(jnp.dot(xb, f32(params["w1"]), precision=hi) + f32(params["b1"]))
    h = f32(h.astype(jnp.bfloat16))
    h = jax.nn.relu(jnp.dot(h, f32(params["w2"]), precision=hi) + f32(params["b2"]))
    h = f32(h.astype(jnp.bfloat16))
    out = jnp.dot(h, f32(params["w3"]), precision=hi) + f32(params["b3"])

    L = out.shape[-1] // 2
    mean, std = out[:, :L], out[:, L:]
    mean = 30.0 * jnp.tanh(mean / 30.0)
    std = STD_MAX - _softplus(STD_MAX - std)
    std = STD_MIN + _softplus(std - STD_MIN)
    return mean, std


def _check(key, batch, input_shape, latent_dims):
    k_param, k_x = jax.random.split(key)
    params = init_params(k_param, input_shape, latent_dims)
    x = jax.random.normal(k_x, (batch, input_shape), jnp.float32)

    fused = encoder_forward(x, params)
    jax.block_until_ready(fused)
    mean, std = split_mean_std(fused)

    mean_ref, std_ref = reference_forward(x, params)
    assert fused.shape == (batch, 2 * latent_dims)
    assert jnp.allclose(mean, mean_ref, atol=2e-3, rtol=2e-3)
    assert jnp.allclose(std, std_ref, atol=2e-3, rtol=2e-3)
    assert bool(jnp.all(std > 0.0))


if __name__ == "__main__":
    key = jax.random.PRNGKey(0)
    k0, k1 = jax.random.split(key)

    # Primary case: L=64 -> fused lane-select path (2L = one lane width).
    # Single grid step on v5e/v6e; 2x128-row "parallel" blocks on v7x.
    _check(k0, batch=256, input_shape=32, latent_dims=64)

    # Lane-aligned-halves path: L=128 -> per-half activations + two stores.
    _check(k1, batch=64, input_shape=32, latent_dims=128)

    print("KERNEL_OK")
</pallas_src>

<mosaic_0001>
module attributes {stable_mosaic.version = 11 : i64} {
  func.func @encoder_kernel(%arg0: i32, %arg1: memref<256x32xbf16, #tpu.memory_space<vmem>>, %arg2: memref<32x256xbf16, #tpu.memory_space<vmem>>, %arg3: memref<1x256xf32, #tpu.memory_space<vmem>>, %arg4: memref<256x256xbf16, #tpu.memory_space<vmem>>, %arg5: memref<1x256xf32, #tpu.memory_space<vmem>>, %arg6: memref<256x128xbf16, #tpu.memory_space<vmem>>, %arg7: memref<1x128xf32, #tpu.memory_space<vmem>>, %arg8: memref<256x128xf32, #tpu.memory_space<vmem>>) attributes {dimension_semantics = [#tpu.dimension_semantics<parallel>], iteration_bounds = array<i64: 1>, scalar_prefetch = 0 : i64, scratch_operands = 0 : i64, tpu.core_type = #tpu.core_type<tc>, window_params = [{transform_indices = @transform_0, window_bounds = array<i64: 256, 32>}, {pipeline_mode = #tpu.pipeline_mode<synchronous>, transform_indices = @transform_1, window_bounds = array<i64: 32, 256>}, {pipeline_mode = #tpu.pipeline_mode<synchronous>, transform_indices = @transform_2, window_bounds = array<i64: 1, 256>}, {pipeline_mode = #tpu.pipeline_mode<synchronous>, transform_indices = @transform_3, window_bounds = array<i64: 256, 256>}, {pipeline_mode = #tpu.pipeline_mode<synchronous>, transform_indices = @transform_4, window_bounds = array<i64: 1, 256>}, {pipeline_mode = #tpu.pipeline_mode<synchronous>, transform_indices = @transform_5, window_bounds = array<i64: 256, 128>}, {pipeline_mode = #tpu.pipeline_mode<synchronous>, transform_indices = @transform_6, window_bounds = array<i64: 1, 128>}, {transform_indices = @transform_7, window_bounds = array<i64: 256, 128>}]} {
    %c0 = arith.constant 0 : index
    %c0_0 = arith.constant 0 : index
    %0 = vector.load %arg1[%c0, %c0_0] : memref<256x32xbf16, #tpu.memory_space<vmem>>, vector<256x32xbf16>
    %c0_1 = arith.constant 0 : index
    %c0_2 = arith.constant 0 : index
    %1 = vector.load %arg2[%c0_1, %c0_2] : memref<32x256xbf16, #tpu.memory_space<vmem>>, vector<32x256xbf16>
    %cst = arith.constant dense<0.000000e+00> : vector<256x256xf32>
    %2 = tpu.matmul %0, %1, %cst {dimension_numbers = #tpu.dot_dimension_numbers<[1], [0], [0], [1], [0, 0, 1, 1], [], []>} : vector<256x32xbf16>, vector<32x256xbf16>, vector<256x256xf32> -> vector<256x256xf32>
    %c0_3 = arith.constant 0 : index
    %c0_4 = arith.constant 0 : index
    %3 = vector.load %arg3[%c0_3, %c0_4] : memref<1x256xf32, #tpu.memory_space<vmem>>, vector<1x256xf32>
    %4 = vector.broadcast %3 : vector<1x256xf32> to vector<256x256xf32>
    %5 = arith.addf %2, %4 : vector<256x256xf32>
    %cst_5 = arith.constant 0.000000e+00 : f32
    %6 = vector.broadcast %cst_5 : f32 to vector<256x256xf32>
    %7 = arith.maximumf %5, %6 : vector<256x256xf32>
    %8 = arith.truncf %7 : vector<256x256xf32> to vector<256x256xbf16>
    %c0_6 = arith.constant 0 : index
    %c0_7 = arith.constant 0 : index
    %9 = vector.load %arg4[%c0_6, %c0_7] : memref<256x256xbf16, #tpu.memory_space<vmem>>, vector<256x256xbf16>
    %cst_8 = arith.constant dense<0.000000e+00> : vector<256x256xf32>
    %10 = tpu.matmul %8, %9, %cst_8 {dimension_numbers = #tpu.dot_dimension_numbers<[1], [0], [0], [1], [0, 0, 1, 1], [], []>} : vector<256x256xbf16>, vector<256x256xbf16>, vector<256x256xf32> -> vector<256x256xf32>
    %c0_9 = arith.constant 0 : index
    %c0_10 = arith.constant 0 : index
    %11 = vector.load %arg5[%c0_9, %c0_10] : memref<1x256xf32, #tpu.memory_space<vmem>>, vector<1x256xf32>
    %12 = vector.broadcast %11 : vector<1x256xf32> to vector<256x256xf32>
    %13 = arith.addf %10, %12 : vector<256x256xf32>
    %cst_11 = arith.constant 0.000000e+00 : f32
    %14 = vector.broadcast %cst_11 : f32 to vector<256x256xf32>
    %15 = arith.maximumf %13, %14 : vector<256x256xf32>
    %16 = arith.truncf %15 : vector<256x256xf32> to vector<256x256xbf16>
    %c0_12 = arith.constant 0 : index
    %c0_13 = arith.constant 0 : index
    %17 = vector.load %arg6[%c0_12, %c0_13] : memref<256x128xbf16, #tpu.memory_space<vmem>>, vector<256x128xbf16>
    %cst_14 = arith.constant dense<0.000000e+00> : vector<256x128xf32>
    %18 = tpu.matmul %16, %17, %cst_14 {dimension_numbers = #tpu.dot_dimension_numbers<[1], [0], [0], [1], [0, 0, 1, 1], [], []>} : vector<256x256xbf16>, vector<256x128xbf16>, vector<256x128xf32> -> vector<256x128xf32>
    %c0_15 = arith.constant 0 : index
    %c0_16 = arith.constant 0 : index
    %19 = vector.load %arg7[%c0_15, %c0_16] : memref<1x128xf32, #tpu.memory_space<vmem>>, vector<1x128xf32>
    %20 = vector.broadcast %19 : vector<1x128xf32> to vector<256x128xf32>
    %21 = arith.addf %18, %20 : vector<256x128xf32>
    %cst_17 = arith.constant 0.0333333351 : f32
    %22 = vector.broadcast %cst_17 : f32 to vector<256x128xf32>
    %23 = arith.mulf %21, %22 : vector<256x128xf32>
    %24 = math.tanh %23 : vector<256x128xf32>
    %cst_18 = arith.constant 3.000000e+01 : f32
    %25 = vector.broadcast %cst_18 : f32 to vector<256x128xf32>
    %26 = arith.mulf %25, %24 : vector<256x128xf32>
    %cst_19 = arith.constant 1.000000e+01 : f32
    %27 = vector.broadcast %cst_19 : f32 to vector<256x128xf32>
    %28 = arith.subf %27, %21 : vector<256x128xf32>
    %cst_20 = arith.constant 2.000000e+01 : f32
    %29 = vector.broadcast %cst_20 : f32 to vector<256x128xf32>
    %30 = arith.minimumf %28, %29 : vector<256x128xf32>
    %cst_21 = arith.constant 2.000000e+01 : f32
    %31 = vector.broadcast %cst_21 : f32 to vector<256x128xf32>
    %32 = arith.cmpf ogt, %28, %31 : vector<256x128xf32>
    %33 = math.exp %30 : vector<256x128xf32>
    %34 = math.log1p %33 : vector<256x128xf32>
    %35 = arith.select %32, %28, %34 : vector<256x128xi1>, vector<256x128xf32>
    %cst_22 = arith.constant 1.000000e+01 : f32
    %36 = vector.broadcast %cst_22 : f32 to vector<256x128xf32>
    %37 = arith.subf %36, %35 : vector<256x128xf32>
    %cst_23 = arith.constant 1.000000e-01 : f32
    %38 = vector.broadcast %cst_23 : f32 to vector<256x128xf32>
    %39 = arith.subf %37, %38 : vector<256x128xf32>
    %cst_24 = arith.constant 2.000000e+01 : f32
    %40 = vector.broadcast %cst_24 : f32 to vector<256x128xf32>
    %41 = arith.minimumf %39, %40 : vector<256x128xf32>
    %cst_25 = arith.constant 2.000000e+01 : f32
    %42 = vector.broadcast %cst_25 : f32 to vector<256x128xf32>
    %43 = arith.cmpf ogt, %39, %42 : vector<256x128xf32>
    %44 = math.exp %41 : vector<256x128xf32>
    %45 = math.log1p %44 : vector<256x128xf32>
    %46 = arith.select %43, %39, %45 : vector<256x128xi1>, vector<256x128xf32>
    %cst_26 = arith.constant 1.000000e-01 : f32
    %47 = vector.broadcast %cst_26 : f32 to vector<256x128xf32>
    %48 = arith.addf %47, %46 : vector<256x128xf32>
    %49 = tpu.iota {dimensions = array<i32: 1>} : vector<256x128xi32>
    %c64_i32 = arith.constant 64 : i32
    %50 = vector.broadcast %c64_i32 : i32 to vector<256x128xi32>
    %51 = arith.cmpi slt, %49, %50 : vector<256x128xi32>
    %52 = arith.select %51, %26, %48 : vector<256x128xi1>, vector<256x128xf32>
    %c0_27 = arith.constant 0 : index
    %c0_28 = arith.constant 0 : index
    %53 = vector.load %arg8[%c0_27, %c0_28] : memref<256x128xf32, #tpu.memory_space<vmem>>, vector<256x128xf32>
    tpu.vector_store %arg8[%c0_27, %c0_28], %52 {strides = array<i32>} : memref<256x128xf32, #tpu.memory_space<vmem>>, vector<256x128xf32>,
    return
  }
  func.func @transform_0(%arg0: i32) -> (i32, i32) {
    %c0_i32 = arith.constant 0 : i32
    %c0_i32_0 = arith.constant 0 : i32
    return %arg0, %c0_i32 : i32, i32
  }
  func.func @transform_1(%arg0: i32) -> (i32, i32) {
    %c0_i32 = arith.constant 0 : i32
    %c0_i32_0 = arith.constant 0 : i32
    %c0_i32_1 = arith.constant 0 : i32
    return %c0_i32, %c0_i32_0 : i32, i32
  }
  func.func @transform_2(%arg0: i32) -> (i32, i32) {
    %c0_i32 = arith.constant 0 : i32
    %c0_i32_0 = arith.constant 0 : i32
    %c0_i32_1 = arith.constant 0 : i32
    return %c0_i32, %c0_i32_0 : i32, i32
  }
  func.func @transform_3(%arg0: i32) -> (i32, i32) {
    %c0_i32 = arith.constant 0 : i32
    %c0_i32_0 = arith.constant 0 : i32
    %c0_i32_1 = arith.constant 0 : i32
    return %c0_i32, %c0_i32_0 : i32, i32
  }
  func.func @transform_4(%arg0: i32) -> (i32, i32) {
    %c0_i32 = arith.constant 0 : i32
    %c0_i32_0 = arith.constant 0 : i32
    %c0_i32_1 = arith.constant 0 : i32
    return %c0_i32, %c0_i32_0 : i32, i32
  }
  func.func @transform_5(%arg0: i32) -> (i32, i32) {
    %c0_i32 = arith.constant 0 : i32
    %c0_i32_0 = arith.constant 0 : i32
    %c0_i32_1 = arith.constant 0 : i32
    return %c0_i32, %c0_i32_0 : i32, i32
  }
  func.func @transform_6(%arg0: i32) -> (i32, i32) {
    %c0_i32 = arith.constant 0 : i32
    %c0_i32_0 = arith.constant 0 : i32
    %c0_i32_1 = arith.constant 0 : i32
    return %c0_i32, %c0_i32_0 : i32, i32
  }
  func.func @transform_7(%arg0: i32) -> (i32, i32) {
    %c0_i32 = arith.constant 0 : i32
    %c0_i32_0 = arith.constant 0 : i32
    return %arg0, %c0_i32 : i32, i32
  }
}

</mosaic_0001>

<bundles_post_ra>
// kernel: _encoder_forward.1
= control target key start
LH: loop header
LB: loop body
LE: loop exit
PB: predicated region body
PF: predicated region fallthrough
CT: control target
= control target key end

     0   :  { %12 = vsyncpa [#allocation3], 0  ;;  %s5047_s0 = inlined_call_operand.vmem [shape: bf16[256,32], index: 0, kind: input, shape index: {}]   ;;  %s5048_s1 = inlined_call_operand.hbm [shape: bf16[32,256], index: 1, kind: input, shape index: {}]   ;;  %s5049_s2 = inlined_call_operand.vmem [shape: f32[1,256], index: 2, kind: input, shape index: {}]   ;;  %s5050_s3 = inlined_call_operand.vmem [shape: bf16[256,256], index: 3, kind: input, shape index: {}]   ;;  %s5051_s4 = inlined_call_operand.vmem [shape: f32[1,256], index: 4, kind: input, shape index: {}]   ;;  %s5052_s5 = inlined_call_operand.hbm [shape: bf16[256,128], index: 5, kind: input, shape index: {}]   ;;  %s5053_s6 = inlined_call_operand.vmem [shape: f32[1,128], index: 6, kind: input, shape index: {}]   ;;  %s5054_s7 = inlined_call_operand.hbm [shape: f32[256,128], index: 7, kind: output, shape index: {}]  }
   0x1   :  { %13 = vsyncpa [#allocation6], 0 }
   0x2   :  { %14 = vsyncpa [#allocation4], 0  ;;  %s3257_s24 = smov [#allocation2]   ;;  %s3185_s28 = scalar_lea.hbm %s5048_s1, 512 }
   0x3   :  { %s22_s25 = sshll.u32 %s3257_s24, 4  ;;  %p3186_p0 = scmp.ne.s32.totalorder %s5048_s1, %s3185_s28  ;;  %s23_s25 = int_to_ptr.vmem [resolvable:$true] %s22_s25 }
   0x4   :  { %p3189_p1 = scmp.lt.u32.totalorder %s3185_s28, %s5048_s1 }
   0x6   :  { %p3191_p2 = pnand %p3189_p1, %p3186_p0 }
   0x8   :  { %3194 = shalt.err (!%p3191_p2)
}
   0x9   :  { %s3195_s10 = scalar_lea.vmem %s23_s25, 512  ;;  %p3200_p4 = scmp.lt.s32.totalorder %s23_s25, %s23_s25 }
   0xa   :  { %p3196_p3 = scmp.ne.s32.totalorder %s23_s25, %s3195_s10  ;;  %p3201_p5 = scmp.lt.s32.totalorder %s3195_s10, %s3195_s10 }
   0xc   :  { %p3202_p6 = por %p3201_p5, %p3200_p4 }
   0xe   :  { %p3203_p7 = pnand %p3202_p6, %p3196_p3 }
  0x10   :  { %3206 = shalt.err (!%p3203_p7)
}
  0x11   :  { %s3258_s11 = smov 128   ;;  %s3259_s12 = smov 8  }
  0x12   :  { %28 = dma.hbm_to_vmem [thread:$0]  %s5048_s1, 512, %s23_s25, [#allocation3], %s3258_s11, %s3258_s11, %s3259_s12  }
  0x13   :  { %s3260_s15 = smov [#allocation5]   ;;  %s3207_s19 = scalar_lea.hbm %s5052_s5, 2048 }
  0x14   :  { %s40_s16 = sshll.u32 %s3260_s15, 4  ;;  %p3208_p8 = scmp.ne.s32.totalorder %s5052_s5, %s3207_s19  ;;  %s41_s16 = int_to_ptr.vmem [resolvable:$true] %s40_s16 }
  0x15   :  { %p3211_p9 = scmp.lt.u32.totalorder %s3207_s19, %s5052_s5 }
  0x17   :  { %p3213_p10 = pnand %p3211_p9, %p3208_p8 }
  0x19   :  { %3216 = shalt.err (!%p3213_p10)
}
  0x1a   :  { %s3217_s24 = scalar_lea.vmem %s41_s16, 2048  ;;  %p3222_p12 = scmp.lt.s32.totalorder %s41_s16, %s41_s16 }
  0x1b   :  { %p3218_p11 = scmp.ne.s32.totalorder %s41_s16, %s3217_s24  ;;  %p3223_p13 = scmp.lt.s32.totalorder %s3217_s24, %s3217_s24 }
  0x1d   :  { %p3224_p0 = por %p3223_p13, %p3222_p12 }
  0x1f   :  { %p3225_p1 = pnand %p3224_p0, %p3218_p11 }
  0x21   :  { %3228 = shalt.err (!%p3225_p1)
}
  0x22   :  { %s3261_s1 = smov 64   ;;  %s3262_s25 = smov 4  }
  0x23   :  { %46 = dma.hbm_to_vmem [thread:$0]  %s5052_s5, 2048, %s41_s16, [#allocation6], %s3261_s1, %s3261_s1, %s3262_s25  }
  0x24   :  { %3251 = dma.done.wait [#allocation3], 512  }
  0x25   :  { %3252 = vsyncadd [#allocation3], 4294966784 }
  0x26   :  { %3253 = dma.done.wait [#allocation6], 2048  }
  0x27   :  { %3254 = vsyncadd [#allocation6], 4294965248  ;;  %v3263_v0 = vmov 0   ;;  %v2777_v1 = vld [vmem:[#allocation2 + $0x4] ss:$8 sps:$4 sm:$0xff]   ;;  %vm204_vm0 = vcmask 261120   ;;  %v94_v53 = vlaneseq }
  0x28   :  { %285 = vmatprep.mubr.bf16.mxu0 %v3263_v0  ;;  %365 = vmatprep.mubr.bf16.mxu1 %v3263_v0  ;;  %v2779_v2 = vld [vmem:[#allocation2] ss:$8 sps:$4 sm:$0xff]   ;;  %v2780_v3 = vld [vmem:[#allocation2 + $0x14] ss:$8 sps:$4 sm:$0xff]   ;;  %v2782_v4 = vld [vmem:[#allocation2 + $0x10] ss:$8 sps:$4 sm:$0xff]  }
  0x29   :  { %253 = vmatprep.subr.bf16.mxu0 %v2777_v1  ;;  %2765 = vmatprep.subr.bf16.mxu1 %v2777_v1  ;;  %v2783_v5 = vld [vmem:[%s5047_s0] sm:$0xff]   ;;  %v2784_v7 = vld [vmem:[%s5047_s0 + $0x8] sm:$0xff]   ;;  %v2804_v11 = vld [vmem:[%s5050_s3 + $0x14] ss:$8 sps:$4 sm:$0xff]   ;;  %v3509_v54 = vshrl.u32 %v94_v53, 7 }
  0x2a   :  { %254 = vmatpush1.bf16.msra.mxu0 %v2779_v2  ;;  %2767 = vmatpush1.bf16.msra.mxu1 %v2779_v2  ;;  %v2791_v6 = vld [vmem:[%s5047_s0 + $0x40] sm:$0xff]   ;;  %v2792_v8 = vld [vmem:[%s5047_s0 + $0x48] sm:$0xff]   ;;  %v2785_v12 = vld [vmem:[%s5047_s0 + $0x10] sm:$0xff]  }
  0x2b   :  { %255 = vmatprep.subr.bf16.mxu0 %v2780_v3  ;;  %2766 = vmatprep.subr.bf16.mxu1 %v2780_v3  ;;  %v2799_v9 = vld [vmem:[%s5050_s3] ss:$8 sps:$4 sm:$0xff]   ;;  %v2801_v10 = vld [vmem:[%s5050_s3 + $0x4] ss:$8 sps:$4 sm:$0xff]   ;;  %v2802_v13 = vld [vmem:[%s5050_s3 + $0x10] ss:$8 sps:$4 sm:$0xff]  }
  0x2c   :  { %v2807_v14 = vld [vmem:[%s5050_s3 + $0x24] ss:$8 sps:$4 sm:$0xff]   ;;  %v2793_v15 = vld [vmem:[%s5047_s0 + $0x50] sm:$0xff]   ;;  %v2805_v16 = vld [vmem:[%s5050_s3 + $0x20] ss:$8 sps:$4 sm:$0xff]   ;;  %v96_v55 = vsub.s32 0, %v3509_v54 }
  0x2d   :  { %v2810_v17 = vld [vmem:[%s5050_s3 + $0x34] ss:$8 sps:$4 sm:$0xff]   ;;  %v2808_v19 = vld [vmem:[%s5050_s3 + $0x30] ss:$8 sps:$4 sm:$0xff]   ;;  %v2813_v20 = vld [vmem:[%s5050_s3 + $0x44] ss:$8 sps:$4 sm:$0xff]  }
  0x2e   :  { %256 = vmatpush1.bf16.msra.mxu0 %v2782_v4  ;;  %2768 = vmatpush1.bf16.msra.mxu1 %v2782_v4  ;;  %v2786_v18 = vld [vmem:[%s5047_s0 + $0x18] sm:$0xff]   ;;  %v2811_v22 = vld [vmem:[%s5050_s3 + $0x40] ss:$8 sps:$4 sm:$0xff]   ;;  %v2819_v26 = vld [vmem:[%s5050_s3 + $0x64] ss:$8 sps:$4 sm:$0xff]   ;;  %v100_v57 = vsub.s32 1, %v3509_v54 }
  0x2f   :  { %746 = vmatprep.subr.bf16.mxu1 %v2801_v10  ;;  %v2794_v21 = vld [vmem:[%s5047_s0 + $0x58] sm:$0xff]   ;;  %v2787_v24 = vld [vmem:[%s5047_s0 + $0x20] sm:$0xff]   ;;  %v2788_v30 = vld [vmem:[%s5047_s0 + $0x28] sm:$0xff]  }
  0x30   :  { %v2816_v23 = vld [vmem:[%s5050_s3 + $0x54] ss:$8 sps:$4 sm:$0xff]   ;;  %v2814_v25 = vld [vmem:[%s5050_s3 + $0x50] ss:$8 sps:$4 sm:$0xff]   ;;  %v2795_v27 = vld [vmem:[%s5047_s0 + $0x60] sm:$0xff]  }
  0x31   :  { %2556 = vmatmul.mubr.msk.bf16.vlgmr.msra.gmra.mrb[0].mxu0 %vm204_vm0, %v2783_v5  ;;  %2564 = vmatmul.mubr.msk.bf16.vlgmr.msra.gmra.mrb[0].mxu1 %vm204_vm0, %v2791_v6  ;;  %v2817_v28 = vld [vmem:[%s5050_s3 + $0x60] ss:$8 sps:$4 sm:$0xff]   ;;  %v2822_v29 = vld [vmem:[%s5050_s3 + $0x74] ss:$8 sps:$4 sm:$0xff]   ;;  %v2820_v31 = vld [vmem:[%s5050_s3 + $0x70] ss:$8 sps:$4 sm:$0xff]  }
  0x32   :  { %295 = vmatprep.mubr.bf16.mxu0 %v3263_v0  ;;  %375 = vmatprep.mubr.bf16.mxu1 %v3263_v0  ;;  %v2825_v32 = vld [vmem:[%s5050_s3 + $0x84] ss:$8 sps:$4 sm:$0xff]   ;;  %v2823_v34 = vld [vmem:[%s5050_s3 + $0x80] ss:$8 sps:$4 sm:$0xff]   ;;  %v2828_v35 = vld [vmem:[%s5050_s3 + $0x94] ss:$8 sps:$4 sm:$0xff]  }
  0x33   :  { %747 = vmatpush1.bf16.msra.mxu1 %v2799_v9  ;;  %v2796_v33 = vld [vmem:[%s5047_s0 + $0x68] sm:$0xff]   ;;  %v2789_v36 = vld [vmem:[%s5047_s0 + $0x30] sm:$0xff]   ;;  %v2790_v42 = vld [vmem:[%s5047_s0 + $0x38] sm:$0xff]  }
  0x34   :  { %748 = vmatprep.subr.bf16.mxu1 %v2804_v11  ;;  %v2826_v37 = vld [vmem:[%s5050_s3 + $0x90] ss:$8 sps:$4 sm:$0xff]   ;;  %v2831_v38 = vld [vmem:[%s5050_s3 + $0xa4] ss:$8 sps:$4 sm:$0xff]   ;;  %v2829_v40 = vld [vmem:[%s5050_s3 + $0xa0] ss:$8 sps:$4 sm:$0xff]  }
  0x35   :  { %v2797_v39 = vld [vmem:[%s5047_s0 + $0x70] sm:$0xff]   ;;  %v2837_v44 = vld [vmem:[%s5050_s3 + $0xc4] ss:$8 sps:$4 sm:$0xff]   ;;  %v2798_v45 = vld [vmem:[%s5047_s0 + $0x78] sm:$0xff]  }
  0x36   :  { %v2834_v41 = vld [vmem:[%s5050_s3 + $0xb4] ss:$8 sps:$4 sm:$0xff]   ;;  %v2832_v43 = vld [vmem:[%s5050_s3 + $0xb0] ss:$8 sps:$4 sm:$0xff]   ;;  %v2835_v46 = vld [vmem:[%s5050_s3 + $0xc0] ss:$8 sps:$4 sm:$0xff]  }
  0x37   :  { %749 = vmatpush1.bf16.msra.mxu1 %v2802_v13  ;;  %v2840_v47 = vld [vmem:[%s5050_s3 + $0xd4] ss:$8 sps:$4 sm:$0xff]   ;;  %v2838_v48 = vld [vmem:[%s5050_s3 + $0xd0] ss:$8 sps:$4 sm:$0xff]   ;;  %v2843_v49 = vld [vmem:[%s5050_s3 + $0xe4] ss:$8 sps:$4 sm:$0xff]  }
  0x38   :  { %750 = vmatprep.subr.bf16.mxu1 %v2807_v14  ;;  %v2841_v50 = vld [vmem:[%s5050_s3 + $0xe0] ss:$8 sps:$4 sm:$0xff]   ;;  %v2846_v51 = vld [vmem:[%s5050_s3 + $0xf4] ss:$8 sps:$4 sm:$0xff]   ;;  %v2844_v52 = vld [vmem:[%s5050_s3 + $0xf0] ss:$8 sps:$4 sm:$0xff]  }
  0x39   :  { %2557 = vmatmul.mubr.msk.bf16.gmra.mrb[4].mxu0 %vm204_vm0, %v2784_v7  ;;  %2565 = vmatmul.mubr.msk.bf16.gmra.mrb[4].mxu1 %vm204_vm0, %v2792_v8  ;;  %v92_v56 = vld [vmem:[%s5049_s2] sm:$0x3]  ;;  %v2849_v6 = vld [vmem:[#allocation5 + $0x48] sm:$0xff]  }
  0x3a   :  { %305 = vmatprep.mubr.bf16.mxu0 %v3263_v0  ;;  %385 = vmatprep.mubr.bf16.mxu1 %v3263_v0  ;;  %v3518_v58 = vrot.slane %v92_v56, %v96_v55  ;;  %v3522_v59 = vrot.slane %v92_v56, %v100_v57  ;;  %v2847_v4 = vld [vmem:[#allocation5 + $0x40] sm:$0xff]  }
  0x3b   :  { %751 = vmatpush1.bf16.msra.mxu1 %v2805_v16  ;;  %v2848_v5 = vld [vmem:[#allocation5] sm:$0xff]   ;;  %2653 = vmatprep.subr.bf16.mxu0 %v2847_v4 }
  0x3c   :  { %752 = vmatprep.subr.bf16.mxu1 %v2810_v17  ;;  %2654 = vmatpush3.bf16.msra.mxu0 %v2848_v5 }
  0x3d   :  { %2655 = vmatprep.subr.bf16.mxu0 %v2849_v6 }
  0x3f   :  { %753 = vmatpush1.bf16.msra.mxu1 %v2808_v19  ;;  %v2850_v19 = vld [vmem:[#allocation5 + $0x8] sm:$0xff]  }
  0x40   :  { %754 = vmatprep.subr.bf16.mxu1 %v2813_v20  ;;  %2656 = vmatpush3.bf16.msra.mxu0 %v2850_v19 }
  0x41   :  { %2558 = vmatmul.mubr.msk.bf16.gmra.mrb[8].mxu0 %vm204_vm0, %v2785_v12  ;;  %2566 = vmatmul.mubr.msk.bf16.gmra.mrb[8].mxu1 %vm204_vm0, %v2793_v15 }
  0x42   :  { %315 = vmatprep.mubr.bf16.mxu0 %v3263_v0  ;;  %395 = vmatprep.mubr.bf16.mxu1 %v3263_v0 }
  0x43   :  { %755 = vmatpush1.bf16.msra.mxu1 %v2811_v22 }
  0x44   :  { %756 = vmatprep.subr.bf16.mxu1 %v2816_v23  ;;  %v2851_v23 = vld [vmem:[#allocation5 + $0x50] sm:$0xff]  }
  0x45   :  { %2657 = vmatprep.subr.bf16.mxu0 %v2851_v23 }
  0x47   :  { %757 = vmatpush1.bf16.msra.mxu1 %v2814_v25 }
  0x48   :  { %758 = vmatprep.subr.bf16.mxu1 %v2819_v26 }
  0x49   :  { %2559 = vmatmul.mubr.msk.bf16.gmra.mrb[12].mxu0 %vm204_vm0, %v2786_v18  ;;  %2567 = vmatmul.mubr.msk.bf16.gmra.mrb[12].mxu1 %vm204_vm0, %v2794_v21 }
  0x4a   :  { %325 = vmatprep.mubr.bf16.mxu0 %v3263_v0  ;;  %405 = vmatprep.mubr.bf16.mxu1 %v3263_v0 }
  0x4b   :  { %759 = vmatpush1.bf16.msra.mxu1 %v2817_v28 }
  0x4c   :  { %760 = vmatprep.subr.bf16.mxu1 %v2822_v29 }
  0x4f   :  { %761 = vmatpush1.bf16.msra.mxu1 %v2820_v31 }
  0x50   :  { %762 = vmatprep.subr.bf16.mxu1 %v2825_v32 }
  0x51   :  { %2560 = vmatmul.mubr.msk.bf16.gmra.mrb[16].mxu0 %vm204_vm0, %v2787_v24  ;;  %2568 = vmatmul.mubr.msk.bf16.gmra.mrb[16].mxu1 %vm204_vm0, %v2795_v27 }
  0x52   :  { %335 = vmatprep.mubr.bf16.mxu0 %v3263_v0  ;;  %415 = vmatprep.mubr.bf16.mxu1 %v3263_v0 }
  0x53   :  { %763 = vmatpush1.bf16.msra.mxu1 %v2823_v34 }
  0x54   :  { %764 = vmatprep.subr.bf16.mxu1 %v2828_v35 }
  0x57   :  { %765 = vmatpush1.bf16.msra.mxu1 %v2826_v37 }
  0x58   :  { %766 = vmatprep.subr.bf16.mxu1 %v2831_v38  ;;  %v2853_v38 = vld [vmem:[#allocation5 + $0x58] sm:$0xff]  }
  0x59   :  { %2561 = vmatmul.mubr.msk.bf16.gmra.mrb[20].mxu0 %vm204_vm0, %v2788_v30  ;;  %2569 = vmatmul.mubr.msk.bf16.gmra.mrb[20].mxu1 %vm204_vm0, %v2796_v33  ;;  %v2852_v33 = vld [vmem:[#allocation5 + $0x10] sm:$0xff]  }
  0x5a   :  { %345 = vmatprep.mubr.bf16.mxu0 %v3263_v0  ;;  %425 = vmatprep.mubr.bf16.mxu1 %v3263_v0 }
  0x5b   :  { %767 = vmatpush1.bf16.msra.mxu1 %v2829_v40  ;;  %2658 = vmatpush3.bf16.msra.mxu0 %v2852_v33 }
  0x5c   :  { %768 = vmatprep.subr.bf16.mxu1 %v2834_v41  ;;  %2659 = vmatprep.subr.bf16.mxu0 %v2853_v38 }
  0x5f   :  { %769 = vmatpush1.bf16.msra.mxu1 %v2832_v43 }
  0x60   :  { %770 = vmatprep.subr.bf16.mxu1 %v2837_v44 }
  0x61   :  { %2562 = vmatmul.mubr.msk.bf16.gmra.mrb[24].mxu0 %vm204_vm0, %v2789_v36  ;;  %2570 = vmatmul.mubr.msk.bf16.gmra.mrb[24].mxu1 %vm204_vm0, %v2797_v39 }
  0x62   :  { %355 = vmatprep.mubr.bf16.mxu0 %v3263_v0  ;;  %435 = vmatprep.mubr.bf16.mxu1 %v3263_v0 }
  0x63   :  { %771 = vmatpush1.bf16.msra.mxu1 %v2835_v46 }
  0x64   :  { %772 = vmatprep.subr.bf16.mxu1 %v2840_v47 }
  0x67   :  { %773 = vmatpush1.bf16.msra.mxu1 %v2838_v48 }
  0x68   :  { %774 = vmatprep.subr.bf16.mxu1 %v2843_v49 }
  0x69   :  { %2563 = vmatmul.mubr.msk.bf16.gmra.mrb[28].mxu0 %vm204_vm0, %v2790_v42  ;;  %2571 = vmatmul.mubr.msk.bf16.gmra.mrb[28].mxu1 %vm204_vm0, %v2798_v45 }
  0x6b   :  { %775 = vmatpush1.bf16.msra.mxu1 %v2841_v50 }
  0x6c   :  { %776 = vmatprep.subr.bf16.mxu1 %v2846_v51  ;;  %v2854_v51 = vld [vmem:[#allocation5 + $0x18] sm:$0xff]  }
  0x6d   :  { %2660 = vmatpush3.bf16.msra.mxu0 %v2854_v51 }
  0x6f   :  { %777 = vmatpush1.bf16.msra.mxu1 %v2844_v52 }
 0x104   :  { %v287_v60 = vpop.f32.mrb[0].mxu0  ;;  %v367_v3 = vpop.f32.mrb[0].mxu1 }
 0x105   :  { %v288_v61 = vadd.f32 %v287_v60, %v3518_v58  ;;  %v289_v62 = vpop.f32.mrb[1].mxu0  ;;  %v368_v8 = vadd.f32 %v367_v3, %v3518_v58  ;;  %v369_v9 = vpop.f32.mrb[1].mxu1 }
 0x106   :  { %v290_v63 = vadd.f32 %v289_v62, %v3522_v59  ;;  %v291_v0 = vpop.f32.mrb[2].mxu0  ;;  %v370_v12 = vadd.f32 %v369_v9, %v3522_v59  ;;  %v371_v13 = vpop.f32.mrb[2].mxu1 }
 0x107   :  { %v292_v1 = vadd.f32 %v291_v0, %v3518_v58  ;;  %v293_v2 = vpop.f32.mrb[3].mxu0  ;;  %v446_v10 = vmax.f32 %v288_v61, 0.0  ;;  %v478_v16 = vmax.f32 %v368_v8, 0.0  ;;  %v372_v17 = vadd.f32 %v371_v13, %v3518_v58  ;;  %v373_v18 = vpop.f32.mrb[3].mxu1  ;;  %v2855_v61 = vld [vmem:[#allocation5 + $0x60] sm:$0xff]  }
 0x108   :  { %v294_v7 = vadd.f32 %v293_v2, %v3522_v59  ;;  %v447_v14 = vmax.f32 %v290_v63, 0.0  ;;  %v479_v21 = vmax.f32 %v370_v12, 0.0  ;;  %v374_v22 = vadd.f32 %v373_v18, %v3522_v59  ;;  %2661 = vmatprep.subr.bf16.mxu0 %v2855_v61  ;;  %v2857_v12 = vld [vmem:[#allocation5 + $0x68] sm:$0xff]  }
 0x109   :  { %v448_v11 = vmax.f32 %v292_v1, 0.0  ;;  %v480_v26 = vmax.f32 %v372_v17, 0.0 }
 0x10a   :  { %v449_v15 = vmax.f32 %v294_v7, 0.0  ;;  %v481_v29 = vmax.f32 %v374_v22, 0.0  ;;  %v2856_v7 = vld [vmem:[#allocation5 + $0x20] sm:$0xff]  }
 0x10b   :  { %v510_v20 = vpack.c.bf16 %v448_v11, %v446_v10  ;;  %v3534_v32 = vpack.c.bf16 %v480_v26, %v478_v16  ;;  %2662 = vmatpush3.bf16.msra.mxu0 %v2856_v7 }
 0x10c   :  { %v511_v24 = vpack.c.bf16 %v449_v15, %v447_v14  ;;  %v297_v25 = vpop.f32.mrb[4].mxu0  ;;  %v3537_v36 = vpack.c.bf16 %v481_v29, %v479_v21  ;;  %v377_v37 = vpop.f32.mrb[4].mxu1  ;;  %2663 = vmatprep.subr.bf16.mxu0 %v2857_v12  ;;  %v2859_v29 = vld [vmem:[#allocation5 + $0x70] sm:$0xff]  }
 0x10d   :  { %v298_v27 = vadd.f32 %v297_v25, %v3518_v58  ;;  %v299_v28 = vpop.f32.mrb[5].mxu0  ;;  %v378_v40 = vadd.f32 %v377_v37, %v3518_v58  ;;  %v379_v41 = vpop.f32.mrb[5].mxu1  ;;  %v2858_v25 = vld [vmem:[#allocation5 + $0x28] sm:$0xff]  }
 0x10e   :  { %v300_v30 = vadd.f32 %v299_v28, %v3522_v59  ;;  %v301_v31 = vpop.f32.mrb[6].mxu0  ;;  %778 = vmatprep.mubr.bf16.mxu1 %v511_v24  ;;  %v380_v44 = vadd.f32 %v379_v41, %v3522_v59  ;;  %v381_v45 = vpop.f32.mrb[6].mxu1  ;;  %v2860_v41 = vld [vmem:[#allocation5 + $0x30] sm:$0xff]  }
 0x10f   :  { %v302_v34 = vadd.f32 %v301_v31, %v3518_v58  ;;  %v303_v35 = vpop.f32.mrb[7].mxu0  ;;  %779 = vmatmul.mubr.bf16.vlgmr.msra.gmra.mrb[32].mxu1 %v510_v20  ;;  %v450_v42 = vmax.f32 %v298_v27, 0.0  ;;  %v482_v48 = vmax.f32 %v378_v40, 0.0  ;;  %v382_v49 = vadd.f32 %v381_v45, %v3518_v58  ;;  %v383_v50 = vpop.f32.mrb[7].mxu1  ;;  %2664 = vmatpush3.bf16.msra.mxu0 %v2858_v25 }
 0x110   :  { %v304_v39 = vadd.f32 %v303_v35, %v3522_v59  ;;  %v451_v46 = vmax.f32 %v300_v30, 0.0  ;;  %v483_v56 = vmax.f32 %v380_v44, 0.0  ;;  %v384_v60 = vadd.f32 %v383_v50, %v3522_v59  ;;  %2665 = vmatprep.subr.bf16.mxu0 %v2859_v29 }
 0x111   :  { %v452_v43 = vmax.f32 %v302_v34, 0.0  ;;  %v484_v0 = vmax.f32 %v382_v49, 0.0 }
 0x112   :  { %v453_v47 = vmax.f32 %v304_v39, 0.0  ;;  %v485_v3 = vmax.f32 %v384_v60, 0.0 }
 0x113   :  { %v512_v52 = vpack.c.bf16 %v452_v43, %v450_v42  ;;  %v3546_v6 = vpack.c.bf16 %v484_v0, %v482_v48  ;;  %2666 = vmatpush3.bf16.msra.mxu0 %v2860_v41 }
 0x114   :  { %v513_v62 = vpack.c.bf16 %v453_v47, %v451_v46  ;;  %v307_v63 = vpop.f32.mrb[8].mxu0  ;;  %v3549_v10 = vpack.c.bf16 %v485_v3, %v483_v56  ;;  %v387_v11 = vpop.f32.mrb[8].mxu1 }
 0x115   :  { %v308_v1 = vadd.f32 %v307_v63, %v3518_v58  ;;  %v309_v2 = vpop.f32.mrb[9].mxu0  ;;  %v388_v14 = vadd.f32 %v387_v11, %v3518_v58  ;;  %v389_v15 = vpop.f32.mrb[9].mxu1 }
 0x116   :  { %v310_v4 = vadd.f32 %v309_v2, %v3522_v59  ;;  %v311_v5 = vpop.f32.mrb[10].mxu0  ;;  %788 = vmatprep.mubr.bf16.mxu1 %v513_v62  ;;  %v390_v18 = vadd.f32 %v389_v15, %v3522_v59  ;;  %v391_v19 = vpop.f32.mrb[10].mxu1 }
 0x117   :  { %v312_v8 = vadd.f32 %v311_v5, %v3518_v58  ;;  %v313_v9 = vpop.f32.mrb[11].mxu0  ;;  %789 = vmatmul.mubr.bf16.gmra.mrb[36].mxu1 %v512_v52  ;;  %v454_v16 = vmax.f32 %v308_v1, 0.0  ;;  %v486_v22 = vmax.f32 %v388_v14, 0.0  ;;  %v392_v23 = vadd.f32 %v391_v19, %v3518_v58  ;;  %v393_v24 = vpop.f32.mrb[11].mxu1 }
 0x118   :  { %v314_v13 = vadd.f32 %v313_v9, %v3522_v59  ;;  %v455_v20 = vmax.f32 %v310_v4, 0.0  ;;  %v487_v27 = vmax.f32 %v390_v18, 0.0  ;;  %v394_v28 = vadd.f32 %v393_v24, %v3522_v59 }
 0x119   :  { %v456_v17 = vmax.f32 %v312_v8, 0.0  ;;  %v488_v33 = vmax.f32 %v392_v23, 0.0 }
 0x11a   :  { %v457_v21 = vmax.f32 %v314_v13, 0.0  ;;  %v489_v37 = vmax.f32 %v394_v28, 0.0 }
 0x11b   :  { %v514_v26 = vpack.c.bf16 %v456_v17, %v454_v16  ;;  %v3558_v40 = vpack.c.bf16 %v488_v33, %v486_v22 }
 0x11c   :  { %v515_v30 = vpack.c.bf16 %v457_v21, %v455_v20  ;;  %v317_v31 = vpop.f32.mrb[12].mxu0  ;;  %v3561_v44 = vpack.c.bf16 %v489_v37, %v487_v27  ;;  %v397_v45 = vpop.f32.mrb[12].mxu1 }
 0x11d   :  { %v318_v34 = vadd.f32 %v317_v31, %v3518_v58  ;;  %v319_v35 = vpop.f32.mrb[13].mxu0  ;;  %v398_v47 = vadd.f32 %v397_v45, %v3518_v58  ;;  %v399_v48 = vpop.f32.mrb[13].mxu1 }
 0x11e   :  { %v320_v38 = vadd.f32 %v319_v35, %v3522_v59  ;;  %v321_v39 = vpop.f32.mrb[14].mxu0  ;;  %798 = vmatprep.mubr.bf16.mxu1 %v515_v30  ;;  %v400_v51 = vadd.f32 %v399_v48, %v3522_v59  ;;  %v401_v52 = vpop.f32.mrb[14].mxu1 }
 0x11f   :  { %v322_v42 = vadd.f32 %v321_v39, %v3518_v58  ;;  %v323_v43 = vpop.f32.mrb[15].mxu0  ;;  %799 = vmatmul.mubr.bf16.gmra.mrb[40].mxu1 %v514_v26  ;;  %v458_v49 = vmax.f32 %v318_v34, 0.0  ;;  %v490_v61 = vmax.f32 %v398_v47, 0.0  ;;  %v402_v62 = vadd.f32 %v401_v52, %v3518_v58  ;;  %v403_v63 = vpop.f32.mrb[15].mxu1 }
 0x120   :  { %v324_v46 = vadd.f32 %v323_v43, %v3522_v59  ;;  %v459_v56 = vmax.f32 %v320_v38, 0.0  ;;  %v491_v1 = vmax.f32 %v400_v51, 0.0  ;;  %v404_v2 = vadd.f32 %v403_v63, %v3522_v59 }
 0x121   :  { %v460_v50 = vmax.f32 %v322_v42, 0.0  ;;  %v492_v5 = vmax.f32 %v402_v62, 0.0 }
 0x122   :  { %v461_v60 = vmax.f32 %v324_v46, 0.0  ;;  %v493_v9 = vmax.f32 %v404_v2, 0.0 }
 0x123   :  { %v516_v0 = vpack.c.bf16 %v460_v50, %v458_v49  ;;  %v3570_v13 = vpack.c.bf16 %v492_v5, %v490_v61 }
 0x124   :  { %v517_v3 = vpack.c.bf16 %v461_v60, %v459_v56  ;;  %v327_v4 = vpop.f32.mrb[16].mxu0  ;;  %v3573_v16 = vpack.c.bf16 %v493_v9, %v491_v1  ;;  %v407_v17 = vpop.f32.mrb[16].mxu1 }
 0x125   :  { %v328_v7 = vadd.f32 %v327_v4, %v3518_v58  ;;  %v329_v8 = vpop.f32.mrb[17].mxu0  ;;  %v408_v19 = vadd.f32 %v407_v17, %v3518_v58  ;;  %v409_v20 = vpop.f32.mrb[17].mxu1 }
 0x126   :  { %v330_v11 = vadd.f32 %v329_v8, %v3522_v59  ;;  %v331_v12 = vpop.f32.mrb[18].mxu0  ;;  %808 = vmatprep.mubr.bf16.mxu1 %v517_v3  ;;  %v410_v23 = vadd.f32 %v409_v20, %v3522_v59  ;;  %v411_v24 = vpop.f32.mrb[18].mxu1 }
 0x127   :  { %v332_v14 = vadd.f32 %v331_v12, %v3518_v58  ;;  %v333_v15 = vpop.f32.mrb[19].mxu0  ;;  %809 = vmatmul.mubr.bf16.gmra.mrb[44].mxu1 %v516_v0  ;;  %v462_v21 = vmax.f32 %v328_v7, 0.0  ;;  %v494_v27 = vmax.f32 %v408_v19, 0.0  ;;  %v412_v28 = vadd.f32 %v411_v24, %v3518_v58  ;;  %v413_v29 = vpop.f32.mrb[19].mxu1 }
 0x128   :  { %v334_v18 = vadd.f32 %v333_v15, %v3522_v59  ;;  %v463_v25 = vmax.f32 %v330_v11, 0.0  ;;  %v495_v31 = vmax.f32 %v410_v23, 0.0  ;;  %v414_v33 = vadd.f32 %v413_v29, %v3522_v59 }
 0x129   :  { %v464_v22 = vmax.f32 %v332_v14, 0.0  ;;  %v496_v37 = vmax.f32 %v412_v28, 0.0 }
 0x12a   :  { %v465_v26 = vmax.f32 %v334_v18, 0.0  ;;  %v497_v41 = vmax.f32 %v414_v33, 0.0 }
 0x12b   :  { %v518_v30 = vpack.c.bf16 %v464_v22, %v462_v21  ;;  %v3582_v45 = vpack.c.bf16 %v496_v37, %v494_v27 }
 0x12c   :  { %v519_v34 = vpack.c.bf16 %v465_v26, %v463_v25  ;;  %v337_v35 = vpop.f32.mrb[20].mxu0  ;;  %v3585_v48 = vpack.c.bf16 %v497_v41, %v495_v31  ;;  %v417_v49 = vpop.f32.mrb[20].mxu1 }
 0x12d   :  { %v338_v38 = vadd.f32 %v337_v35, %v3518_v58  ;;  %v339_v39 = vpop.f32.mrb[21].mxu0  ;;  %v418_v51 = vadd.f32 %v417_v49, %v3518_v58  ;;  %v419_v52 = vpop.f32.mrb[21].mxu1 }
 0x12e   :  { %v340_v42 = vadd.f32 %v339_v39, %v3522_v59  ;;  %v341_v43 = vpop.f32.mrb[22].mxu0  ;;  %818 = vmatprep.mubr.bf16.mxu1 %v519_v34  ;;  %v420_v61 = vadd.f32 %v419_v52, %v3522_v59  ;;  %v421_v62 = vpop.f32.mrb[22].mxu1 }
 0x12f   :  { %v342_v46 = vadd.f32 %v341_v43, %v3518_v58  ;;  %v343_v47 = vpop.f32.mrb[23].mxu0  ;;  %819 = vmatmul.mubr.bf16.gmra.mrb[48].mxu1 %v518_v30  ;;  %v466_v56 = vmax.f32 %v338_v38, 0.0  ;;  %v498_v1 = vmax.f32 %v418_v51, 0.0  ;;  %v422_v2 = vadd.f32 %v421_v62, %v3518_v58  ;;  %v423_v3 = vpop.f32.mrb[23].mxu1 }
 0x130   :  { %v344_v50 = vadd.f32 %v343_v47, %v3522_v59  ;;  %v467_v63 = vmax.f32 %v340_v42, 0.0  ;;  %v499_v5 = vmax.f32 %v420_v61, 0.0  ;;  %v424_v7 = vadd.f32 %v423_v3, %v3522_v59 }
 0x131   :  { %v468_v60 = vmax.f32 %v342_v46, 0.0  ;;  %v500_v11 = vmax.f32 %v422_v2, 0.0 }
 0x132   :  { %v469_v0 = vmax.f32 %v344_v50, 0.0  ;;  %v501_v15 = vmax.f32 %v424_v7, 0.0 }
 0x133   :  { %v520_v4 = vpack.c.bf16 %v468_v60, %v466_v56  ;;  %v3594_v19 = vpack.c.bf16 %v500_v11, %v498_v1 }
 0x134   :  { %v521_v8 = vpack.c.bf16 %v469_v0, %v467_v63  ;;  %v347_v9 = vpop.f32.mrb[24].mxu0  ;;  %v3597_v22 = vpack.c.bf16 %v501_v15, %v499_v5  ;;  %v427_v23 = vpop.f32.mrb[24].mxu1 }
 0x135   :  { %v348_v12 = vadd.f32 %v347_v9, %v3518_v58  ;;  %v349_v14 = vpop.f32.mrb[25].mxu0  ;;  %v428_v25 = vadd.f32 %v427_v23, %v3518_v58  ;;  %v429_v26 = vpop.f32.mrb[25].mxu1 }
 0x136   :  { %v350_v17 = vadd.f32 %v349_v14, %v3522_v59  ;;  %v351_v18 = vpop.f32.mrb[26].mxu0  ;;  %828 = vmatprep.mubr.bf16.mxu1 %v521_v8  ;;  %v430_v29 = vadd.f32 %v429_v26, %v3522_v59  ;;  %v431_v30 = vpop.f32.mrb[26].mxu1 }
 0x137   :  { %v352_v20 = vadd.f32 %v351_v18, %v3518_v58  ;;  %v353_v21 = vpop.f32.mrb[27].mxu0  ;;  %829 = vmatmul.mubr.bf16.gmra.mrb[52].mxu1 %v520_v4  ;;  %v470_v27 = vmax.f32 %v348_v12, 0.0  ;;  %v502_v34 = vmax.f32 %v428_v25, 0.0  ;;  %v432_v35 = vadd.f32 %v431_v30, %v3518_v58  ;;  %v433_v37 = vpop.f32.mrb[27].mxu1 }
 0x138   :  { %v354_v24 = vadd.f32 %v353_v21, %v3522_v59  ;;  %v471_v31 = vmax.f32 %v350_v17, 0.0  ;;  %v503_v39 = vmax.f32 %v430_v29, 0.0  ;;  %v434_v41 = vadd.f32 %v433_v37, %v3522_v59 }
 0x139   :  { %v472_v28 = vmax.f32 %v352_v20, 0.0  ;;  %v504_v46 = vmax.f32 %v432_v35, 0.0 }
 0x13a   :  { %v473_v33 = vmax.f32 %v354_v24, 0.0  ;;  %v505_v50 = vmax.f32 %v434_v41, 0.0 }
 0x13b   :  { %v522_v38 = vpack.c.bf16 %v472_v28, %v470_v27  ;;  %v538_v56 = vpack.c.bf16 %v504_v46, %v502_v34 }
 0x13c   :  { %v523_v42 = vpack.c.bf16 %v473_v33, %v471_v31  ;;  %v357_v43 = vpop.f32.mrb[28].mxu0  ;;  %v539_v62 = vpack.c.bf16 %v505_v50, %v503_v39  ;;  %v437_v63 = vpop.f32.mrb[28].mxu1 }
 0x13d   :  { %v358_v47 = vadd.f32 %v357_v43, %v3518_v58  ;;  %v359_v49 = vpop.f32.mrb[29].mxu0  ;;  %v438_v1 = vadd.f32 %v437_v63, %v3518_v58  ;;  %v439_v2 = vpop.f32.mrb[29].mxu1 }
 0x13e   :  { %v360_v51 = vadd.f32 %v359_v49, %v3522_v59  ;;  %v361_v52 = vpop.f32.mrb[30].mxu0  ;;  %838 = vmatprep.mubr.bf16.mxu1 %v523_v42  ;;  %v440_v5 = vadd.f32 %v439_v2, %v3522_v59  ;;  %v441_v7 = vpop.f32.mrb[30].mxu1 }
 0x13f   :  { %v362_v60 = vadd.f32 %v361_v52, %v3518_v58  ;;  %v363_v61 = vpop.f32.mrb[31].mxu0  ;;  %839 = vmatmul.mubr.bf16.gmra.mrb[56].mxu1 %v522_v38  ;;  %v474_v3 = vmax.f32 %v358_v47, 0.0  ;;  %v506_v11 = vmax.f32 %v438_v1, 0.0  ;;  %v442_v12 = vadd.f32 %v441_v7, %v3518_v58  ;;  %v443_v14 = vpop.f32.mrb[31].mxu1  ;;  %v2861_v58 = vld [vmem:[#allocation5 + $0x78] sm:$0xff]  }
 0x140   :  { %v364_v0 = vadd.f32 %v363_v61, %v3522_v59  ;;  %v475_v8 = vmax.f32 %v360_v51, 0.0  ;;  %v507_v17 = vmax.f32 %v440_v5, 0.0  ;;  %v444_v18 = vadd.f32 %v443_v14, %v3522_v59  ;;  %v2862_v59 = vld [vmem:[#allocation5 + $0x38] sm:$0xff]   ;;  %2667 = vmatprep.subr.bf16.mxu0 %v2861_v58 }
 0x141   :  { %v476_v4 = vmax.f32 %v362_v60, 0.0  ;;  %v508_v21 = vmax.f32 %v442_v12, 0.0  ;;  %2668 = vmatpush3.bf16.msra.mxu0 %v2862_v59 }
 0x142   :  { %v477_v9 = vmax.f32 %v364_v0, 0.0  ;;  %v509_v23 = vmax.f32 %v444_v18, 0.0 }
 0x143   :  { %v524_v15 = vpack.c.bf16 %v476_v4, %v474_v3  ;;  %v540_v24 = vpack.c.bf16 %v508_v21, %v506_v11 }
 0x144   :  { %v525_v20 = vpack.c.bf16 %v477_v9, %v475_v8  ;;  %v541_v25 = vpack.c.bf16 %v509_v23, %v507_v17 }
 0x146   :  { %848 = vmatprep.mubr.bf16.mxu1 %v525_v20 }
 0x147   :  { %849 = vmatmul.mubr.bf16.gmra.mrb[60].mxu1 %v524_v15 }
 0x148   :  { %858 = vmatprep.mubr.bf16.mxu1 %v3537_v36 }
 0x14f   :  { %859 = vmatmul.mubr.bf16.gmra.mrb[64].mxu1 %v3534_v32  ;;  %v574_v32 = vld [vmem:[%s5051_s4] sm:$0x3] }
 0x150   :  { %868 = vmatprep.mubr.bf16.mxu1 %v3549_v10  ;;  %v3629_v36 = vrot.slane %v574_v32, %v96_v55 }
 0x157   :  { %869 = vmatmul.mubr.bf16.gmra.mrb[68].mxu1 %v3546_v6  ;;  %v3633_v6 = vrot.slane %v574_v32, %v100_v57 }
 0x158   :  { %878 = vmatprep.mubr.bf16.mxu1 %v3561_v44 }
 0x15f   :  { %879 = vmatmul.mubr.bf16.gmra.mrb[72].mxu1 %v3558_v40 }
 0x160   :  { %888 = vmatprep.mubr.bf16.mxu1 %v3573_v16 }
 0x167   :  { %889 = vmatmul.mubr.bf16.gmra.mrb[76].mxu1 %v3570_v13 }
 0x168   :  { %898 = vmatprep.mubr.bf16.mxu1 %v3585_v48 }
 0x16f   :  { %899 = vmatmul.mubr.bf16.gmra.mrb[80].mxu1 %v3582_v45 }
 0x170   :  { %908 = vmatprep.mubr.bf16.mxu1 %v3597_v22 }
 0x177   :  { %909 = vmatmul.mubr.bf16.gmra.mrb[84].mxu1 %v3594_v19 }
 0x178   :  { %918 = vmatprep.mubr.bf16.mxu1 %v539_v62 }
 0x17f   :  { %919 = vmatmul.mubr.bf16.gmra.mrb[88].mxu1 %v538_v56 }
 0x180   :  { %928 = vmatprep.mubr.bf16.mxu1 %v541_v25 }
 0x187   :  { %929 = vmatmul.mubr.bf16.gmra.mrb[92].mxu1 %v540_v24 }
 0x1e2   :  { %v780_v10 = vpop.f32.mrb[32].mxu1 }
 0x1e3   :  { %v781_v40 = vadd.f32 %v780_v10, %v3629_v36  ;;  %v782_v44 = vpop.f32.mrb[33].mxu1 }
 0x1e4   :  { %v783_v13 = vadd.f32 %v782_v44, %v3633_v6  ;;  %v784_v16 = vpop.f32.mrb[34].mxu1 }
 0x1e5   :  { %v785_v45 = vadd.f32 %v784_v16, %v3629_v36  ;;  %v786_v48 = vpop.f32.mrb[35].mxu1  ;;  %v939_v22 = vmax.f32 %v781_v40, 0.0 }
 0x1e6   :  { %v787_v19 = vadd.f32 %v786_v48, %v3633_v6  ;;  %v940_v55 = vmax.f32 %v783_v13, 0.0 }
 0x1e7   :  { %v941_v26 = vmax.f32 %v785_v45, 0.0 }
 0x1e8   :  { %v942_v27 = vmax.f32 %v787_v19, 0.0 }
 0x1e9   :  { %v1003_v28 = vpack.c.bf16 %v941_v26, %v939_v22 }
 0x1ea   :  { %v1004_v54 = vpack.c.bf16 %v942_v27, %v940_v55  ;;  %v790_v57 = vpop.f32.mrb[36].mxu1 }
 0x1eb   :  { %v791_v29 = vadd.f32 %v790_v57, %v3629_v36  ;;  %v792_v30 = vpop.f32.mrb[37].mxu1 }
 0x1ec   :  { %v793_v31 = vadd.f32 %v792_v30, %v3633_v6  ;;  %v794_v33 = vpop.f32.mrb[38].mxu1  ;;  %1202 = vmatprep.mubr.bf16.mxu0 %v1004_v54 }
 0x1ed   :  { %v795_v34 = vadd.f32 %v794_v33, %v3629_v36  ;;  %v796_v35 = vpop.f32.mrb[39].mxu1  ;;  %1203 = vmatmul.mubr.bf16.vlgmr.msra.gmra.mrb[32].mxu0 %v1003_v28  ;;  %v943_v38 = vmax.f32 %v791_v29, 0.0 }
 0x1ee   :  { %v797_v37 = vadd.f32 %v796_v35, %v3633_v6  ;;  %v944_v41 = vmax.f32 %v793_v31, 0.0 }
 0x1ef   :  { %v945_v39 = vmax.f32 %v795_v34, 0.0 }
 0x1f0   :  { %v946_v42 = vmax.f32 %v797_v37, 0.0 }
 0x1f1   :  { %v1005_v43 = vpack.c.bf16 %v945_v39, %v943_v38 }
 0x1f2   :  { %v1006_v46 = vpack.c.bf16 %v946_v42, %v944_v41  ;;  %v800_v47 = vpop.f32.mrb[40].mxu1 }
 0x1f3   :  { %v801_v49 = vadd.f32 %v800_v47, %v3629_v36  ;;  %v802_v50 = vpop.f32.mrb[41].mxu1 }
 0x1f4   :  { %v803_v51 = vadd.f32 %v802_v50, %v3633_v6  ;;  %v804_v52 = vpop.f32.mrb[42].mxu1  ;;  %1210 = vmatprep.mubr.bf16.mxu0 %v1006_v46 }
 0x1f5   :  { %v805_v56 = vadd.f32 %v804_v52, %v3629_v36  ;;  %v806_v60 = vpop.f32.mrb[43].mxu1  ;;  %1211 = vmatmul.mubr.bf16.gmra.mrb[36].mxu0 %v1005_v43  ;;  %v947_v62 = vmax.f32 %v801_v49, 0.0 }
 0x1f6   :  { %v807_v61 = vadd.f32 %v806_v60, %v3633_v6  ;;  %v948_v0 = vmax.f32 %v803_v51, 0.0 }
 0x1f7   :  { %v949_v63 = vmax.f32 %v805_v56, 0.0 }
 0x1f8   :  { %v950_v1 = vmax.f32 %v807_v61, 0.0 }
 0x1f9   :  { %v1007_v2 = vpack.c.bf16 %v949_v63, %v947_v62 }
 0x1fa   :  { %v1008_v3 = vpack.c.bf16 %v950_v1, %v948_v0  ;;  %v810_v4 = vpop.f32.mrb[44].mxu1 }
 0x1fb   :  { %v811_v5 = vadd.f32 %v810_v4, %v3629_v36  ;;  %v812_v7 = vpop.f32.mrb[45].mxu1 }
 0x1fc   :  { %v813_v8 = vadd.f32 %v812_v7, %v3633_v6  ;;  %v814_v9 = vpop.f32.mrb[46].mxu1  ;;  %1218 = vmatprep.mubr.bf16.mxu0 %v1008_v3 }
 0x1fd   :  { %v815_v11 = vadd.f32 %v814_v9, %v3629_v36  ;;  %v816_v12 = vpop.f32.mrb[47].mxu1  ;;  %1219 = vmatmul.mubr.bf16.gmra.mrb[40].mxu0 %v1007_v2  ;;  %v951_v15 = vmax.f32 %v811_v5, 0.0 }
 0x1fe   :  { %v817_v14 = vadd.f32 %v816_v12, %v3633_v6  ;;  %v952_v18 = vmax.f32 %v813_v8, 0.0 }
 0x1ff   :  { %v953_v17 = vmax.f32 %v815_v11, 0.0 }
 0x200   :  { %v954_v20 = vmax.f32 %v817_v14, 0.0 }
 0x201   :  { %v1009_v21 = vpack.c.bf16 %v953_v17, %v951_v15 }
 0x202   :  { %v1010_v23 = vpack.c.bf16 %v954_v20, %v952_v18  ;;  %v820_v24 = vpop.f32.mrb[48].mxu1 }
 0x203   :  { %v821_v25 = vadd.f32 %v820_v24, %v3629_v36  ;;  %v822_v58 = vpop.f32.mrb[49].mxu1 }
 0x204   :  { %v823_v59 = vadd.f32 %v822_v58, %v3633_v6  ;;  %v824_v32 = vpop.f32.mrb[50].mxu1  ;;  %1226 = vmatprep.mubr.bf16.mxu0 %v1010_v23 }
 0x205   :  { %v825_v10 = vadd.f32 %v824_v32, %v3629_v36  ;;  %v826_v40 = vpop.f32.mrb[51].mxu1  ;;  %1227 = vmatmul.mubr.bf16.gmra.mrb[44].mxu0 %v1009_v21  ;;  %v955_v13 = vmax.f32 %v821_v25, 0.0 }
 0x206   :  { %v827_v44 = vadd.f32 %v826_v40, %v3633_v6  ;;  %v956_v45 = vmax.f32 %v823_v59, 0.0 }
 0x207   :  { %v957_v16 = vmax.f32 %v825_v10, 0.0 }
 0x208   :  { %v958_v48 = vmax.f32 %v827_v44, 0.0 }
 0x209   :  { %v1011_v19 = vpack.c.bf16 %v957_v16, %v955_v13 }
 0x20a   :  { %v1012_v22 = vpack.c.bf16 %v958_v48, %v956_v45  ;;  %v830_v26 = vpop.f32.mrb[52].mxu1 }
 0x20b   :  { %v831_v55 = vadd.f32 %v830_v26, %v3629_v36  ;;  %v832_v27 = vpop.f32.mrb[53].mxu1 }
 0x20c   :  { %v833_v28 = vadd.f32 %v832_v27, %v3633_v6  ;;  %v834_v54 = vpop.f32.mrb[54].mxu1  ;;  %1234 = vmatprep.mubr.bf16.mxu0 %v1012_v22 }
 0x20d   :  { %v835_v57 = vadd.f32 %v834_v54, %v3629_v36  ;;  %v836_v29 = vpop.f32.mrb[55].mxu1  ;;  %1235 = vmatmul.mubr.bf16.gmra.mrb[48].mxu0 %v1011_v19  ;;  %v959_v31 = vmax.f32 %v831_v55, 0.0 }
 0x20e   :  { %v837_v30 = vadd.f32 %v836_v29, %v3633_v6  ;;  %v960_v34 = vmax.f32 %v833_v28, 0.0 }
 0x20f   :  { %v961_v33 = vmax.f32 %v835_v57, 0.0 }
 0x210   :  { %v962_v35 = vmax.f32 %v837_v30, 0.0 }
 0x211   :  { %v1013_v37 = vpack.c.bf16 %v961_v33, %v959_v31 }
 0x212   :  { %v1014_v38 = vpack.c.bf16 %v962_v35, %v960_v34  ;;  %v840_v39 = vpop.f32.mrb[56].mxu1 }
 0x213   :  { %v841_v41 = vadd.f32 %v840_v39, %v3629_v36  ;;  %v842_v42 = vpop.f32.mrb[57].mxu1 }
 0x214   :  { %v843_v43 = vadd.f32 %v842_v42, %v3633_v6  ;;  %v844_v46 = vpop.f32.mrb[58].mxu1  ;;  %1242 = vmatprep.mubr.bf16.mxu0 %v1014_v38 }
 0x215   :  { %v845_v47 = vadd.f32 %v844_v46, %v3629_v36  ;;  %v846_v49 = vpop.f32.mrb[59].mxu1  ;;  %1243 = vmatmul.mubr.bf16.gmra.mrb[52].mxu0 %v1013_v37  ;;  %v963_v51 = vmax.f32 %v841_v41, 0.0 }
 0x216   :  { %v847_v50 = vadd.f32 %v846_v49, %v3633_v6  ;;  %v964_v56 = vmax.f32 %v843_v43, 0.0 }
 0x217   :  { %v965_v52 = vmax.f32 %v845_v47, 0.0 }
 0x218   :  { %v966_v60 = vmax.f32 %v847_v50, 0.0 }
 0x219   :  { %v1015_v61 = vpack.c.bf16 %v965_v52, %v963_v51 }
 0x21a   :  { %v1016_v62 = vpack.c.bf16 %v966_v60, %v964_v56  ;;  %v850_v63 = vpop.f32.mrb[60].mxu1 }
 0x21b   :  { %v851_v0 = vadd.f32 %v850_v63, %v3629_v36  ;;  %v852_v1 = vpop.f32.mrb[61].mxu1 }
 0x21c   :  { %v853_v2 = vadd.f32 %v852_v1, %v3633_v6  ;;  %v854_v3 = vpop.f32.mrb[62].mxu1  ;;  %1250 = vmatprep.mubr.bf16.mxu0 %v1016_v62 }
 0x21d   :  { %v855_v4 = vadd.f32 %v854_v3, %v3629_v36  ;;  %v856_v5 = vpop.f32.mrb[63].mxu1  ;;  %1251 = vmatmul.mubr.bf16.gmra.mrb[56].mxu0 %v1015_v61  ;;  %v967_v8 = vmax.f32 %v851_v0, 0.0 }
 0x21e   :  { %v857_v7 = vadd.f32 %v856_v5, %v3633_v6  ;;  %v968_v11 = vmax.f32 %v853_v2, 0.0 }
 0x21f   :  { %v969_v9 = vmax.f32 %v855_v4, 0.0 }
 0x220   :  { %v970_v12 = vmax.f32 %v857_v7, 0.0 }
 0x221   :  { %v1017_v14 = vpack.c.bf16 %v969_v9, %v967_v8 }
 0x222   :  { %v1018_v15 = vpack.c.bf16 %v970_v12, %v968_v11  ;;  %v860_v17 = vpop.f32.mrb[64].mxu1 }
 0x223   :  { %v861_v18 = vadd.f32 %v860_v17, %v3629_v36  ;;  %v862_v20 = vpop.f32.mrb[65].mxu1 }
 0x224   :  { %v863_v21 = vadd.f32 %v862_v20, %v3633_v6  ;;  %v864_v23 = vpop.f32.mrb[66].mxu1  ;;  %1258 = vmatprep.mubr.bf16.mxu0 %v1018_v15 }
 0x225   :  { %v865_v24 = vadd.f32 %v864_v23, %v3629_v36  ;;  %v866_v25 = vpop.f32.mrb[67].mxu1  ;;  %1259 = vmatmul.mubr.bf16.gmra.mrb[60].mxu0 %v1017_v14  ;;  %v971_v59 = vmax.f32 %v861_v18, 0.0 }
 0x226   :  { %v867_v58 = vadd.f32 %v866_v25, %v3633_v6  ;;  %v972_v10 = vmax.f32 %v863_v21, 0.0 }
 0x227   :  { %v973_v32 = vmax.f32 %v865_v24, 0.0 }
 0x228   :  { %v974_v40 = vmax.f32 %v867_v58, 0.0 }
 0x229   :  { %v1019_v44 = vpack.c.bf16 %v973_v32, %v971_v59 }
 0x22a   :  { %v1020_v13 = vpack.c.bf16 %v974_v40, %v972_v10  ;;  %v870_v16 = vpop.f32.mrb[68].mxu1 }
 0x22b   :  { %v871_v45 = vadd.f32 %v870_v16, %v3629_v36  ;;  %v872_v48 = vpop.f32.mrb[69].mxu1 }
 0x22c   :  { %v873_v19 = vadd.f32 %v872_v48, %v3633_v6  ;;  %v874_v22 = vpop.f32.mrb[70].mxu1  ;;  %1266 = vmatprep.mubr.bf16.mxu0 %v1020_v13 }
 0x22d   :  { %v875_v26 = vadd.f32 %v874_v22, %v3629_v36  ;;  %v876_v55 = vpop.f32.mrb[71].mxu1  ;;  %1267 = vmatmul.mubr.bf16.gmra.mrb[64].mxu0 %v1019_v44  ;;  %v975_v28 = vmax.f32 %v871_v45, 0.0 }
 0x22e   :  { %v877_v27 = vadd.f32 %v876_v55, %v3633_v6  ;;  %v976_v57 = vmax.f32 %v873_v19, 0.0 }
 0x22f   :  { %v977_v54 = vmax.f32 %v875_v26, 0.0 }
 0x230   :  { %v978_v29 = vmax.f32 %v877_v27, 0.0 }
 0x231   :  { %v1021_v30 = vpack.c.bf16 %v977_v54, %v975_v28 }
 0x232   :  { %v1022_v31 = vpack.c.bf16 %v978_v29, %v976_v57  ;;  %v880_v33 = vpop.f32.mrb[72].mxu1 }
 0x233   :  { %v881_v34 = vadd.f32 %v880_v33, %v3629_v36  ;;  %v882_v35 = vpop.f32.mrb[73].mxu1 }
 0x234   :  { %v883_v37 = vadd.f32 %v882_v35, %v3633_v6  ;;  %v884_v38 = vpop.f32.mrb[74].mxu1  ;;  %1274 = vmatprep.mubr.bf16.mxu0 %v1022_v31 }
 0x235   :  { %v885_v39 = vadd.f32 %v884_v38, %v3629_v36  ;;  %v886_v41 = vpop.f32.mrb[75].mxu1  ;;  %1275 = vmatmul.mubr.bf16.gmra.mrb[68].mxu0 %v1021_v30  ;;  %v979_v43 = vmax.f32 %v881_v34, 0.0 }
 0x236   :  { %v887_v42 = vadd.f32 %v886_v41, %v3633_v6  ;;  %v980_v47 = vmax.f32 %v883_v37, 0.0 }
 0x237   :  { %v981_v46 = vmax.f32 %v885_v39, 0.0 }
 0x238   :  { %v982_v49 = vmax.f32 %v887_v42, 0.0 }
 0x239   :  { %v1023_v50 = vpack.c.bf16 %v981_v46, %v979_v43 }
 0x23a   :  { %v1024_v51 = vpack.c.bf16 %v982_v49, %v980_v47  ;;  %v890_v52 = vpop.f32.mrb[76].mxu1 }
 0x23b   :  { %v891_v56 = vadd.f32 %v890_v52, %v3629_v36  ;;  %v892_v60 = vpop.f32.mrb[77].mxu1 }
 0x23c   :  { %v893_v61 = vadd.f32 %v892_v60, %v3633_v6  ;;  %v894_v62 = vpop.f32.mrb[78].mxu1  ;;  %1282 = vmatprep.mubr.bf16.mxu0 %v1024_v51 }
 0x23d   :  { %v895_v63 = vadd.f32 %v894_v62, %v3629_v36  ;;  %v896_v0 = vpop.f32.mrb[79].mxu1  ;;  %1283 = vmatmul.mubr.bf16.gmra.mrb[72].mxu0 %v1023_v50  ;;  %v983_v2 = vmax.f32 %v891_v56, 0.0 }
 0x23e   :  { %v897_v1 = vadd.f32 %v896_v0, %v3633_v6  ;;  %v984_v4 = vmax.f32 %v893_v61, 0.0 }
 0x23f   :  { %v985_v3 = vmax.f32 %v895_v63, 0.0 }
 0x240   :  { %v986_v5 = vmax.f32 %v897_v1, 0.0 }
 0x241   :  { %v1025_v7 = vpack.c.bf16 %v985_v3, %v983_v2 }
 0x242   :  { %v1026_v8 = vpack.c.bf16 %v986_v5, %v984_v4  ;;  %v900_v9 = vpop.f32.mrb[80].mxu1  ;;  %v3702_v4 = vld [vmem:[%s5053_s6] ss:$0 sm:$0xff] }
 0x243   :  { %v901_v11 = vadd.f32 %v900_v9, %v3629_v36  ;;  %v902_v12 = vpop.f32.mrb[81].mxu1 }
 0x244   :  { %v903_v14 = vadd.f32 %v902_v12, %v3633_v6  ;;  %v904_v15 = vpop.f32.mrb[82].mxu1  ;;  %1290 = vmatprep.mubr.bf16.mxu0 %v1026_v8 }
 0x245   :  { %v905_v17 = vadd.f32 %v904_v15, %v3629_v36  ;;  %v906_v18 = vpop.f32.mrb[83].mxu1  ;;  %1291 = vmatmul.mubr.bf16.gmra.mrb[76].mxu0 %v1025_v7  ;;  %v987_v21 = vmax.f32 %v901_v11, 0.0 }
 0x246   :  { %v907_v20 = vadd.f32 %v906_v18, %v3633_v6  ;;  %v988_v24 = vmax.f32 %v903_v14, 0.0 }
 0x247   :  { %v989_v23 = vmax.f32 %v905_v17, 0.0 }
 0x248   :  { %v990_v25 = vmax.f32 %v907_v20, 0.0 }
 0x249   :  { %v1027_v58 = vpack.c.bf16 %v989_v23, %v987_v21 }
 0x24a   :  { %v1028_v59 = vpack.c.bf16 %v990_v25, %v988_v24  ;;  %v910_v32 = vpop.f32.mrb[84].mxu1 }
 0x24b   :  { %v911_v10 = vadd.f32 %v910_v32, %v3629_v36  ;;  %v912_v40 = vpop.f32.mrb[85].mxu1 }
 0x24c   :  { %v913_v44 = vadd.f32 %v912_v40, %v3633_v6  ;;  %v914_v13 = vpop.f32.mrb[86].mxu1  ;;  %1298 = vmatprep.mubr.bf16.mxu0 %v1028_v59 }
 0x24d   :  { %v915_v16 = vadd.f32 %v914_v13, %v3629_v36  ;;  %v916_v45 = vpop.f32.mrb[87].mxu1  ;;  %1299 = vmatmul.mubr.bf16.gmra.mrb[80].mxu0 %v1027_v58  ;;  %v991_v19 = vmax.f32 %v911_v10, 0.0 }
 0x24e   :  { %v917_v48 = vadd.f32 %v916_v45, %v3633_v6  ;;  %v992_v26 = vmax.f32 %v913_v44, 0.0 }
 0x24f   :  { %v993_v22 = vmax.f32 %v915_v16, 0.0 }
 0x250   :  { %v994_v55 = vmax.f32 %v917_v48, 0.0 }
 0x251   :  { %v1029_v27 = vpack.c.bf16 %v993_v22, %v991_v19 }
 0x252   :  { %v1030_v28 = vpack.c.bf16 %v994_v55, %v992_v26  ;;  %v920_v54 = vpop.f32.mrb[88].mxu1 }
 0x253   :  { %v921_v57 = vadd.f32 %v920_v54, %v3629_v36  ;;  %v922_v29 = vpop.f32.mrb[89].mxu1 }
 0x254   :  { %v923_v30 = vadd.f32 %v922_v29, %v3633_v6  ;;  %v924_v31 = vpop.f32.mrb[90].mxu1  ;;  %1306 = vmatprep.mubr.bf16.mxu0 %v1030_v28 }
 0x255   :  { %v925_v33 = vadd.f32 %v924_v31, %v3629_v36  ;;  %v926_v34 = vpop.f32.mrb[91].mxu1  ;;  %1307 = vmatmul.mubr.bf16.gmra.mrb[84].mxu0 %v1029_v27  ;;  %v995_v37 = vmax.f32 %v921_v57, 0.0 }
 0x256   :  { %v927_v35 = vadd.f32 %v926_v34, %v3633_v6  ;;  %v996_v39 = vmax.f32 %v923_v30, 0.0 }
 0x257   :  { %v997_v38 = vmax.f32 %v925_v33, 0.0 }
 0x258   :  { %v998_v41 = vmax.f32 %v927_v35, 0.0 }
 0x259   :  { %v1031_v42 = vpack.c.bf16 %v997_v38, %v995_v37 }
 0x25a   :  { %v1032_v43 = vpack.c.bf16 %v998_v41, %v996_v39  ;;  %v930_v46 = vpop.f32.mrb[92].mxu1 }
 0x25b   :  { %v931_v47 = vadd.f32 %v930_v46, %v3629_v36  ;;  %v932_v49 = vpop.f32.mrb[93].mxu1 }
 0x25c   :  { %v933_v50 = vadd.f32 %v932_v49, %v3633_v6  ;;  %v934_v51 = vpop.f32.mrb[94].mxu1  ;;  %1314 = vmatprep.mubr.bf16.mxu0 %v1032_v43 }
 0x25d   :  { %v935_v52 = vadd.f32 %v934_v51, %v3629_v36  ;;  %v936_v56 = vpop.f32.mrb[95].mxu1  ;;  %1315 = vmatmul.mubr.bf16.gmra.mrb[88].mxu0 %v1031_v42  ;;  %v999_v61 = vmax.f32 %v931_v47, 0.0 }
 0x25e   :  { %v937_v60 = vadd.f32 %v936_v56, %v3633_v6  ;;  %v1000_v63 = vmax.f32 %v933_v50, 0.0 }
 0x25f   :  { %v1001_v62 = vmax.f32 %v935_v52, 0.0 }
 0x260   :  { %v1002_v0 = vmax.f32 %v937_v60, 0.0 }
 0x261   :  { %v1033_v1 = vpack.c.bf16 %v1001_v62, %v999_v61 }
 0x262   :  { %v1034_v2 = vpack.c.bf16 %v1002_v0, %v1000_v63 }
 0x264   :  { %1322 = vmatprep.mubr.bf16.mxu0 %v1034_v2  ;;  %v3736_v2 = vand.u32 127, %v94_v53 }
 0x265   :  { %1323 = vmatmul.mubr.bf16.gmra.mrb[92].mxu0 %v1033_v1 }
 0x266   :  { %vm2453_vm0 = vcmp.lt.s32.totalorder %v3736_v2, 64 }
 0x2c0   :  { %v2669_v3 = vpop.f32.mrb[32].mxu0 }
 0x2c1   :  { %v2670_v5 = vpop.f32.mrb[33].mxu0 }
 0x2c2   :  { %v2671_v36 = vadd.f32 %v2670_v5, %v2669_v3  ;;  %v2672_v7 = vpop.f32.mrb[34].mxu0 }
 0x2c3   :  { %v2673_v8 = vpop.f32.mrb[35].mxu0 }
 0x2c4   :  { %v1205_v6 = vadd.f32 %v2671_v36, %v3702_v4  ;;  %v2674_v9 = vadd.f32 %v2673_v8, %v2672_v7 }
 0x2c6   :  { %v3705_v11 = vsub.f32 10.0, %v1205_v6  ;;  %v1208_v12 = vadd.f32 %v2674_v9, %v3702_v4  ;;  %v1331_v31 = vmul.f32 0.033333335, %v1205_v6 }
 0x2c8   :  { %v1459_v14 = vmin.f32 %v3705_v11, 20.0  ;;  %v2675_v15 = vpop.f32.mrb[36].mxu0  ;;  %v3709_v17 = vsub.f32 10.0, %v1208_v12  ;;  %v1332_v41 = vmul.f32 0.033333335, %v1208_v12  ;;  %vm1491_vm1 = vcmp.gt.f32.partialorder %v3705_v11, 20.0 }
 0x2c9   :  { %v2676_v18 = vpop.f32.mrb[37].mxu0 }
 0x2ca   :  { %v1523_v20 = vmul.f32 1.442695, %v1459_v14  ;;  %v2677_v21 = vadd.f32 %v2676_v18, %v2675_v15  ;;  %v2678_v23 = vpop.f32.mrb[38].mxu0  ;;  %v1460_v24 = vmin.f32 %v3709_v17, 20.0  ;;  %vm1492_vm2 = vcmp.gt.f32.partialorder %v3709_v17, 20.0 }
 0x2cb   :  { %v2679_v25 = vpop.f32.mrb[39].mxu0 }
 0x2cc   :  { %2863 = vpow2.f32 %v1523_v20  ;;  %v1213_v58 = vadd.f32 %v2677_v21, %v3702_v4  ;;  %v2680_v59 = vadd.f32 %v2679_v25, %v2678_v23  ;;  %v1525_v32 = vmul.f32 1.442695, %v1460_v24 }
 0x2ce   :  { %v3713_v10 = vsub.f32 10.0, %v1213_v58  ;;  %v1216_v40 = vadd.f32 %v2680_v59, %v3702_v4  ;;  %2865 = vpow2.f32 %v1525_v32  ;;  %v1333_v50 = vmul.f32 0.033333335, %v1213_v58 }
 0x2d0   :  { %v1461_v44 = vmin.f32 %v3713_v10, 20.0  ;;  %v2681_v13 = vpop.f32.mrb[40].mxu0  ;;  %v3717_v16 = vsub.f32 10.0, %v1216_v40  ;;  %v1334_v62 = vmul.f32 0.033333335, %v1216_v40  ;;  %vm1493_vm5 = vcmp.gt.f32.partialorder %v3713_v10, 20.0 }
 0x2d1   :  { %v2682_v45 = vpop.f32.mrb[41].mxu0 }
 0x2d2   :  { %v1527_v48 = vmul.f32 1.442695, %v1461_v44  ;;  %v2683_v19 = vadd.f32 %v2682_v45, %v2681_v13  ;;  %v2684_v22 = vpop.f32.mrb[42].mxu0  ;;  %v1462_v26 = vmin.f32 %v3717_v16, 20.0  ;;  %vm1494_vm7 = vcmp.gt.f32.partialorder %v3717_v16, 20.0 }
 0x2d3   :  { %v2685_v55 = vpop.f32.mrb[43].mxu0 }
 0x2d4   :  { %2867 = vpow2.f32 %v1527_v48  ;;  %v1221_v27 = vadd.f32 %v2683_v19, %v3702_v4  ;;  %v2686_v28 = vadd.f32 %v2685_v55, %v2684_v22  ;;  %v1529_v54 = vmul.f32 1.442695, %v1462_v26 }
 0x2d6   :  { %v2864_v57 = vpop.eup %2863  ;;  %v3721_v29 = vsub.f32 10.0, %v1221_v27  ;;  %v1224_v30 = vadd.f32 %v2686_v28, %v3702_v4  ;;  %2869 = vpow2.f32 %v1529_v54  ;;  %v1335_v1 = vmul.f32 0.033333335, %v1221_v27 }
 0x2d7   :  { %v1587_v33 = vadd.f32 1.0, %v2864_v57  ;;  %v1590_v49 = vmul.f32 -0.5, %v2864_v57  ;;  %v1593_v8 = vand.u32 2147483647, %v2864_v57 }
 0x2d8   :  { %v1463_v34 = vmin.f32 %v3721_v29, 20.0  ;;  %v2687_v35 = vpop.f32.mrb[44].mxu0  ;;  %v3725_v37 = vpop.eup %2865  ;;  %v3727_v38 = vsub.f32 10.0, %v1224_v30  ;;  %v1336_v6 = vmul.f32 0.033333335, %v1224_v30  ;;  %vm1495_vm9 = vcmp.gt.f32.partialorder %v3721_v29, 20.0 }
 0x2d9   :  { %2871 = vlog2.f32 %v1587_v33  ;;  %v2688_v39 = vpop.f32.mrb[45].mxu0  ;;  %v1596_v42 = vadd.f32 1.0, %v3725_v37  ;;  %v1599_v61 = vmul.f32 -0.5, %v3725_v37  ;;  %v1591_v3 = vadd.f32 1.0, %v1590_v49 }
 0x2da   :  { %v1531_v43 = vmul.f32 1.442695, %v1463_v34  ;;  %2873 = vtanh.f32 %v1331_v31  ;;  %v1464_v46 = vmin.f32 %v3727_v38, 20.0  ;;  %v2690_v47 = vpop.f32.mrb[46].mxu0  ;;  %v2689_v56 = vadd.f32 %v2688_v39, %v2687_v35 }
 0x2db   :  { %2875 = vlog2.f32 %v1596_v42  ;;  %v2691_v51 = vpop.f32.mrb[47].mxu0  ;;  %v1600_v53 = vadd.f32 1.0, %v1599_v61  ;;  %v1602_v18 = vand.u32 2147483647, %v3725_v37  ;;  %v1592_v24 = vmul.f32 %v2864_v57, %v1591_v3 }
 0x2dc   :  { %2877 = vpow2.f32 %v1531_v43  ;;  %v1533_v52 = vmul.f32 1.442695, %v1464_v46  ;;  %v2692_v63 = vadd.f32 %v2691_v51, %v2690_v47  ;;  %v3739_v5 = vadd.f32 %v2689_v56, %v3702_v4 }
 0x2dd   :  { %2879 = vtanh.f32 %v1332_v41  ;;  %vm1594_vm3 = vcmp.lt.f32.partialorder %v1593_v8, 0.0004427343  ;;  %v1601_v45 = vmul.f32 %v3725_v37, %v1600_v53  ;;  %vm1603_vm4 = vcmp.lt.f32.partialorder %v1602_v18, 0.0004427343 }
 0x2de   :  { %v3731_v60 = vpop.eup %2867  ;;  %2881 = vpow2.f32 %v1533_v52  ;;  %v3746_v9 = vadd.f32 %v2692_v63, %v3702_v4  ;;  %v3755_v20 = vsub.f32 10.0, %v3739_v5  ;;  %vm1496_vm12 = vcmp.gt.f32.partialorder %v3727_v38, 20.0 }
 0x2df   :  { %v1605_v0 = vadd.f32 1.0, %v3731_v60  ;;  %2883 = vtanh.f32 %v1333_v50  ;;  %v1608_v25 = vmul.f32 -0.5, %v3731_v60  ;;  %v1611_v48 = vand.u32 2147483647, %v3731_v60 }
 0x2e0   :  { %v3741_v36 = vpop.f32.mrb[48].mxu0  ;;  %v3743_v7 = vpop.eup %2869  ;;  %v1465_v32 = vmin.f32 %v3755_v20, 20.0  ;;  %v3764_v40 = vsub.f32 10.0, %v3746_v9  ;;  %vm1497_vm13 = vcmp.gt.f32.partialorder %v3755_v20, 20.0 }
 0x2e1   :  { %2885 = vlog2.f32 %v1605_v0  ;;  %v3748_v12 = vpop.f32.mrb[49].mxu0  ;;  %v1614_v14 = vadd.f32 1.0, %v3743_v7  ;;  %v1617_v19 = vmul.f32 -0.5, %v3743_v7  ;;  %v1609_v30 = vadd.f32 1.0, %v1608_v25 }
 0x2e2   :  { %2887 = vtanh.f32 %v1334_v62  ;;  %v3757_v21 = vpop.f32.mrb[50].mxu0  ;;  %v1535_v27 = vmul.f32 1.442695, %v1465_v32  ;;  %v1466_v28 = vmin.f32 %v3764_v40, 20.0  ;;  %vm3790_vm6 = vcmp.lt.f32.partialorder %v1611_v48, 0.0004427343 }
 0x2e3   :  { %v2872_v15 = vpop.eup %2871  ;;  %2889 = vtanh.f32 %v1335_v1  ;;  %v3760_v58 = vpop.f32.mrb[51].mxu0  ;;  %v1618_v51 = vadd.f32 1.0, %v1617_v19  ;;  %v1620_v0 = vand.u32 2147483647, %v3743_v7  ;;  %vm1498_vm15 = vcmp.gt.f32.partialorder %v3764_v40, 20.0 }
 0x2e4   :  { %v1589_v23 = vmul.f32 0.6931472, %v2872_v15  ;;  %2891 = vlog2.f32 %v1614_v14  ;;  %v2874_v59 = vpop.eup %2873  ;;  %v1537_v43 = vmul.f32 1.442695, %v1466_v28 }
 0x2e5   :  { %2893 = vtanh.f32 %v1336_v6  ;;  %v2876_v44 = vpop.eup %2875  ;;  %v3780_v35 = vmul.f32 30.0, %v2874_v59  ;;  %v1619_v59 = vmul.f32 %v3743_v7, %v1618_v51  ;;  %vm1621_vm8 = vcmp.lt.f32.partialorder %v1620_v0, 0.0004427343 }
 0x2e6   :  { %v1595_v13 = vsel %vm1594_vm3, %v1592_v24, %v1589_v23  ;;  %v3769_v22 = vpop.eup %2877  ;;  %v1598_v55 = vmul.f32 0.6931472, %v2876_v44  ;;  %2895 = vpow2.f32 %v1535_v27  ;;  %v3828_v7 = vadd.f32 %v3760_v58, %v3757_v21 }
 0x2e7   :  { %v1875_v26 = vsel %vm1491_vm1, %v3705_v11, %v1595_v13  ;;  %v3775_v54 = vpop.eup %2879  ;;  %v1623_v31 = vadd.f32 1.0, %v3769_v22  ;;  %v1626_v8 = vmul.f32 -0.5, %v3769_v22 }
 0x2e8   :  { %v1907_v57 = vsub.f32 10.0, %v1875_v26  ;;  %v2699_v33 = vpop.f32.mrb[52].mxu0  ;;  %v3778_v34 = vpop.eup %2881  ;;  %v1604_v37 = vsel %vm1603_vm4, %v1601_v45, %v1598_v55  ;;  %v1629_v45 = vand.u32 2147483647, %v3769_v22 }
 0x2e9   :  { %v2700_v11 = vpop.f32.mrb[53].mxu0  ;;  %v3783_v39 = vpop.eup %2883  ;;  %v1876_v42 = vsel %vm1492_vm2, %v3709_v17, %v1604_v37  ;;  %2897 = vlog2.f32 %v1623_v31  ;;  %v1632_v52 = vadd.f32 1.0, %v3778_v34  ;;  %v1610_v17 = vmul.f32 %v3731_v60, %v1609_v30 }
 0x2ea   :  { %v3785_v41 = vadd.f32 -0.1, %v1907_v57  ;;  %v2702_v46 = vpop.f32.mrb[54].mxu0  ;;  %v1908_v49 = vsub.f32 10.0, %v1876_v42  ;;  %v1635_v6 = vmul.f32 -0.5, %v3778_v34  ;;  %v2695_v60 = vadd.f32 %v3748_v12, %v3741_v36 }
 0x2eb   :  { %v2886_v47 = vpop.eup %2885  ;;  %v2703_v56 = vpop.f32.mrb[55].mxu0  ;;  %2899 = vlog2.f32 %v1632_v52  ;;  %v1627_v12 = vadd.f32 1.0, %v1626_v8  ;;  %v3834_v57 = vadd.f32 %v2700_v11, %v2699_v33  ;;  %v1638_v21 = vand.u32 2147483647, %v3778_v34 }
 0x2ec   :  { %v3795_v61 = vpop.eup %2887  ;;  %v1971_v62 = vmin.f32 %v3785_v41, 20.0  ;;  %v1607_v63 = vmul.f32 0.6931472, %v2886_v47  ;;  %v3802_v3 = vadd.f32 -0.1, %v1908_v49  ;;  %2901 = vpow2.f32 %v1537_v43 }
 0x2ed   :  { %v3800_v1 = vpop.eup %2889  ;;  %v1636_v26 = vadd.f32 1.0, %v1635_v6  ;;  %v3836_v30 = vadd.f32 %v2703_v56, %v2702_v46  ;;  %v1628_v11 = vmul.f32 %v3769_v22, %v1627_v12  ;;  %vm1630_vm10 = vcmp.lt.f32.partialorder %v1629_v45, 0.0004427343 }
 0x2ee   :  { %v2892_v53 = vpop.eup %2891  ;;  %v2035_v14 = vmul.f32 1.442695, %v1971_v62  ;;  %v1613_v15 = vsel %vm3790_vm6, %v1610_v17, %v1607_v63  ;;  %v1972_v23 = vmin.f32 %v3802_v3, 20.0  ;;  %v1337_v47 = vmul.f32 0.033333335, %v3739_v5 }
 0x2ef   :  { %v3810_v18 = vpop.eup %2893  ;;  %v1877_v24 = vsel %vm1493_vm5, %v3713_v10, %v1613_v15  ;;  %v1616_v25 = vmul.f32 0.6931472, %v2892_v53  ;;  %v3852_v49 = vmul.f32 30.0, %v3783_v39  ;;  %v1637_v52 = vmul.f32 %v3778_v34, %v1636_v26 }
 0x2f0   :  { %2903 = vpow2.f32 %v2035_v14  ;;  %v1909_v32 = vsub.f32 10.0, %v1877_v24  ;;  %v3818_v44 = vpop.f32.mrb[56].mxu0  ;;  %v2037_v13 = vmul.f32 1.442695, %v1972_v23  ;;  %v3832_v27 = vpop.eup %2895  ;;  %vm3859_vm11 = vcmp.lt.f32.partialorder %v1638_v21, 0.0004427343 }
 0x2f1   :  { %v1622_v36 = vsel %vm1621_vm8, %v1619_v59, %v1616_v25  ;;  %v3821_v48 = vpop.f32.mrb[57].mxu0  ;;  %v1641_v58 = vadd.f32 1.0, %v3832_v27  ;;  %v1644_v6 = vmul.f32 -0.5, %v3832_v27  ;;  %v3875_v53 = vadd.f32 %v2695_v60, %v3702_v4 }
 0x2f2   :  { %v3823_v19 = vadd.f32 -0.1, %v1909_v32  ;;  %v1878_v10 = vsel %vm1494_vm7, %v3717_v16, %v1622_v36  ;;  %v3830_v55 = vpop.f32.mrb[58].mxu0  ;;  %2905 = vpow2.f32 %v2037_v13  ;;  %v3841_v16 = vmul.f32 30.0, %v3775_v54 }
 0x2f3   :  { %v1910_v28 = vsub.f32 10.0, %v1878_v10  ;;  %v3838_v31 = vpop.f32.mrb[59].mxu0  ;;  %v2898_v37 = vpop.eup %2897  ;;  %2907 = vlog2.f32 %v1641_v58  ;;  %v3881_v23 = vmul.f32 30.0, %v3795_v61  ;;  %v1338_v24 = vmul.f32 0.033333335, %v3746_v9 }
 0x2f4   :  { %v1973_v42 = vmin.f32 %v3823_v19, 20.0  ;;  %v1625_v33 = vmul.f32 0.6931472, %v2898_v37  ;;  %v3887_v59 = vmul.f32 30.0, %v3800_v1  ;;  %v1647_v9 = vand.u32 2147483647, %v3832_v27 }
 0x2f5   :  { %v3846_v43 = vadd.f32 -0.1, %v1910_v28  ;;  %v2900_v54 = vpop.eup %2899  ;;  %v1645_v12 = vadd.f32 1.0, %v1644_v6  ;;  %v3901_v45 = vsub.f32 10.0, %v3875_v53  ;;  %v3909_v21 = vmul.f32 30.0, %v3810_v18 }
 0x2f6   :  { %v2039_v46 = vmul.f32 1.442695, %v1973_v42  ;;  %v1631_v51 = vsel %vm1630_vm10, %v1628_v11, %v1625_v33  ;;  %v3856_v56 = vpop.eup %2901  ;;  %v1634_v22 = vmul.f32 0.6931472, %v2900_v54  ;;  %vm3914_vm14 = vcmp.lt.f32.partialorder %v1647_v9, 0.0004427343 }
 0x2f7   :  { %v1974_v50 = vmin.f32 %v3846_v43, 20.0  ;;  %v1879_v62 = vsel %vm1495_vm9, %v3721_v29, %v1631_v51  ;;  %v1650_v0 = vadd.f32 1.0, %v3856_v56  ;;  %v1653_v26 = vmul.f32 -0.5, %v3856_v56 }
 0x2f8   :  { %2909 = vpow2.f32 %v2039_v46  ;;  %v3863_v5 = vpop.f32.mrb[60].mxu0  ;;  %v1911_v39 = vsub.f32 10.0, %v1879_v62  ;;  %v1640_v29 = vsel %vm3859_vm11, %v1637_v52, %v1634_v22  ;;  %v1467_v51 = vmin.f32 %v3901_v45, 20.0 }
 0x2f9   :  { %v2041_v17 = vmul.f32 1.442695, %v1974_v50  ;;  %v3867_v8 = vpop.f32.mrb[61].mxu0  ;;  %2911 = vtanh.f32 %v1337_v47  ;;  %v1880_v60 = vsel %vm1496_vm12, %v3727_v38, %v1640_v29  ;;  %v3921_v47 = vadd.f32 %v3828_v7, %v3702_v4 }
 0x2fa   :  { %v3869_v34 = vpop.eup %2903  ;;  %v3877_v14 = vpop.f32.mrb[62].mxu0  ;;  %v3889_v32 = vadd.f32 -0.1, %v1911_v39  ;;  %v1912_v61 = vsub.f32 10.0, %v1880_v60  ;;  %v1646_v50 = vmul.f32 %v3832_v27, %v1645_v12  ;;  %vm2003_vm1 = vcmp.gt.f32.partialorder %v3785_v41, 20.0 }
 0x2fb   :  { %v2099_v15 = vadd.f32 1.0, %v3869_v34  ;;  %2913 = vpow2.f32 %v2041_v17  ;;  %v3884_v25 = vpop.f32.mrb[63].mxu0  ;;  %v2102_v10 = vmul.f32 -0.5, %v3869_v34  ;;  %v2105_v37 = vand.u32 2147483647, %v3869_v34 }
 0x2fc   :  { %2915 = vlog2.f32 %v1650_v0  ;;  %v3894_v13 = vpop.eup %2905  ;;  %v1975_v1 = vmin.f32 %v3889_v32, 20.0  ;;  %v3904_v38 = vadd.f32 -0.1, %v1912_v61  ;;  %v1654_v17 = vadd.f32 1.0, %v1653_v26 }
 0x2fd   :  { %2917 = vlog2.f32 %v2099_v15  ;;  %v2108_v36 = vadd.f32 1.0, %v3894_v13  ;;  %v2908_v28 = vpop.eup %2907  ;;  %v2111_v18 = vmul.f32 -0.5, %v3894_v13  ;;  %v2103_v62 = vadd.f32 1.0, %v2102_v10 }
 0x2fe   :  { %2919 = vtanh.f32 %v1338_v24  ;;  %v2043_v42 = vmul.f32 1.442695, %v1975_v1  ;;  %v1976_v33 = vmin.f32 %v3904_v38, 20.0  ;;  %v1643_v11 = vmul.f32 0.6931472, %v2908_v28 }
 0x2ff   :  { %2921 = vlog2.f32 %v2108_v36  ;;  %vm3935_vm2 = vcmp.lt.f32.partialorder %v2105_v37, 0.0004427343  ;;  %v1656_v0 = vand.u32 2147483647, %v3856_v56  ;;  %v1539_v24 = vmul.f32 1.442695, %v1467_v51 }
 0x300   :  { %v3911_v58 = vpop.f32.mrb[64].mxu0  ;;  %2923 = vpow2.f32 %v2043_v42  ;;  %v2045_v63 = vmul.f32 1.442695, %v1976_v33  ;;  %v1649_v27 = vsel %vm3914_vm14, %v1646_v50, %v1643_v11  ;;  %v3950_v60 = vsub.f32 10.0, %v3921_v47 }
 0x301   :  { %v3928_v52 = vpop.f32.mrb[65].mxu0  ;;  %v1881_v15 = vsel %vm1497_vm13, %v3755_v20, %v1649_v27  ;;  %v2112_v36 = vadd.f32 1.0, %v2111_v18  ;;  %v2114_v1 = vand.u32 2147483647, %v3894_v13  ;;  %v2104_v26 = vmul.f32 %v3869_v34, %v2103_v62 }
 0x302   :  { %v3923_v54 = vpop.eup %2909  ;;  %v3942_v29 = vpop.f32.mrb[66].mxu0  ;;  %v1913_v28 = vsub.f32 10.0, %v1881_v15  ;;  %v1655_v20 = vmul.f32 %v3856_v56, %v1654_v17  ;;  %vm1657_vm3 = vcmp.lt.f32.partialorder %v1656_v0, 0.0004427343  ;;  %v1468_v51 = vmin.f32 %v3950_v60, 20.0 }
 0x303   :  { %v2117_v22 = vadd.f32 1.0, %v3923_v54  ;;  %v3932_v7 = vpop.eup %2911  ;;  %v3952_v61 = vpop.f32.mrb[67].mxu0  ;;  %v2120_v33 = vmul.f32 -0.5, %v3923_v54  ;;  %vm2004_vm4 = vcmp.gt.f32.partialorder %v3802_v3, 20.0  ;;  %vm2115_vm5 = vcmp.lt.f32.partialorder %v2114_v1, 0.0004427343 }
 0x304   :  { %v3963_v18 = vadd.f32 -0.1, %v1913_v28  ;;  %v1541_v28 = vmul.f32 1.442695, %v1468_v51  ;;  %vm2005_vm6 = vcmp.gt.f32.partialorder %v3823_v19, 20.0  ;;  %vm2006_vm9 = vcmp.gt.f32.partialorder %v3846_v43, 20.0 }
 0x305   :  { %v3944_v6 = vpop.eup %2913  ;;  %2925 = vlog2.f32 %v2117_v22  ;;  %v2113_v22 = vmul.f32 %v3894_v13, %v2112_v36  ;;  %v2121_v36 = vadd.f32 1.0, %v2120_v33  ;;  %vm2007_vm10 = vcmp.gt.f32.partialorder %v3889_v32, 20.0 }
 0x306   :  { %v2916_v9 = vpop.eup %2915  ;;  %v2126_v12 = vadd.f32 1.0, %v3944_v6  ;;  %2927 = vpow2.f32 %v2045_v63  ;;  %v2129_v15 = vmul.f32 -0.5, %v3944_v6  ;;  %v1977_v39 = vmin.f32 %v3963_v18, 20.0 }
 0x307   :  { %v2918_v10 = vpop.eup %2917  ;;  %v1652_v37 = vmul.f32 0.6931472, %v2916_v9  ;;  %vm2008_vm11 = vcmp.gt.f32.partialorder %v3904_v38, 20.0  ;;  %vm1499_vm14 = vcmp.gt.f32.partialorder %v3901_v45, 20.0 }
 0x308   :  { %v2101_v42 = vmul.f32 0.6931472, %v2918_v10  ;;  %2929 = vlog2.f32 %v2126_v12  ;;  %v3959_v11 = vpop.f32.mrb[68].mxu0  ;;  %v3961_v46 = vpop.eup %2919  ;;  %v2123_v10 = vand.u32 2147483647, %v3923_v54 }
 0x309   :  { %v1658_v50 = vsel %vm1657_vm3, %v1655_v20, %v1652_v37  ;;  %2931 = vpow2.f32 %v1539_v24  ;;  %v3966_v34 = vpop.f32.mrb[69].mxu0  ;;  %v2922_v62 = vpop.eup %2921  ;;  %v2047_v20 = vmul.f32 1.442695, %v1977_v39 }
 0x30a   :  { %v2107_v56 = vsel %vm3935_vm2, %v2104_v26, %v2101_v42  ;;  %v1882_v63 = vsel %vm1498_vm15, %v3764_v40, %v1658_v50  ;;  %v3975_v17 = vpop.f32.mrb[70].mxu0  ;;  %v2110_v0 = vmul.f32 0.6931472, %v2922_v62  ;;  %v3984_v9 = vpop.eup %2923  ;;  %v2130_v50 = vadd.f32 1.0, %v2129_v15 }
 0x30b   :  { %v2387_v27 = vsel %vm2003_vm1, %v3785_v41, %v2107_v56  ;;  %v3982_v24 = vpop.f32.mrb[71].mxu0  ;;  %v1914_v12 = vsub.f32 10.0, %v1882_v63  ;;  %v2135_v26 = vadd.f32 1.0, %v3984_v9  ;;  %v2132_v62 = vand.u32 2147483647, %v3944_v6 }
 0x30c   :  { %v2419_v13 = vadd.f32 0.1, %v2387_v27  ;;  %v2116_v40 = vsel %vm2115_vm5, %v2113_v22, %v2110_v0  ;;  %v2122_v22 = vmul.f32 %v3923_v54, %v2121_v36  ;;  %vm2124_vm7 = vcmp.lt.f32.partialorder %v2123_v10, 0.0004427343 }
 0x30d   :  { %v2388_v37 = vsel %vm2004_vm4, %v3802_v3, %v2116_v40  ;;  %v3994_v42 = vadd.f32 -0.1, %v1914_v12  ;;  %2933 = vlog2.f32 %v2135_v26  ;;  %v2138_v54 = vmul.f32 -0.5, %v3984_v9 }
 0x30e   :  { %v2454_v41 = vsel %vm2453_vm0, %v3780_v35, %v2419_v13  ;;  %v2420_v33 = vadd.f32 0.1, %v2388_v37  ;;  %2935 = vpow2.f32 %v2047_v20  ;;  %v2131_v10 = vmul.f32 %v3944_v6, %v2130_v50 }
 0x30f   :  { %v2926_v1 = vpop.eup %2925  ;;  %2486 = vst [vmem:[#allocation7] sm:$0xff] %v2454_v41  ;;  %v1978_v35 = vmin.f32 %v3994_v42, 20.0  ;;  %2937 = vpow2.f32 %v1541_v28  ;;  %vm2133_vm8 = vcmp.lt.f32.partialorder %v2132_v62, 0.0004427343  ;;  %v2141_v62 = vand.u32 2147483647, %v3984_v9 }
 0x310   :  { %v3997_v56 = vpop.eup %2927  ;;  %v2119_v51 = vmul.f32 0.6931472, %v2926_v1  ;;  %v4001_v63 = vpop.f32.mrb[72].mxu0  ;;  %v2455_v3 = vsel %vm2453_vm0, %v3841_v16, %v2420_v33  ;;  %v1339_v1 = vmul.f32 0.033333335, %v3875_v53  ;;  %v2139_v33 = vadd.f32 1.0, %v2138_v54 }
 0x311   :  { %v2144_v27 = vadd.f32 1.0, %v3997_v56  ;;  %v4008_v0 = vpop.f32.mrb[73].mxu0  ;;  %2487 = vst [vmem:[#allocation7 + $0x8] sm:$0xff] %v2455_v3  ;;  %v2049_v13 = vmul.f32 1.442695, %v1978_v35  ;;  %v2147_v20 = vmul.f32 -0.5, %v3997_v56  ;;  %v4044_v35 = vadd.f32 %v3867_v8, %v3863_v5 }
 0x312   :  { %v2930_v15 = vpop.eup %2929  ;;  %v2125_v39 = vsel %vm2124_vm7, %v2122_v22, %v2119_v51  ;;  %v4011_v36 = vpop.f32.mrb[74].mxu0  ;;  %v4029_v51 = vmul.f32 30.0, %v3932_v7  ;;  %v4033_v22 = vadd.f32 %v3834_v57, %v3702_v4  ;;  %v2150_v53 = vand.u32 2147483647, %v3997_v56 }
 0x313   :  { %v4013_v12 = vpop.eup %2931  ;;  %v2389_v16 = vsel %vm2005_vm6, %v3823_v19, %v2125_v39  ;;  %v2128_v40 = vmul.f32 0.6931472, %v2930_v15  ;;  %2939 = vlog2.f32 %v2144_v27  ;;  %v4017_v26 = vpop.f32.mrb[75].mxu0  ;;  %v2148_v27 = vadd.f32 1.0, %v2147_v20 }
 0x314   :  { %v2421_v41 = vadd.f32 0.1, %v2389_v16  ;;  %2941 = vpow2.f32 %v2049_v13  ;;  %v1659_v37 = vadd.f32 1.0, %v4013_v12  ;;  %v1662_v5 = vmul.f32 -0.5, %v4013_v12 }
 0x315   :  { %v2134_v28 = vsel %vm2133_vm8, %v2131_v10, %v2128_v40  ;;  %vm2142_vm12 = vcmp.lt.f32.partialorder %v2141_v62, 0.0004427343  ;;  %v4063_v15 = vsub.f32 10.0, %v4033_v22  ;;  %v4067_v39 = vadd.f32 %v3836_v30, %v3702_v4 }
 0x316   :  { %v2456_v19 = vsel %vm2453_vm0, %v3852_v49, %v2421_v41  ;;  %v2390_v6 = vsel %vm2006_vm9, %v3846_v43, %v2134_v28  ;;  %2943 = vlog2.f32 %v1659_v37  ;;  %v2707_v49 = vadd.f32 %v3821_v48, %v3818_v44 }
 0x317   :  { %2488 = vst [vmem:[#allocation7 + $0x10] sm:$0xff] %v2456_v19  ;;  %v2422_v50 = vadd.f32 0.1, %v2390_v6  ;;  %v4040_v43 = vadd.f32 %v3838_v31, %v3830_v55  ;;  %v2934_v7 = vpop.eup %2933  ;;  %2945 = vtanh.f32 %v1339_v1  ;;  %v2140_v31 = vmul.f32 %v3984_v9, %v2139_v33 }
 0x318   :  { %v4046_v3 = vpop.f32.mrb[76].mxu0  ;;  %v4054_v48 = vpop.eup %2935  ;;  %v2137_v55 = vmul.f32 0.6931472, %v2934_v7  ;;  %vm4073_vm13 = vcmp.lt.f32.partialorder %v2150_v53, 0.0004427343  ;;  %v2149_v41 = vmul.f32 %v3997_v56, %v2148_v27  ;;  %v1663_v19 = vadd.f32 1.0, %v1662_v5 }
 0x319   :  { %v2457_v57 = vsel %vm2453_vm0, %v3881_v23, %v2422_v50  ;;  %v4052_v44 = vpop.f32.mrb[77].mxu0  ;;  %v2153_v23 = vadd.f32 1.0, %v4054_v48  ;;  %v4071_v13 = vpop.eup %2937  ;;  %v4079_v40 = vmul.f32 0.033333335, %v3921_v47  ;;  %v1665_v37 = vand.u32 2147483647, %v4013_v12 }
 0x31a   :  { %2489 = vst [vmem:[#allocation7 + $0x18] sm:$0xff] %v2457_v57  ;;  %v4059_v8 = vpop.f32.mrb[78].mxu0  ;;  %v2143_v9 = vsel %vm2142_vm12, %v2140_v31, %v2137_v55  ;;  %v1668_v6 = vadd.f32 1.0, %v4071_v13  ;;  %v2156_v47 = vmul.f32 -0.5, %v4054_v48  ;;  %v1469_v50 = vmin.f32 %v4063_v15, 20.0 }
 0x31b   :  { %v4069_v54 = vpop.f32.mrb[79].mxu0  ;;  %v2391_v30 = vsel %vm2007_vm10, %v3889_v32, %v2143_v9  ;;  %2947 = vlog2.f32 %v2153_v23  ;;  %v4093_v32 = vsub.f32 10.0, %v4067_v39  ;;  %v1671_v7 = vmul.f32 -0.5, %v4071_v13 }
 0x31c   :  { %v2423_v20 = vadd.f32 0.1, %v2391_v30  ;;  %2949 = vlog2.f32 %v1668_v6  ;;  %vm4106_vm15 = vcmp.lt.f32.partialorder %v1665_v37, 0.0004427343  ;;  %v2159_v23 = vand.u32 2147483647, %v4054_v48 }
 0x31d   :  { %v2940_v10 = vpop.eup %2939  ;;  %v1664_v16 = vmul.f32 %v4013_v12, %v1663_v19  ;;  %vm2009_vm1 = vcmp.gt.f32.partialorder %v3963_v18, 20.0  ;;  %v1543_v30 = vmul.f32 1.442695, %v1469_v50  ;;  %v1672_v12 = vadd.f32 1.0, %v1671_v7 }
 0x31e   :  { %v4086_v28 = vpop.eup %2941  ;;  %v2146_v1 = vmul.f32 0.6931472, %v2940_v10  ;;  %v2458_v62 = vsel %vm2453_vm0, %v3887_v59, %v2423_v20  ;;  %v4111_v59 = vadd.f32 %v2707_v49, %v3702_v4  ;;  %vm1500_vm2 = vcmp.gt.f32.partialorder %v3950_v60, 20.0 }
 0x31f   :  { %v2162_v33 = vadd.f32 1.0, %v4086_v28  ;;  %2490 = vst [vmem:[#allocation7 + $0x20] sm:$0xff] %v2458_v62  ;;  %v2165_v20 = vmul.f32 -0.5, %v4086_v28  ;;  %vm4138_vm3 = vcmp.lt.f32.partialorder %v2159_v23, 0.0004427343  ;;  %vm2010_vm4 = vcmp.gt.f32.partialorder %v3994_v42, 20.0 }
 0x320   :  { %v2944_v56 = vpop.eup %2943  ;;  %v2152_v53 = vsel %vm4073_vm13, %v2149_v41, %v2146_v1  ;;  %v4101_v57 = vpop.f32.mrb[80].mxu0  ;;  %v1470_v41 = vmin.f32 %v4093_v32, 20.0  ;;  %v4146_v62 = vadd.f32 %v4040_v43, %v3702_v4  ;;  %v2168_v7 = vand.u32 2147483647, %v4086_v28 }
 0x321   :  { %v2392_v27 = vsel %vm2008_vm11, %v3904_v38, %v2152_v53  ;;  %2951 = vlog2.f32 %v2162_v33  ;;  %v4113_v31 = vpop.f32.mrb[81].mxu0  ;;  %v1661_v9 = vmul.f32 0.6931472, %v2944_v56  ;;  %v4117_v10 = vpop.eup %2945  ;;  %v2157_v38 = vadd.f32 1.0, %v2156_v47 }
 0x322   :  { %v2424_v5 = vadd.f32 0.1, %v2392_v27  ;;  %v4121_v37 = vpop.f32.mrb[82].mxu0  ;;  %2953 = vpow2.f32 %v1543_v30  ;;  %v1545_v47 = vmul.f32 1.442695, %v1470_v41  ;;  %v4136_v33 = vsub.f32 10.0, %v4111_v59 }
 0x323   :  { %v1667_v1 = vsel %vm4106_vm15, %v1664_v16, %v1661_v9  ;;  %v4129_v19 = vpop.f32.mrb[83].mxu0  ;;  %v1674_v56 = vand.u32 2147483647, %v4071_v13  ;;  %v2158_v53 = vmul.f32 %v4054_v48, %v2157_v38  ;;  %v1673_v9 = vmul.f32 %v4071_v13, %v1672_v12 }
 0x324   :  { %v2459_v49 = vsel %vm2453_vm0, %v3909_v21, %v2424_v5  ;;  %v1883_v6 = vsel %vm1499_vm14, %v3901_v45, %v1667_v1  ;;  %2955 = vpow2.f32 %v1545_v47  ;;  %v1471_v27 = vmin.f32 %v4136_v33, 20.0 }
 0x325   :  { %2491 = vst [vmem:[#allocation7 + $0x28] sm:$0xff] %v2459_v49  ;;  %v1915_v50 = vsub.f32 10.0, %v1883_v6  ;;  %v2948_v45 = vpop.eup %2947  ;;  %v2166_v5 = vadd.f32 1.0, %v2165_v20  ;;  %v4155_v30 = vsub.f32 10.0, %v4146_v62  ;;  %v2716_v43 = vadd.f32 %v3884_v25, %v3877_v14 }
 0x326   :  { %v2155_v55 = vmul.f32 0.6931472, %v2948_v45  ;;  %v1547_v16 = vmul.f32 1.442695, %v1471_v27  ;;  %v4161_v48 = vadd.f32 %v3928_v52, %v3911_v58  ;;  %v2950_v41 = vpop.eup %2949  ;;  %vm4168_vm5 = vcmp.lt.f32.partialorder %v1674_v56, 0.0004427343 }
 0x327   :  { %v4151_v23 = vadd.f32 -0.1, %v1915_v50  ;;  %v4174_v1 = vadd.f32 %v4044_v35, %v3702_v4  ;;  %v1670_v52 = vmul.f32 0.6931472, %v2950_v41  ;;  %v1472_v12 = vmin.f32 %v4155_v30, 20.0 }
 0x328   :  { %v4163_v38 = vpop.f32.mrb[84].mxu0  ;;  %v2161_v49 = vsel %vm4138_vm3, %v2158_v53, %v2155_v55  ;;  %2957 = vpow2.f32 %v1547_v16  ;;  %v2167_v21 = vmul.f32 %v4086_v28, %v2166_v5  ;;  %vm2169_vm6 = vcmp.lt.f32.partialorder %v2168_v7, 0.0004427343 }
 0x329   :  { %v1979_v20 = vmin.f32 %v4151_v23, 20.0  ;;  %v4176_v14 = vpop.f32.mrb[85].mxu0  ;;  %v2393_v58 = vsel %vm2009_vm1, %v3963_v18, %v2161_v49  ;;  %v1676_v35 = vsel %vm4168_vm5, %v1673_v9, %v1670_v52  ;;  %v1341_v56 = vmul.f32 0.033333335, %v4033_v22 }
 0x32a   :  { %v2425_v6 = vadd.f32 0.1, %v2393_v58  ;;  %v1549_v45 = vmul.f32 1.442695, %v1472_v12  ;;  %v1884_v27 = vsel %vm1500_vm2, %v3950_v60, %v1676_v35  ;;  %v4198_v22 = vsub.f32 10.0, %v4174_v1  ;;  %v4200_v5 = vpop.f32.mrb[86].mxu0 }
 0x32b   :  { %v2952_v25 = vpop.eup %2951  ;;  %v2051_v50 = vmul.f32 1.442695, %v1979_v20  ;;  %v1916_v7 = vsub.f32 10.0, %v1884_v27  ;;  %v1342_v60 = vmul.f32 0.033333335, %v4067_v39  ;;  %v4209_v20 = vpop.f32.mrb[87].mxu0  ;;  %v4216_v58 = vadd.f32 %v2716_v43, %v3702_v4 }
 0x32c   :  { %v2164_v47 = vmul.f32 0.6931472, %v2952_v25  ;;  %v2460_v18 = vsel %vm2453_vm0, %v4029_v51, %v2425_v6  ;;  %v4192_v55 = vpop.eup %2953  ;;  %v1402_v51 = vmul.f32 30.0, %v3961_v46  ;;  %v1343_v46 = vmul.f32 0.033333335, %v4111_v59 }
 0x32d   :  { %2959 = vpow2.f32 %v2051_v50  ;;  %2492 = vst [vmem:[#allocation7 + $0x30] sm:$0xff] %v2460_v18  ;;  %v1677_v16 = vadd.f32 1.0, %v4192_v55  ;;  %v4206_v49 = vadd.f32 -0.1, %v1916_v7  ;;  %v1680_v12 = vmul.f32 -0.5, %v4192_v55 }
 0x32e   :  { %v2170_v53 = vsel %vm2169_vm6, %v2167_v21, %v2164_v47  ;;  %2961 = vpow2.f32 %v1549_v45  ;;  %v2956_v41 = vpop.eup %2955  ;;  %v1683_v21 = vand.u32 2147483647, %v4192_v55  ;;  %v4224_v50 = vsub.f32 10.0, %v4216_v58 }
 0x32f   :  { %v2394_v28 = vsel %vm2010_vm4, %v3994_v42, %v2170_v53  ;;  %2963 = vtanh.f32 %v4079_v40  ;;  %v1473_v42 = vmin.f32 %v4198_v22, 20.0  ;;  %v1980_v25 = vmin.f32 %v4206_v49, 20.0 }
 0x330   :  { %v2426_v9 = vadd.f32 0.1, %v2394_v28  ;;  %2965 = vlog2.f32 %v1677_v16  ;;  %v1686_v39 = vadd.f32 1.0, %v2956_v41  ;;  %v1689_v47 = vmul.f32 -0.5, %v2956_v41  ;;  %v4226_v4 = vpop.f32.mrb[88].mxu0 }
 0x331   :  { %2967 = vtanh.f32 %v1341_v56  ;;  %v2053_v52 = vmul.f32 1.442695, %v1980_v25  ;;  %v1551_v6 = vmul.f32 1.442695, %v1473_v42  ;;  %5071 = vst [vmem:[#allocation11_spill] sm:$0xff] %v4226_v4  ;;  %v4231_v35 = vmul.f32 30.0, %v4117_v10 }
 0x332   :  { %v2461_v13 = vsel %vm2453_vm0, %v1402_v51, %v2426_v9  ;;  %2969 = vtanh.f32 %v1342_v60  ;;  %v4218_v40 = vpop.eup %2957  ;;  %v1692_v56 = vand.u32 2147483647, %v2956_v41  ;;  %v4233_v45 = vpop.f32.mrb[89].mxu0  ;;  %vm1501_vm7 = vcmp.gt.f32.partialorder %v4063_v15, 20.0  ;;  %v4263_v25 = vld [vmem:[%s5053_s6] ss:$0 sm:$0xff] }
 0x333   :  { %2493 = vst [vmem:[#allocation7 + $0x38] sm:$0xff] %v2461_v13  ;;  %2971 = vlog2.f32 %v1686_v39  ;;  %v1695_v59 = vadd.f32 1.0, %v4218_v40  ;;  %5072 = vst [vmem:[#allocation12_spill] sm:$0xff] %v4233_v45  ;;  %v1681_v27 = vadd.f32 1.0, %v1680_v12  ;;  %vm1502_vm8 = vcmp.gt.f32.partialorder %v4093_v32, 20.0 }
 0x334   :  { %2973 = vtanh.f32 %v1343_v46  ;;  %v1690_v28 = vadd.f32 1.0, %v1689_v47  ;;  %v1698_v7 = vmul.f32 -0.5, %v4218_v40  ;;  %v4242_v10 = vmul.f32 0.033333335, %v4146_v62 }
 0x335   :  { %2975 = vpow2.f32 %v2053_v52  ;;  %vm4247_vm9 = vcmp.lt.f32.partialorder %v1683_v21, 0.0004427343  ;;  %v4252_v60 = vmul.f32 0.033333335, %v4174_v1  ;;  %v1474_v42 = vmin.f32 %v4224_v50, 20.0 }
 0x336   :  { %2977 = vlog2.f32 %v1695_v59  ;;  %vm4256_vm10 = vcmp.lt.f32.partialorder %v1692_v56, 0.0004427343  ;;  %v4267_v39 = vadd.f32 %v4263_v25, %v4161_v48  ;;  %v1682_v12 = vmul.f32 %v4192_v55, %v1681_v27  ;;  %v4278_v48 = vpop.f32.mrb[90].mxu0 }
 0x337   :  { %v4228_v43 = vpop.eup %2959  ;;  %2979 = vpow2.f32 %v1551_v6  ;;  %vm1503_vm11 = vcmp.gt.f32.partialorder %v4136_v33, 20.0  ;;  %v1701_v6 = vand.u32 2147483647, %v4218_v40  ;;  %v1691_v56 = vmul.f32 %v2956_v41, %v1690_v28  ;;  %5077 = vst [vmem:[#allocation13_spill] sm:$0xff] %v4278_v48  ;;  %v4294_v41 = vpop.f32.mrb[91].mxu0 }
 0x338   :  { %v4235_v18 = vpop.eup %2961  ;;  %v2171_v53 = vadd.f32 1.0, %v4228_v43  ;;  %v2174_v46 = vmul.f32 -0.5, %v4228_v43  ;;  %v2177_v21 = vand.u32 2147483647, %v4228_v43  ;;  %v4284_v55 = vadd.f32 %v3952_v61, %v3942_v29  ;;  %5078 = vst [vmem:[#allocation14_spill] sm:$0xff] %v4294_v41 }
 0x339   :  { %v1704_v51 = vadd.f32 1.0, %v4235_v18  ;;  %v4245_v9 = vpop.eup %2963  ;;  %v1707_v47 = vmul.f32 -0.5, %v4235_v18  ;;  %v4288_v27 = vadd.f32 %v3966_v34, %v3959_v11  ;;  %v4292_v4 = vadd.f32 %v3982_v24, %v3975_v17 }
 0x33a   :  { %2981 = vlog2.f32 %v2171_v53  ;;  %v2966_v13 = vpop.eup %2965  ;;  %v1699_v53 = vadd.f32 1.0, %v1698_v7  ;;  %vm2011_vm12 = vcmp.gt.f32.partialorder %v4151_v23, 20.0  ;;  %v2175_v7 = vadd.f32 1.0, %v2174_v46 }
 0x33b   :  { %2983 = vlog2.f32 %v1704_v51  ;;  %v4269_v1 = vpop.eup %2967  ;;  %v1679_v52 = vmul.f32 0.6931472, %v2966_v13  ;;  %v1553_v51 = vmul.f32 1.442695, %v1474_v42  ;;  %v4303_v16 = vsub.f32 10.0, %v4267_v39 }
 0x33c   :  { %v4275_v59 = vpop.eup %2969  ;;  %vm4307_vm13 = vcmp.lt.f32.partialorder %v1701_v6, 0.0004427343  ;;  %vm1504_vm14 = vcmp.gt.f32.partialorder %v4155_v30, 20.0  ;;  %v1708_v24 = vadd.f32 1.0, %v1707_v47  ;;  %vm4319_vm15 = vcmp.lt.f32.partialorder %v2177_v21, 0.0004427343 }
 0x33d   :  { %v2972_v45 = vpop.eup %2971  ;;  %v1685_v13 = vsel %vm4247_vm9, %v1682_v12, %v1679_v52  ;;  %2985 = vpow2.f32 %v1553_v51  ;;  %v1710_v52 = vand.u32 2147483647, %v4235_v18  ;;  %v2176_v62 = vmul.f32 %v4228_v43, %v2175_v7 }
 0x33e   :  { %v4296_v28 = vpop.eup %2973  ;;  %v1885_v29 = vsel %vm1501_vm7, %v4063_v15, %v1685_v13  ;;  %v1688_v61 = vmul.f32 0.6931472, %v2972_v45  ;;  %v1700_v45 = vmul.f32 %v4218_v40, %v1699_v53  ;;  %v1475_v40 = vmin.f32 %v4303_v16, 20.0 }
 0x33f   :  { %v4305_v11 = vpop.eup %2975  ;;  %v1917_v34 = vsub.f32 10.0, %v1885_v29  ;;  %vm1711_vm1 = vcmp.lt.f32.partialorder %v1710_v52, 0.0004427343  ;;  %vm2012_vm2 = vcmp.gt.f32.partialorder %v4206_v49, 20.0  ;;  %vm1505_vm4 = vcmp.gt.f32.partialorder %v4198_v22, 20.0 }
 0x340   :  { %v2978_v42 = vpop.eup %2977  ;;  %v2180_v46 = vadd.f32 1.0, %v4305_v11  ;;  %v1694_v15 = vsel %vm4256_vm10, %v1691_v56, %v1688_v61  ;;  %v1709_v61 = vmul.f32 %v4235_v18, %v1708_v24  ;;  %v1555_v24 = vmul.f32 1.442695, %v1475_v40  ;;  %v4357_v40 = vpop.f32.mrb[92].mxu0 }
 0x341   :  { %v4317_v12 = vpop.eup %2979  ;;  %v4323_v13 = vadd.f32 -0.1, %v1917_v34  ;;  %v1886_v47 = vsel %vm1502_vm8, %v4093_v32, %v1694_v15  ;;  %v1697_v51 = vmul.f32 0.6931472, %v2978_v42  ;;  %v2183_v32 = vmul.f32 -0.5, %v4305_v11  ;;  %5083 = vst [vmem:[#allocation15_spill] sm:$0xff] %v4357_v40 }
 0x342   :  { %2987 = vlog2.f32 %v2180_v46  ;;  %v1918_v56 = vsub.f32 10.0, %v1886_v47  ;;  %v1713_v34 = vadd.f32 1.0, %v4317_v12  ;;  %vm1506_vm6 = vcmp.gt.f32.partialorder %v4224_v50, 20.0 }
 0x343   :  { %v1981_v29 = vmin.f32 %v4323_v13, 20.0  ;;  %v1703_v21 = vsel %vm4307_vm13, %v1700_v45, %v1697_v51  ;;  %v2184_v52 = vadd.f32 1.0, %v2183_v32  ;;  %vm2013_vm8 = vcmp.gt.f32.partialorder %v4323_v13, 20.0 }
 0x344   :  { %v2982_v53 = vpop.eup %2981  ;;  %v4336_v42 = vadd.f32 -0.1, %v1918_v56  ;;  %v1887_v43 = vsel %vm1503_vm11, %v4136_v33, %v1703_v21  ;;  %2989 = vlog2.f32 %v1713_v34  ;;  %v4364_v21 = vpop.f32.mrb[93].mxu0 }
 0x345   :  { %v2984_v41 = vpop.eup %2983  ;;  %v2173_v48 = vmul.f32 0.6931472, %v2982_v53  ;;  %v2055_v7 = vmul.f32 1.442695, %v1981_v29  ;;  %v1919_v46 = vsub.f32 10.0, %v1887_v43  ;;  %v1404_v29 = vmul.f32 30.0, %v4245_v9 }
 0x346   :  { %v1706_v15 = vmul.f32 0.6931472, %v2984_v41  ;;  %v1982_v18 = vmin.f32 %v4336_v42, 20.0  ;;  %5084 = vst [vmem:[#allocation16_spill] sm:$0xff] %v4364_v21  ;;  %v1719_v9 = vand.u32 2147483647, %v4317_v12 }
 0x347   :  { %v2179_v17 = vsel %vm4319_vm15, %v2176_v62, %v2173_v48  ;;  %2991 = vpow2.f32 %v2055_v7  ;;  %v4347_v47 = vadd.f32 -0.1, %v1919_v46  ;;  %v1716_v48 = vmul.f32 -0.5, %v4317_v12  ;;  %v4353_v6 = vpop.eup %2985  ;;  %v4375_v7 = vpop.f32.mrb[94].mxu0 }
 0x348   :  { %v2395_v45 = vsel %vm2011_vm12, %v4151_v23, %v2179_v17  ;;  %v1712_v51 = vsel %vm1711_vm1, %v1709_v61, %v1706_v15  ;;  %v2057_v56 = vmul.f32 1.442695, %v1982_v18  ;;  %2993 = vtanh.f32 %v4242_v10  ;;  %5085 = vst [vmem:[#allocation17_spill] sm:$0xff] %v4375_v7  ;;  %v4379_v18 = vpop.f32.mrb[95].mxu0 }
 0x349   :  { %v2427_v33 = vadd.f32 0.1, %v2395_v45  ;;  %v1888_v41 = vsel %vm1504_vm14, %v4155_v30, %v1712_v51  ;;  %v1983_v62 = vmin.f32 %v4347_v47, 20.0  ;;  %v2186_v30 = vand.u32 2147483647, %v4305_v11  ;;  %5086 = vst [vmem:[#allocation18_spill] sm:$0xff] %v4379_v18 }
 0x34a   :  { %v1920_v23 = vsub.f32 10.0, %v1888_v41  ;;  %2995 = vpow2.f32 %v2057_v56  ;;  %v4370_v10 = vadd.f32 %v4263_v25, %v4284_v55  ;;  %v1722_v43 = vadd.f32 1.0, %v4353_v6 }
 0x34b   :  { %v2462_v53 = vsel %vm2453_vm0, %v4231_v35, %v2427_v33  ;;  %v2059_v61 = vmul.f32 1.442695, %v1983_v62  ;;  %2997 = vpow2.f32 %v1555_v24  ;;  %v1717_v35 = vadd.f32 1.0, %v1716_v48 }
 0x34c   :  { %2494 = vst [vmem:[#allocation7 + $0x40] sm:$0xff] %v2462_v53  ;;  %v4366_v34 = vadd.f32 -0.1, %v1920_v23  ;;  %v2988_v32 = vpop.eup %2987  ;;  %2999 = vtanh.f32 %v4252_v60  ;;  %v2185_v15 = vmul.f32 %v4305_v11, %v2184_v52  ;;  %vm2187_vm3 = vcmp.lt.f32.partialorder %v2186_v30, 0.0004427343 }
 0x34d   :  { %v2182_v46 = vmul.f32 0.6931472, %v2988_v32  ;;  %3001 = vpow2.f32 %v2059_v61  ;;  %v1346_v60 = vmul.f32 0.033333335, %v4216_v58  ;;  %v4385_v51 = vsub.f32 10.0, %v4370_v10 }
 0x34e   :  { %v1984_v17 = vmin.f32 %v4366_v34, 20.0  ;;  %3003 = vlog2.f32 %v1722_v43  ;;  %v2990_v55 = vpop.eup %2989  ;;  %v1718_v56 = vmul.f32 %v4317_v12, %v1717_v35  ;;  %vm1720_vm5 = vcmp.lt.f32.partialorder %v1719_v9, 0.0004427343 }
 0x34f   :  { %v2188_v24 = vsel %vm2187_vm3, %v2185_v15, %v2182_v46  ;;  %v1715_v33 = vmul.f32 0.6931472, %v2990_v55  ;;  %v1725_v58 = vmul.f32 -0.5, %v4353_v6  ;;  %v1476_v52 = vmin.f32 %v4385_v51, 20.0 }
 0x350   :  { %v2061_v45 = vmul.f32 1.442695, %v1984_v17  ;;  %v2396_v11 = vsel %vm2012_vm2, %v4206_v49, %v2188_v24  ;;  %v1347_v53 = vmul.f32 0.033333335, %v4267_v39  ;;  %v1728_v61 = vand.u32 2147483647, %v4353_v6 }
 0x351   :  { %v4389_v41 = vpop.eup %2991  ;;  %v2428_v48 = vadd.f32 0.1, %v2396_v11  ;;  %v1721_v23 = vsel %vm1720_vm5, %v1718_v56, %v1715_v33  ;;  %v1557_v32 = vmul.f32 1.442695, %v1476_v52  ;;  %v4404_v9 = vmul.f32 30.0, %v4269_v1 }
 0x352   :  { %3005 = vpow2.f32 %v2061_v45  ;;  %v2189_v62 = vadd.f32 1.0, %v4389_v41  ;;  %v4395_v30 = vpop.eup %2993  ;;  %v1889_v12 = vsel %vm1505_vm4, %v4198_v22, %v1721_v23  ;;  %v4407_v39 = vmul.f32 30.0, %v4275_v59 }
 0x353   :  { %3007 = vtanh.f32 %v1346_v60  ;;  %v2463_v49 = vsel %vm2453_vm0, %v1404_v29, %v2428_v48  ;;  %v1921_v43 = vsub.f32 10.0, %v1889_v12  ;;  %v4412_v15 = vmul.f32 30.0, %v4296_v28 }
 0x354   :  { %v2996_v35 = vpop.eup %2995  ;;  %2495 = vst [vmem:[#allocation7 + $0x48] sm:$0xff] %v2463_v49  ;;  %3009 = vlog2.f32 %v2189_v62  ;;  %v1726_v22 = vadd.f32 1.0, %v1725_v58  ;;  %v2192_v60 = vmul.f32 -0.5, %v4389_v41  ;;  %vm4421_vm7 = vcmp.lt.f32.partialorder %v1728_v61, 0.0004427343 }
 0x355   :  { %v4409_v46 = vpop.eup %2997  ;;  %v2198_v29 = vadd.f32 1.0, %v2996_v35  ;;  %3011 = vpow2.f32 %v1557_v32  ;;  %v4417_v55 = vadd.f32 -0.1, %v1921_v43  ;;  %v4427_v28 = vadd.f32 %v4263_v25, %v4288_v27 }
 0x356   :  { %v4414_v17 = vpop.eup %2999  ;;  %3013 = vtanh.f32 %v1347_v53  ;;  %v1731_v1 = vadd.f32 1.0, %v4409_v46  ;;  %v2195_v11 = vand.u32 2147483647, %v4389_v41  ;;  %v2201_v33 = vmul.f32 -0.5, %v2996_v35 }
 0x357   :  { %v3002_v59 = vpop.eup %3001  ;;  %3015 = vlog2.f32 %v2198_v29  ;;  %v1985_v48 = vmin.f32 %v4417_v55, 20.0  ;;  %v1727_v62 = vmul.f32 %v4353_v6, %v1726_v22  ;;  %v2193_v23 = vadd.f32 1.0, %v2192_v60 }
 0x358   :  { %v3004_v45 = vpop.eup %3003  ;;  %v2207_v56 = vadd.f32 1.0, %v3002_v59  ;;  %v2210_v58 = vmul.f32 -0.5, %v3002_v59  ;;  %3017 = vlog2.f32 %v1731_v1  ;;  %v2204_v53 = vand.u32 2147483647, %v2996_v35 }
 0x359   :  { %v1724_v52 = vmul.f32 0.6931472, %v3004_v45  ;;  %v2063_v49 = vmul.f32 1.442695, %v1985_v48  ;;  %v2213_v27 = vand.u32 2147483647, %v3002_v59 }
 0x35a   :  { %3019 = vlog2.f32 %v2207_v56  ;;  %v1734_v32 = vmul.f32 -0.5, %v4409_v46  ;;  %vm4440_vm9 = vcmp.lt.f32.partialorder %v2195_v11, 0.0004427343  ;;  %vm2014_vm10 = vcmp.gt.f32.partialorder %v4336_v42, 20.0 }
 0x35b   :  { %v1730_v61 = vsel %vm4421_vm7, %v1727_v62, %v1724_v52  ;;  %v2202_v6 = vadd.f32 1.0, %v2201_v33  ;;  %v1737_v60 = vand.u32 2147483647, %v4409_v46  ;;  %v2211_v1 = vadd.f32 1.0, %v2210_v58 }
 0x35c   :  { %v4432_v12 = vpop.eup %3005  ;;  %3021 = vpow2.f32 %v2063_v49  ;;  %v1890_v24 = vsel %vm1506_vm6, %v4224_v50, %v1730_v61  ;;  %v4451_v45 = vsub.f32 10.0, %v4427_v28  ;;  %v2194_v56 = vmul.f32 %v4389_v41, %v2193_v23 }
 0x35d   :  { %v4438_v43 = vpop.eup %3007  ;;  %v2216_v22 = vadd.f32 1.0, %v4432_v12  ;;  %vm4454_vm11 = vcmp.lt.f32.partialorder %v2204_v53, 0.0004427343  ;;  %v1922_v33 = vsub.f32 10.0, %v1890_v24  ;;  %vm1507_vm12 = vcmp.gt.f32.partialorder %v4303_v16, 20.0 }
 0x35e   :  { %v3010_v11 = vpop.eup %3009  ;;  %vm2015_vm13 = vcmp.gt.f32.partialorder %v4347_v47, 20.0  ;;  %vm4462_vm14 = vcmp.lt.f32.partialorder %v2213_v27, 0.0004427343  ;;  %v1735_v62 = vadd.f32 1.0, %v1734_v32  ;;  %v1477_v41 = vmin.f32 %v4451_v45, 20.0 }
 0x35f   :  { %3023 = vlog2.f32 %v2216_v22  ;;  %v4459_v58 = vpop.eup %3011  ;;  %v2191_v52 = vmul.f32 0.6931472, %v3010_v11  ;;  %v2203_v53 = vmul.f32 %v2996_v35, %v2202_v6  ;;  %v4469_v49 = vadd.f32 -0.1, %v1922_v33 }
 0x360   :  { %v4467_v23 = vpop.eup %3013  ;;  %vm4471_vm15 = vcmp.lt.f32.partialorder %v1737_v60, 0.0004427343  ;;  %v1740_v22 = vadd.f32 1.0, %v4459_v58  ;;  %v2212_v11 = vmul.f32 %v3002_v59, %v2211_v1  ;;  %v2219_v32 = vmul.f32 -0.5, %v4432_v12 }
 0x361   :  { %v3016_v24 = vpop.eup %3015  ;;  %v2197_v27 = vsel %vm4440_vm9, %v2194_v56, %v2191_v52  ;;  %v1559_v18 = vmul.f32 1.442695, %v1477_v41  ;;  %v2222_v60 = vand.u32 2147483647, %v4432_v12  ;;  %v1986_v33 = vmin.f32 %v4469_v49, 20.0 }
 0x362   :  { %v2397_v35 = vsel %vm2013_vm8, %v4323_v13, %v2197_v27  ;;  %v2200_v6 = vmul.f32 0.6931472, %v3016_v24  ;;  %v3018_v7 = vpop.eup %3017  ;;  %v1736_v40 = vmul.f32 %v4409_v46, %v1735_v62  ;;  %3025 = vlog2.f32 %v1740_v22 }
 0x363   :  { %v2429_v21 = vadd.f32 0.1, %v2397_v35  ;;  %v4487_v59 = vadd.f32 %v4263_v25, %v4292_v4  ;;  %v2065_v56 = vmul.f32 1.442695, %v1986_v33  ;;  %v1733_v13 = vmul.f32 0.6931472, %v3018_v7 }
 0x364   :  { %v3020_v29 = vpop.eup %3019  ;;  %v2206_v1 = vsel %vm4454_vm11, %v2203_v53, %v2200_v6  ;;  %3027 = vpow2.f32 %v1559_v18  ;;  %v2220_v41 = vadd.f32 1.0, %v2219_v32  ;;  %v1743_v53 = vmul.f32 -0.5, %v4459_v58 }
 0x365   :  { %v2464_v52 = vsel %vm2453_vm0, %v4404_v9, %v2429_v21  ;;  %v2398_v46 = vsel %vm2014_vm10, %v4336_v42, %v2206_v1  ;;  %v2209_v62 = vmul.f32 0.6931472, %v3020_v29  ;;  %3029 = vpow2.f32 %v2065_v56 }
 0x366   :  { %2496 = vst [vmem:[#allocation7 + $0x50] sm:$0xff] %v2464_v52  ;;  %v2430_v4 = vadd.f32 0.1, %v2398_v46  ;;  %v1739_v48 = vsel %vm4471_vm15, %v1736_v40, %v1733_v13  ;;  %v3022_v7 = vpop.eup %3021  ;;  %v4506_v42 = vsub.f32 10.0, %v4487_v59  ;;  %v2731_v9 = vadd.f32 %v4008_v0, %v4001_v63 }
 0x367   :  { %v2215_v18 = vsel %vm4462_vm14, %v2212_v11, %v2209_v62  ;;  %v1891_v21 = vsel %vm1507_vm12, %v4303_v16, %v1739_v48  ;;  %v2225_v61 = vadd.f32 1.0, %v3022_v7  ;;  %v1348_v24 = vmul.f32 0.033333335, %v4370_v10 }
 0x368   :  { %v2465_v40 = vsel %vm2453_vm0, %v4407_v39, %v2430_v4  ;;  %v2399_v50 = vsel %vm2015_vm13, %v4347_v47, %v2215_v18  ;;  %vm2016_vm1 = vcmp.gt.f32.partialorder %v4366_v34, 20.0  ;;  %v2221_v11 = vmul.f32 %v4432_v12, %v2220_v41 }
 0x369   :  { %v3024_v22 = vpop.eup %3023  ;;  %2497 = vst [vmem:[#allocation7 + $0x58] sm:$0xff] %v2465_v40  ;;  %v2431_v16 = vadd.f32 0.1, %v2399_v50  ;;  %vm2223_vm2 = vcmp.lt.f32.partialorder %v2222_v60, 0.0004427343  ;;  %3031 = vlog2.f32 %v2225_v61  ;;  %v1923_v63 = vsub.f32 10.0, %v1891_v21 }
 0x36a   :  { %v2218_v27 = vmul.f32 0.6931472, %v3024_v22  ;;  %v1744_v0 = vadd.f32 1.0, %v1743_v53  ;;  %v1746_v47 = vand.u32 2147483647, %v4459_v58  ;;  %v1478_v10 = vmin.f32 %v4506_v42, 20.0 }
 0x36b   :  { %v2466_v39 = vsel %vm2453_vm0, %v4412_v15, %v2431_v16  ;;  %v1408_v35 = vmul.f32 30.0, %v4395_v30  ;;  %v4526_v33 = vadd.f32 -0.1, %v1923_v63  ;;  %3033 = vtanh.f32 %v1348_v24 }
 0x36c   :  { %v2224_v32 = vsel %vm2223_vm2, %v2221_v11, %v2218_v27  ;;  %2498 = vst [vmem:[#allocation7 + $0x60] sm:$0xff] %v2466_v39  ;;  %v3026_v12 = vpop.eup %3025  ;;  %v2228_v29 = vmul.f32 -0.5, %v3022_v7  ;;  %v1561_v1 = vmul.f32 1.442695, %v1478_v10  ;;  %v2734_v15 = vadd.f32 %v4017_v26, %v4011_v36 }
 0x36d   :  { %v2400_v6 = vsel %vm2016_vm1, %v4366_v34, %v2224_v32  ;;  %v1987_v13 = vmin.f32 %v4526_v33, 20.0  ;;  %v1742_v52 = vmul.f32 0.6931472, %v3026_v12  ;;  %v1745_v46 = vmul.f32 %v4459_v58, %v1744_v0 }
 0x36e   :  { %v2432_v60 = vadd.f32 0.1, %v2400_v6  ;;  %v4530_v56 = vpop.eup %3027  ;;  %v2737_v34 = vadd.f32 %v4052_v44, %v4046_v3  ;;  %vm1508_vm3 = vcmp.gt.f32.partialorder %v4385_v51, 20.0  ;;  %vm1747_vm4 = vcmp.lt.f32.partialorder %v1746_v47, 0.0004427343 }
 0x36f   :  { %v4540_v62 = vadd.f32 %v4263_v25, %v2731_v9  ;;  %v4542_v36 = vpop.eup %3029  ;;  %v2067_v26 = vmul.f32 1.442695, %v1987_v13  ;;  %v1748_v41 = vsel %vm1747_vm4, %v1745_v46, %v1742_v52  ;;  %v1749_v4 = vadd.f32 1.0, %v4530_v56 }
 0x370   :  { %v2467_v30 = vsel %vm2453_vm0, %v1408_v35, %v2432_v60  ;;  %3035 = vpow2.f32 %v1561_v1  ;;  %v2229_v58 = vadd.f32 1.0, %v2228_v29  ;;  %v2231_v48 = vand.u32 2147483647, %v3022_v7 }
 0x371   :  { %2499 = vst [vmem:[#allocation7 + $0x68] sm:$0xff] %v2467_v30  ;;  %v2234_v3 = vadd.f32 1.0, %v4542_v36  ;;  %v1892_v44 = vsel %vm1508_vm3, %v4385_v51, %v1748_v41  ;;  %3037 = vpow2.f32 %v2067_v26  ;;  %v4548_v18 = vsub.f32 10.0, %v4540_v62 }
 0x372   :  { %v1924_v53 = vsub.f32 10.0, %v1892_v44  ;;  %vm2017_vm5 = vcmp.gt.f32.partialorder %v4417_v55, 20.0  ;;  %v2230_v40 = vmul.f32 %v3022_v7, %v2229_v58  ;;  %vm2232_vm6 = vcmp.lt.f32.partialorder %v2231_v48, 0.0004427343 }
 0x373   :  { %3039 = vlog2.f32 %v2234_v3  ;;  %v3032_v21 = vpop.eup %3031  ;;  %v1479_v50 = vmin.f32 %v4548_v18, 20.0  ;;  %v2237_v51 = vmul.f32 -0.5, %v4542_v36  ;;  %v1752_v16 = vmul.f32 -0.5, %v4530_v56 }
 0x374   :  { %v4551_v9 = vadd.f32 -0.1, %v1924_v53  ;;  %3041 = vlog2.f32 %v1749_v4  ;;  %v2227_v22 = vmul.f32 0.6931472, %v3032_v21  ;;  %v4558_v27 = vadd.f32 %v4263_v25, %v2734_v15 }
 0x375   :  { %v3034_v61 = vpop.eup %3033  ;;  %v1563_v63 = vmul.f32 1.442695, %v1479_v50  ;;  %v4561_v0 = vadd.f32 %v4263_v25, %v2737_v34  ;;  %v2740_v7 = vadd.f32 %v4069_v54, %v4059_v8  ;;  %v1409_v39 = vmul.f32 30.0, %v4414_v17 }
 0x376   :  { %v1988_v24 = vmin.f32 %v4551_v9, 20.0  ;;  %v2233_v11 = vsel %vm2232_vm6, %v2230_v40, %v2227_v22  ;;  %v4570_v10 = vsub.f32 10.0, %v4558_v27  ;;  %v1410_v6 = vmul.f32 30.0, %v4438_v43 }
 0x377   :  { %v2401_v32 = vsel %vm2017_vm5, %v4417_v55, %v2233_v11  ;;  %3043 = vpow2.f32 %v1563_v63  ;;  %v4574_v12 = vsub.f32 10.0, %v4561_v0  ;;  %v2238_v8 = vadd.f32 1.0, %v2237_v51 }
 0x378   :  { %v2069_v47 = vmul.f32 1.442695, %v1988_v24  ;;  %v2433_v35 = vadd.f32 0.1, %v2401_v32  ;;  %v1349_v54 = vmul.f32 0.033333335, %v4427_v28  ;;  %v4602_v50 = vadd.f32 %v4263_v25, %v2740_v7 }
 0x379   :  { %v1480_v17 = vmin.f32 %v4570_v10, 20.0  ;;  %v2240_v29 = vand.u32 2147483647, %v4542_v36  ;;  %v1753_v1 = vadd.f32 1.0, %v1752_v16  ;;  %v4587_v13 = vmul.f32 30.0, %v4467_v23 }
 0x37a   :  { %v4576_v60 = vpop.eup %3035  ;;  %3045 = vpow2.f32 %v2069_v47  ;;  %v2468_v55 = vsel %vm2453_vm0, %v1409_v39, %v2433_v35  ;;  %v4589_v52 = vmul.f32 30.0, %v3034_v61  ;;  %v1755_v28 = vand.u32 2147483647, %v4530_v56 }
 0x37b   :  { %v1758_v43 = vadd.f32 1.0, %v4576_v60  ;;  %v4584_v15 = vpop.eup %3037  ;;  %2500 = vst [vmem:[#allocation7 + $0x70] sm:$0xff] %v2468_v55  ;;  %v1565_v46 = vmul.f32 1.442695, %v1480_v17  ;;  %vm1509_vm7 = vcmp.gt.f32.partialorder %v4451_v45, 20.0  ;;  %v1481_v26 = vmin.f32 %v4574_v12, 20.0 }
 0x37c   :  { %v2243_v30 = vadd.f32 1.0, %v4584_v15  ;;  %vm2018_vm8 = vcmp.gt.f32.partialorder %v4469_v49, 20.0  ;;  %v2239_v23 = vmul.f32 %v4542_v36, %v2238_v8  ;;  %vm2241_vm9 = vcmp.lt.f32.partialorder %v2240_v29, 0.0004427343 }
 0x37d   :  { %v3040_v34 = vpop.eup %3039  ;;  %3047 = vlog2.f32 %v1758_v43  ;;  %v1754_v48 = vmul.f32 %v4530_v56, %v1753_v1  ;;  %vm1756_vm10 = vcmp.lt.f32.partialorder %v1755_v28, 0.0004427343  ;;  %v1350_v44 = vmul.f32 0.033333335, %v4487_v59 }
 0x37e   :  { %v3042_v41 = vpop.eup %3041  ;;  %v2236_v4 = vmul.f32 0.6931472, %v3040_v34  ;;  %3049 = vpow2.f32 %v1565_v46  ;;  %v1761_v53 = vmul.f32 -0.5, %v4576_v60  ;;  %v1567_v40 = vmul.f32 1.442695, %v1481_v26 }
 0x37f   :  { %3051 = vlog2.f32 %v2243_v30  ;;  %v1751_v58 = vmul.f32 0.6931472, %v3042_v41  ;;  %v2246_v61 = vmul.f32 -0.5, %v4584_v15  ;;  %v4614_v24 = vadd.f32 %v4129_v19, %v4121_v37 }
 0x380   :  { %v2242_v3 = vsel %vm2241_vm9, %v2239_v23, %v2236_v4  ;;  %3053 = vtanh.f32 %v1349_v54  ;;  %v1762_v63 = vadd.f32 1.0, %v1761_v53  ;;  %v1764_v7 = vand.u32 2147483647, %v4576_v60 }
 0x381   :  { %v2402_v21 = vsel %vm2018_vm8, %v4469_v49, %v2242_v3  ;;  %v1757_v22 = vsel %vm1756_vm10, %v1754_v48, %v1751_v58  ;;  %v4608_v51 = vpop.eup %3043  ;;  %3055 = vpow2.f32 %v1567_v40  ;;  %v2743_v49 = vadd.f32 %v4113_v31, %v4101_v57 }
 0x382   :  { %v2434_v36 = vadd.f32 0.1, %v2402_v21  ;;  %v1893_v56 = vsel %vm1509_vm7, %v4451_v45, %v1757_v22  ;;  %v1767_v45 = vadd.f32 1.0, %v4608_v51  ;;  %3057 = vtanh.f32 %v1350_v44 }
 0x383   :  { %v1925_v59 = vsub.f32 10.0, %v1893_v56  ;;  %v4626_v57 = vsub.f32 10.0, %v4602_v50  ;;  %v2247_v31 = vadd.f32 1.0, %v2246_v61  ;;  %vm1510_vm11 = vcmp.gt.f32.partialorder %v4506_v42, 20.0 }
 0x384   :  { %v4616_v16 = vpop.eup %3045  ;;  %v2469_v11 = vsel %vm2453_vm0, %v1410_v6, %v2434_v36  ;;  %v1351_v37 = vmul.f32 0.033333335, %v4540_v62  ;;  %3059 = vlog2.f32 %v1767_v45  ;;  %vm2019_vm12 = vcmp.gt.f32.partialorder %v4526_v33, 20.0 }
 0x385   :  { %2501 = vst [vmem:[#allocation7 + $0x78] sm:$0xff] %v2469_v11  ;;  %v2252_v39 = vadd.f32 1.0, %v4616_v16  ;;  %v4623_v32 = vadd.f32 -0.1, %v1925_v59  ;;  %v2249_v47 = vand.u32 2147483647, %v4584_v15  ;;  %v1763_v54 = vmul.f32 %v4576_v60, %v1762_v63 }
 0x386   :  { %vm1765_vm13 = vcmp.lt.f32.partialorder %v1764_v7, 0.0004427343  ;;  %v1770_v17 = vmul.f32 -0.5, %v4608_v51  ;;  %v2255_v62 = vmul.f32 -0.5, %v4616_v16  ;;  %v1482_v43 = vmin.f32 %v4626_v57, 20.0 }
 0x387   :  { %v3048_v19 = vpop.eup %3047  ;;  %3061 = vlog2.f32 %v2252_v39  ;;  %v1989_v35 = vmin.f32 %v4623_v32, 20.0  ;;  %v2248_v46 = vmul.f32 %v4584_v15, %v2247_v31  ;;  %vm2250_vm14 = vcmp.lt.f32.partialorder %v2249_v47, 0.0004427343 }
 0x388   :  { %v4633_v6 = vpop.eup %3049  ;;  %v1760_v8 = vmul.f32 0.6931472, %v3048_v19  ;;  %3063 = vtanh.f32 %v1351_v37  ;;  %v1773_v30 = vand.u32 2147483647, %v4608_v51  ;;  %v1771_v23 = vadd.f32 1.0, %v1770_v17 }
 0x389   :  { %v3052_v55 = vpop.eup %3051  ;;  %v2071_v29 = vmul.f32 1.442695, %v1989_v35  ;;  %v1776_v1 = vadd.f32 1.0, %v4633_v6  ;;  %v2256_v48 = vadd.f32 1.0, %v2255_v62  ;;  %v1779_v3 = vmul.f32 -0.5, %v4633_v6 }
 0x38a   :  { %v2245_v28 = vmul.f32 0.6931472, %v3052_v55  ;;  %v1766_v34 = vsel %vm1765_vm13, %v1763_v54, %v1760_v8  ;;  %v4645_v26 = vpop.eup %3053  ;;  %v1569_v44 = vmul.f32 1.442695, %v1482_v43  ;;  %vm2020_vm15 = vcmp.gt.f32.partialorder %v4551_v9, 20.0 }
 0x38b   :  { %3065 = vpow2.f32 %v2071_v29  ;;  %v1894_v60 = vsel %vm1510_vm11, %v4506_v42, %v1766_v34  ;;  %v4647_v58 = vpop.eup %3055  ;;  %v2258_v40 = vand.u32 2147483647, %v4616_v16  ;;  %vm4660_vm1 = vcmp.lt.f32.partialorder %v1773_v30, 0.0004427343 }
 0x38c   :  { %v2251_v41 = vsel %vm2250_vm14, %v2248_v46, %v2245_v28  ;;  %v1926_v4 = vsub.f32 10.0, %v1894_v60  ;;  %3067 = vlog2.f32 %v1776_v1  ;;  %v1785_v21 = vadd.f32 1.0, %v4647_v58  ;;  %v4657_v22 = vpop.eup %3057 }
 0x38d   :  { %v2403_v15 = vsel %vm2019_vm12, %v4526_v33, %v2251_v41  ;;  %3069 = vpow2.f32 %v1569_v44  ;;  %v4665_v33 = vadd.f32 %v4263_v25, %v2743_v49  ;;  %v1772_v11 = vmul.f32 %v4608_v51, %v1771_v23 }
 0x38e   :  { %v2435_v53 = vadd.f32 0.1, %v2403_v15  ;;  %v4654_v42 = vadd.f32 -0.1, %v1926_v4  ;;  %v3060_v61 = vpop.eup %3059  ;;  %3071 = vlog2.f32 %v1785_v21  ;;  %v2257_v7 = vmul.f32 %v4616_v16, %v2256_v48 }
 0x38f   :  { %v1769_v45 = vmul.f32 0.6931472, %v3060_v61  ;;  %v1780_v39 = vadd.f32 1.0, %v1779_v3  ;;  %v4674_v31 = vsub.f32 10.0, %v4665_v33  ;;  %v1788_v19 = vmul.f32 -0.5, %v4647_v58 }
 0x390   :  { %v2470_v56 = vsel %vm2453_vm0, %v4587_v13, %v2435_v53  ;;  %v1990_v59 = vmin.f32 %v4654_v42, 20.0  ;;  %v4679_v13 = vadd.f32 %v4176_v14, %v4163_v38  ;;  %vm2259_vm2 = vcmp.lt.f32.partialorder %v2258_v40, 0.0004427343 }
 0x391   :  { %v3062_v63 = vpop.eup %3061  ;;  %2502 = vst [vmem:[#allocation7 + $0x80] sm:$0xff] %v2470_v56  ;;  %vm1511_vm3 = vcmp.gt.f32.partialorder %v4548_v18, 20.0  ;;  %v1775_v51 = vsel %vm4660_vm1, %v1772_v11, %v1769_v45  ;;  %v1483_v16 = vmin.f32 %v4674_v31, 20.0  ;;  %v1782_v54 = vand.u32 2147483647, %v4633_v6 }
 0x392   :  { %v2254_v49 = vmul.f32 0.6931472, %v3062_v63  ;;  %v2073_v37 = vmul.f32 1.442695, %v1990_v59  ;;  %v4685_v47 = vpop.eup %3063  ;;  %v1895_v8 = vsel %vm1511_vm3, %v4548_v18, %v1775_v51  ;;  %v1352_v55 = vmul.f32 0.033333335, %v4558_v27 }
 0x393   :  { %v1927_v14 = vsub.f32 10.0, %v1895_v8  ;;  %v1353_v62 = vmul.f32 0.033333335, %v4561_v0  ;;  %v1781_v28 = vmul.f32 %v4633_v6, %v1780_v39  ;;  %v1789_v18 = vadd.f32 1.0, %v1788_v19 }
 0x394   :  { %v2260_v35 = vsel %vm2259_vm2, %v2257_v7, %v2254_v49  ;;  %3073 = vpow2.f32 %v2073_v37  ;;  %v1571_v60 = vmul.f32 1.442695, %v1483_v16  ;;  %v4702_v30 = vadd.f32 %v4263_v25, %v4614_v24 }
 0x395   :  { %v4689_v17 = vpop.eup %3065  ;;  %v2404_v38 = vsel %vm2020_vm15, %v4551_v9, %v2260_v35  ;;  %v4698_v46 = vadd.f32 -0.1, %v1927_v14  ;;  %vm1783_vm4 = vcmp.lt.f32.partialorder %v1782_v54, 0.0004427343  ;;  %v1791_v27 = vand.u32 2147483647, %v4647_v58 }
 0x396   :  { %v3068_v29 = vpop.eup %3067  ;;  %v2436_v1 = vadd.f32 0.1, %v2404_v38  ;;  %v2261_v43 = vadd.f32 1.0, %v4689_v17  ;;  %vm1512_vm5 = vcmp.gt.f32.partialorder %v4570_v10, 20.0  ;;  %v2264_v24 = vmul.f32 -0.5, %v4689_v17 }
 0x397   :  { %v1778_v34 = vmul.f32 0.6931472, %v3068_v29  ;;  %v4708_v0 = vpop.eup %3069  ;;  %v1991_v6 = vmin.f32 %v4698_v46, 20.0  ;;  %v4717_v53 = vsub.f32 10.0, %v4702_v30  ;;  %vm1513_vm6 = vcmp.gt.f32.partialorder %v4574_v12, 20.0 }
 0x398   :  { %v2471_v9 = vsel %vm2453_vm0, %v4589_v52, %v2436_v1  ;;  %3075 = vlog2.f32 %v2261_v43  ;;  %v3072_v4 = vpop.eup %3071  ;;  %v1790_v52 = vmul.f32 %v4647_v58, %v1789_v18  ;;  %v1794_v15 = vadd.f32 1.0, %v4708_v0 }
 0x399   :  { %2503 = vst [vmem:[#allocation7 + $0x88] sm:$0xff] %v2471_v9  ;;  %v1784_v41 = vsel %vm1783_vm4, %v1781_v28, %v1778_v34  ;;  %3077 = vpow2.f32 %v1571_v60  ;;  %v2075_v48 = vmul.f32 1.442695, %v1991_v6  ;;  %v1787_v44 = vmul.f32 0.6931472, %v3072_v4 }
 0x39a   :  { %v1896_v23 = vsel %vm1512_vm5, %v4570_v10, %v1784_v41  ;;  %vm1792_vm7 = vcmp.lt.f32.partialorder %v1791_v27, 0.0004427343  ;;  %3079 = vlog2.f32 %v1794_v15  ;;  %v1797_v21 = vmul.f32 -0.5, %v4708_v0  ;;  %v5101_v15 = vld [vmem:[#allocation11_spill] sm:$0xff] }
 0x39b   :  { %v1928_v3 = vsub.f32 10.0, %v1896_v23  ;;  %3081 = vpow2.f32 %v2075_v48  ;;  %v1793_v10 = vsel %vm1792_vm7, %v1790_v52, %v1787_v44  ;;  %v1484_v58 = vmin.f32 %v4717_v53, 20.0  ;;  %v5102_v48 = vld [vmem:[#allocation12_spill] sm:$0xff] }
 0x39c   :  { %3083 = vtanh.f32 %v1352_v55  ;;  %v1897_v61 = vsel %vm1513_vm6, %v4574_v12, %v1793_v10  ;;  %v2265_v56 = vadd.f32 1.0, %v2264_v24  ;;  %v2267_v59 = vand.u32 2147483647, %v4689_v17  ;;  %v5103_v10 = vld [vmem:[#allocation13_spill] sm:$0xff] }
 0x39d   :  { %v4721_v40 = vadd.f32 -0.1, %v1928_v3  ;;  %v1413_v7 = vmul.f32 30.0, %v4645_v26  ;;  %3085 = vtanh.f32 %v1353_v62  ;;  %v1929_v45 = vsub.f32 10.0, %v1897_v61  ;;  %v5105_v61 = vld [vmem:[#allocation15_spill] sm:$0xff] }
 0x39e   :  { %v4724_v36 = vpop.eup %3073  ;;  %v1573_v39 = vmul.f32 1.442695, %v1484_v58  ;;  %v1354_v37 = vmul.f32 0.033333335, %v4602_v50  ;;  %v1798_v19 = vadd.f32 1.0, %v1797_v21  ;;  %v4733_v12 = vmul.f32 30.0, %v4657_v22 }
 0x39f   :  { %v2270_v11 = vadd.f32 1.0, %v4724_v36  ;;  %v1992_v63 = vmin.f32 %v4721_v40, 20.0  ;;  %v4735_v16 = vadd.f32 -0.1, %v1929_v45  ;;  %v4739_v35 = vadd.f32 %v4263_v25, %v4679_v13 }
 0x3a0   :  { %v2266_v54 = vmul.f32 %v4689_v17, %v2265_v56  ;;  %vm2268_vm8 = vcmp.lt.f32.partialorder %v2267_v59, 0.0004427343  ;;  %v2273_v50 = vmul.f32 -0.5, %v4724_v36  ;;  %v1800_v22 = vand.u32 2147483647, %v4708_v0  ;;  %v5106_v56 = vld [vmem:[#allocation16_spill] sm:$0xff] }
 0x3a1   :  { %3087 = vlog2.f32 %v2270_v11  ;;  %v2077_v49 = vmul.f32 1.442695, %v1992_v63  ;;  %v1993_v38 = vmin.f32 %v4735_v16, 20.0  ;;  %vm2021_vm9 = vcmp.gt.f32.partialorder %v4623_v32, 20.0 }
 0x3a2   :  { %v3076_v51 = vpop.eup %3075  ;;  %3089 = vpow2.f32 %v1573_v39  ;;  %v1799_v25 = vmul.f32 %v4708_v0, %v1798_v19  ;;  %v4752_v29 = vsub.f32 10.0, %v4739_v35  ;;  %v2276_v28 = vand.u32 2147483647, %v4724_v36 }
 0x3a3   :  { %v4741_v26 = vpop.eup %3077  ;;  %v2263_v8 = vmul.f32 0.6931472, %v3076_v51  ;;  %3091 = vpow2.f32 %v2077_v49  ;;  %v2079_v17 = vmul.f32 1.442695, %v1993_v38  ;;  %v2752_v34 = vadd.f32 %v4209_v20, %v4200_v5 }
 0x3a4   :  { %v1803_v14 = vadd.f32 1.0, %v4741_v26  ;;  %3093 = vtanh.f32 %v1354_v37  ;;  %v3080_v13 = vpop.eup %3079  ;;  %v2274_v9 = vadd.f32 1.0, %v2273_v50  ;;  %vm1801_vm10 = vcmp.lt.f32.partialorder %v1800_v22, 0.0004427343 }
 0x3a5   :  { %v2269_v55 = vsel %vm2268_vm8, %v2266_v54, %v2263_v8  ;;  %v4754_v1 = vpop.eup %3081  ;;  %v1796_v18 = vmul.f32 0.6931472, %v3080_v13  ;;  %vm1514_vm11 = vcmp.gt.f32.partialorder %v4626_v57, 20.0  ;;  %v1806_v6 = vmul.f32 -0.5, %v4741_v26 }
 0x3a6   :  { %v2405_v62 = vsel %vm2021_vm9, %v4623_v32, %v2269_v55  ;;  %3095 = vlog2.f32 %v1803_v14  ;;  %v4759_v60 = vpop.eup %3083  ;;  %v2279_v27 = vadd.f32 1.0, %v4754_v1  ;;  %v4769_v5 = vmul.f32 30.0, %v4685_v47  ;;  %v4809_v14 = vld [vmem:[%s5053_s6] ss:$0 sm:$0xff]  ;;  %s3264_s6 = smov [#allocation7]  }
 0x3a7   :  { %v2437_v43 = vadd.f32 0.1, %v2405_v62  ;;  %3097 = vpow2.f32 %v2079_v17  ;;  %v1802_v0 = vsel %vm1801_vm10, %v1799_v25, %v1796_v18  ;;  %v4766_v41 = vpop.eup %3085  ;;  %v1485_v4 = vmin.f32 %v4752_v29, 20.0  ;;  %s2523_s16 = sshll.u32 %s3264_s6, 4  ;;  %s2524_s16 = int_to_ptr.vmem [resolvable:$true] %s2523_s16 }
 0x3a8   :  { %3099 = vlog2.f32 %v2279_v27  ;;  %v1898_v20 = vsel %vm1514_vm11, %v4626_v57, %v1802_v0  ;;  %vm2022_vm12 = vcmp.gt.f32.partialorder %v4654_v42, 20.0  ;;  %vm4774_vm13 = vcmp.lt.f32.partialorder %v2276_v28, 0.0004427343  ;;  %v5104_v57 = vld [vmem:[#allocation14_spill] sm:$0xff]  ;;  %s3229_s17 = scalar_lea.vmem %s2524_s16, 4096  ;;  %p3234_p3 = scmp.lt.s32.totalorder %s2524_s16, %s2524_s16 }
 0x3a9   :  { %v2472_v32 = vsel %vm2453_vm0, %v1413_v7, %v2437_v43  ;;  %v1930_v52 = vsub.f32 10.0, %v1898_v20  ;;  %v2755_v3 = vadd.f32 %v5102_v48, %v5101_v15  ;;  %v2275_v21 = vmul.f32 %v4724_v36, %v2274_v9  ;;  %p3230_p2 = scmp.ne.s32.totalorder %s2524_s16, %s3229_s17  ;;  %p3235_p4 = scmp.lt.s32.totalorder %s3229_s17, %s3229_s17 }
 0x3aa   :  { %2504 = vst [vmem:[#allocation7 + $0x90] sm:$0xff] %v2472_v32  ;;  %v4785_v58 = vadd.f32 %v5104_v57, %v5103_v10  ;;  %v4789_v59 = vadd.f32 %v5106_v56, %v5105_v61  ;;  %v2282_v63 = vmul.f32 -0.5, %v4754_v1  ;;  %v1807_v45 = vadd.f32 1.0, %v1806_v6 }
 0x3ab   :  { %v3088_v24 = vpop.eup %3087  ;;  %v4792_v7 = vadd.f32 -0.1, %v1930_v52  ;;  %vm1515_vm14 = vcmp.gt.f32.partialorder %v4674_v31, 20.0  ;;  %v1575_v37 = vmul.f32 1.442695, %v1485_v4  ;;  %v4812_v55 = vadd.f32 %v4809_v14, %v2752_v34  ;;  %p3236_p5 = por %p3235_p4, %p3234_p3 }
 0x3ac   :  { %v4780_v44 = vpop.eup %3089  ;;  %v2272_v47 = vmul.f32 0.6931472, %v3088_v24  ;;  %v1809_v54 = vand.u32 2147483647, %v4741_v26  ;;  %v2285_v22 = vand.u32 2147483647, %v4754_v1  ;;  %v1808_v62 = vmul.f32 %v4741_v26, %v1807_v45 }
 0x3ad   :  { %v3092_v11 = vpop.eup %3091  ;;  %v1812_v39 = vadd.f32 1.0, %v4780_v44  ;;  %v1994_v8 = vmin.f32 %v4792_v7, 20.0  ;;  %v2283_v25 = vadd.f32 1.0, %v2282_v63  ;;  %v1815_v18 = vmul.f32 -0.5, %v4780_v44  ;;  %v5111_v63 = vld [vmem:[#allocation17_spill] sm:$0xff]  ;;  %v5112_v45 = vld [vmem:[#allocation18_spill] sm:$0xff]  ;;  %p3237_p6 = pnand %p3236_p5, %p3230_p2 }
 0x3ae   :  { %v2278_v49 = vsel %vm4774_vm13, %v2275_v21, %v2272_v47  ;;  %v2288_v36 = vadd.f32 1.0, %v3092_v11  ;;  %v4798_v19 = vpop.eup %3093  ;;  %v2291_v28 = vmul.f32 -0.5, %v3092_v11  ;;  %vm2023_vm15 = vcmp.gt.f32.partialorder %v4698_v46, 20.0 }
 0x3af   :  { %v2406_v51 = vsel %vm2022_vm12, %v4654_v42, %v2278_v49  ;;  %3101 = vlog2.f32 %v1812_v39  ;;  %v2081_v42 = vmul.f32 1.442695, %v1994_v8  ;;  %vm1810_vm1 = vcmp.lt.f32.partialorder %v1809_v54, 0.0004427343 }
 0x3b0   :  { %v3096_v50 = vpop.eup %3095  ;;  %v2438_v38 = vadd.f32 0.1, %v2406_v51  ;;  %3103 = vlog2.f32 %v2288_v36  ;;  %vm4823_vm2 = vcmp.lt.f32.partialorder %v2285_v22, 0.0004427343  ;;  %vm1516_vm3 = vcmp.gt.f32.partialorder %v4717_v53, 20.0 }
 0x3b1   :  { %v1805_v13 = vmul.f32 0.6931472, %v3096_v50  ;;  %v4815_v17 = vpop.eup %3097  ;;  %3105 = vpow2.f32 %v1575_v37  ;;  %v2284_v0 = vmul.f32 %v4754_v1, %v2283_v25  ;;  %v2294_v6 = vand.u32 2147483647, %v3092_v11 }
 0x3b2   :  { %v2473_v43 = vsel %vm2453_vm0, %v4733_v12, %v2438_v38  ;;  %v2297_v34 = vadd.f32 1.0, %v4815_v17  ;;  %3107 = vpow2.f32 %v2081_v42  ;;  %v3100_v9 = vpop.eup %3099  ;;  %v4829_v12 = vsub.f32 10.0, %v4812_v55 }
 0x3b3   :  { %2505 = vst [vmem:[#allocation7 + $0x98] sm:$0xff] %v2473_v43  ;;  %v1811_v27 = vsel %vm1810_vm1, %v1808_v62, %v1805_v13  ;;  %v2281_v32 = vmul.f32 0.6931472, %v3100_v9  ;;  %v2292_v20 = vadd.f32 1.0, %v2291_v28  ;;  %v1816_v24 = vadd.f32 1.0, %v1815_v18 }
 0x3b4   :  { %3109 = vlog2.f32 %v2297_v34  ;;  %v1899_v4 = vsel %vm1515_vm14, %v4674_v31, %v1811_v27  ;;  %v1486_v23 = vmin.f32 %v4829_v12, 20.0  ;;  %vm2024_vm4 = vcmp.gt.f32.partialorder %v4721_v40, 20.0 }
 0x3b5   :  { %v2287_v52 = vsel %vm4823_vm2, %v2284_v0, %v2281_v32  ;;  %v1931_v15 = vsub.f32 10.0, %v1899_v4  ;;  %v1818_v48 = vand.u32 2147483647, %v4780_v44  ;;  %v2300_v47 = vmul.f32 -0.5, %v4815_v17 }
 0x3b6   :  { %v2407_v1 = vsel %vm2023_vm15, %v4698_v46, %v2287_v52  ;;  %v1577_v21 = vmul.f32 1.442695, %v1486_v23  ;;  %v4845_v31 = vadd.f32 %v4809_v14, %v2755_v3  ;;  %vm4847_vm5 = vcmp.lt.f32.partialorder %v2294_v6, 0.0004427343 }
 0x3b7   :  { %v2439_v57 = vadd.f32 0.1, %v2407_v1  ;;  %v4851_v56 = vadd.f32 -0.1, %v1931_v15  ;;  %v4855_v39 = vadd.f32 %v5112_v45, %v5111_v63  ;;  %v2293_v46 = vmul.f32 %v3092_v11, %v2292_v20 }
 0x3b8   :  { %v1817_v37 = vmul.f32 %v4780_v44, %v1816_v24  ;;  %3111 = vpow2.f32 %v1577_v21  ;;  %vm1819_vm6 = vcmp.lt.f32.partialorder %v1818_v48, 0.0004427343  ;;  %v2301_v50 = vadd.f32 1.0, %v2300_v47 }
 0x3b9   :  { %v3102_v10 = vpop.eup %3101  ;;  %v2474_v3 = vsel %vm2453_vm0, %v4769_v5, %v2439_v57  ;;  %v1995_v8 = vmin.f32 %v4851_v56, 20.0  ;;  %v2303_v38 = vand.u32 2147483647, %v4815_v17  ;;  %v4866_v11 = vsub.f32 10.0, %v4845_v31 }
 0x3ba   :  { %v3104_v49 = vpop.eup %3103  ;;  %v1814_v36 = vmul.f32 0.6931472, %v3102_v10  ;;  %2506 = vst [vmem:[#allocation7 + $0xa0] sm:$0xff] %v2474_v3  ;;  %v1416_v18 = vmul.f32 30.0, %v4759_v60  ;;  %v2302_v27 = vmul.f32 %v4815_v17, %v2301_v50  ;;  %vm2025_vm8 = vcmp.gt.f32.partialorder %v4735_v16, 20.0 }
 0x3bb   :  { %v2290_v51 = vmul.f32 0.6931472, %v3104_v49  ;;  %v4862_v54 = vpop.eup %3105  ;;  %v2083_v42 = vmul.f32 1.442695, %v1995_v8  ;;  %v1487_v32 = vmin.f32 %v4866_v11, 20.0  ;;  %v4887_v60 = vadd.f32 %v4809_v14, %v4785_v58 }
 0x3bc   :  { %v1820_v22 = vsel %vm1819_vm6, %v1817_v37, %v1814_v36  ;;  %v3108_v44 = vpop.eup %3107  ;;  %v1821_v13 = vadd.f32 1.0, %v4862_v54  ;;  %vm2304_vm7 = vcmp.lt.f32.partialorder %v2303_v38, 0.0004427343  ;;  %v1417_v17 = vmul.f32 30.0, %v4766_v41 }
 0x3bd   :  { %v2296_v25 = vsel %vm4847_vm5, %v2293_v46, %v2290_v51  ;;  %v1900_v5 = vsel %vm1516_vm3, %v4717_v53, %v1820_v22  ;;  %v2306_v43 = vadd.f32 1.0, %v3108_v44  ;;  %3113 = vpow2.f32 %v2083_v42 }
 0x3be   :  { %v2408_v62 = vsel %vm2024_vm4, %v4721_v40, %v2296_v25  ;;  %v3110_v28 = vpop.eup %3109  ;;  %v1932_v9 = vsub.f32 10.0, %v1900_v5  ;;  %v2309_v20 = vmul.f32 -0.5, %v3108_v44  ;;  %v1824_v52 = vmul.f32 -0.5, %v4862_v54 }
 0x3bf   :  { %v2440_v34 = vadd.f32 0.1, %v2408_v62  ;;  %v2299_v26 = vmul.f32 0.6931472, %v3110_v28  ;;  %3115 = vlog2.f32 %v2306_v43  ;;  %v1579_v15 = vmul.f32 1.442695, %v1487_v32 }
 0x3c0   :  { %v4882_v0 = vadd.f32 -0.1, %v1932_v9  ;;  %3117 = vlog2.f32 %v1821_v13  ;;  %v4897_v48 = vadd.f32 %v4809_v14, %v4789_v59  ;;  %v1355_v58 = vmul.f32 0.033333335, %v4665_v33 }
 0x3c1   :  { %v2475_v53 = vsel %vm2453_vm0, %v1416_v18, %v2440_v34  ;;  %v2305_v40 = vsel %vm2304_vm7, %v2302_v27, %v2299_v26  ;;  %3119 = vpow2.f32 %v1579_v15  ;;  %v4904_v47 = vsub.f32 10.0, %v4887_v60 }
 0x3c2   :  { %2507 = vst [vmem:[#allocation7 + $0xa8] sm:$0xff] %v2475_v53  ;;  %v2409_v6 = vsel %vm2025_vm8, %v4735_v16, %v2305_v40  ;;  %v1996_v4 = vmin.f32 %v4882_v0, 20.0  ;;  %v4892_v24 = vpop.eup %3111  ;;  %v2310_v21 = vadd.f32 1.0, %v2309_v20  ;;  %v2312_v10 = vand.u32 2147483647, %v3108_v44 }
 0x3c3   :  { %v2441_v23 = vadd.f32 0.1, %v2409_v6  ;;  %v1830_v41 = vadd.f32 1.0, %v4892_v24  ;;  %v1825_v57 = vadd.f32 1.0, %v1824_v52  ;;  %v1488_v59 = vmin.f32 %v4904_v47, 20.0 }
 0x3c4   :  { %v2085_v1 = vmul.f32 1.442695, %v1996_v4  ;;  %v4908_v33 = vsub.f32 10.0, %v4897_v48  ;;  %v1418_v63 = vmul.f32 30.0, %v4798_v19  ;;  %vm1517_vm9 = vcmp.gt.f32.partialorder %v4752_v29, 20.0 }
 0x3c5   :  { %v2476_v16 = vsel %vm2453_vm0, %v1417_v17, %v2441_v23  ;;  %v1827_v45 = vand.u32 2147483647, %v4862_v54  ;;  %v1833_v36 = vmul.f32 -0.5, %v4892_v24  ;;  %v1581_v37 = vmul.f32 1.442695, %v1488_v59 }
 0x3c6   :  { %2508 = vst [vmem:[#allocation7 + $0xb0] sm:$0xff] %v2476_v16  ;;  %3121 = vpow2.f32 %v2085_v1  ;;  %v4919_v3 = vadd.f32 %v4809_v14, %v4855_v39  ;;  %vm2026_vm10 = vcmp.gt.f32.partialorder %v4792_v7, 20.0  ;;  %v2311_v19 = vmul.f32 %v3108_v44, %v2310_v21 }
 0x3c7   :  { %3123 = vlog2.f32 %v1830_v41  ;;  %v4910_v61 = vpop.eup %3113  ;;  %v1489_v50 = vmin.f32 %v4908_v33, 20.0  ;;  %vm2313_vm11 = vcmp.lt.f32.partialorder %v2312_v10, 0.0004427343  ;;  %v1826_v22 = vmul.f32 %v4862_v54, %v1825_v57 }
 0x3c8   :  { %3125 = vtanh.f32 %v1355_v58  ;;  %v2315_v46 = vadd.f32 1.0, %v4910_v61  ;;  %vm1828_vm12 = vcmp.lt.f32.partialorder %v1827_v45, 0.0004427343  ;;  %v1834_v39 = vadd.f32 1.0, %v1833_v36 }
 0x3c9   :  { %v3116_v49 = vpop.eup %3115  ;;  %v1583_v42 = vmul.f32 1.442695, %v1489_v50  ;;  %v4926_v13 = vsub.f32 10.0, %v4919_v3  ;;  %v2318_v44 = vmul.f32 -0.5, %v4910_v61  ;;  %v1836_v18 = vand.u32 2147483647, %v4892_v24 }
 0x3ca   :  { %v3118_v51 = vpop.eup %3117  ;;  %v2308_v8 = vmul.f32 0.6931472, %v3116_v49  ;;  %3127 = vlog2.f32 %v2315_v46  ;;  %v1356_v9 = vmul.f32 0.033333335, %v4702_v30  ;;  %v1835_v20 = vmul.f32 %v4892_v24, %v1834_v39 }
 0x3cb   :  { %v1823_v38 = vmul.f32 0.6931472, %v3118_v51  ;;  %3129 = vpow2.f32 %v1581_v37  ;;  %v4932_v54 = vpop.eup %3119  ;;  %v1490_v53 = vmin.f32 %v4926_v13, 20.0  ;;  %v2319_v17 = vadd.f32 1.0, %v2318_v44 }
 0x3cc   :  { %v2314_v25 = vsel %vm2313_vm11, %v2311_v19, %v2308_v8  ;;  %3131 = vpow2.f32 %v1583_v42  ;;  %v1839_v26 = vadd.f32 1.0, %v4932_v54  ;;  %v2321_v4 = vand.u32 2147483647, %v4910_v61 }
 0x3cd   :  { %v2410_v5 = vsel %vm2026_vm10, %v4792_v7, %v2314_v25  ;;  %v1829_v14 = vsel %vm1828_vm12, %v1826_v22, %v1823_v38  ;;  %vm1837_vm13 = vcmp.lt.f32.partialorder %v1836_v18, 0.0004427343  ;;  %vm1518_vm14 = vcmp.gt.f32.partialorder %v4829_v12, 20.0 }
 0x3ce   :  { %v2442_v62 = vadd.f32 0.1, %v2410_v5  ;;  %v1901_v43 = vsel %vm1517_vm9, %v4752_v29, %v1829_v14  ;;  %3133 = vlog2.f32 %v1839_v26  ;;  %v1842_v1 = vmul.f32 -0.5, %v4932_v54 }
 0x3cf   :  { %v1933_v28 = vsub.f32 10.0, %v1901_v43  ;;  %v1585_v41 = vmul.f32 1.442695, %v1490_v53  ;;  %v2320_v21 = vmul.f32 %v4910_v61, %v2319_v17  ;;  %vm2322_vm15 = vcmp.lt.f32.partialorder %v2321_v4, 0.0004427343 }
 0x3d0   :  { %v4935_v34 = vpop.eup %3121  ;;  %v2477_v7 = vsel %vm2453_vm0, %v1418_v63, %v2442_v62  ;;  %vm2027_vm1 = vcmp.gt.f32.partialorder %v4851_v56, 20.0  ;;  %v1843_v36 = vadd.f32 1.0, %v1842_v1  ;;  %v1845_v61 = vand.u32 2147483647, %v4932_v54 }
 0x3d1   :  { %v3124_v27 = vpop.eup %3123  ;;  %2509 = vst [vmem:[#allocation7 + $0xb8] sm:$0xff] %v2477_v7  ;;  %v2324_v32 = vadd.f32 1.0, %v4935_v34  ;;  %v4942_v29 = vadd.f32 -0.1, %v1933_v28  ;;  %v2327_v10 = vmul.f32 -0.5, %v4935_v34  ;;  %vm2028_vm3 = vcmp.gt.f32.partialorder %v4882_v0, 20.0 }
 0x3d2   :  { %v3126_v40 = vpop.eup %3125  ;;  %v1832_v6 = vmul.f32 0.6931472, %v3124_v27  ;;  %v2330_v50 = vand.u32 2147483647, %v4935_v34  ;;  %v1844_v14 = vmul.f32 %v4932_v54, %v1843_v36  ;;  %vm1846_vm2 = vcmp.lt.f32.partialorder %v1845_v61, 0.0004427343 }
 0x3d3   :  { %3135 = vlog2.f32 %v2324_v32  ;;  %v1997_v30 = vmin.f32 %v4942_v29, 20.0  ;;  %v1419_v59 = vmul.f32 30.0, %v3126_v40  ;;  %v2328_v51 = vadd.f32 1.0, %v2327_v10 }
 0x3d4   :  { %3137 = vtanh.f32 %v1356_v9  ;;  %v1838_v23 = vsel %vm1837_vm13, %v1835_v20, %v1832_v6  ;;  %v3128_v52 = vpop.eup %3127  ;;  %vm2331_vm4 = vcmp.lt.f32.partialorder %v2330_v50, 0.0004427343  ;;  %vm1519_vm5 = vcmp.gt.f32.partialorder %v4866_v11, 20.0 }
 0x3d5   :  { %v2087_v15 = vmul.f32 1.442695, %v1997_v30  ;;  %v1902_v58 = vsel %vm1518_vm14, %v4829_v12, %v1838_v23  ;;  %v4951_v16 = vpop.eup %3129  ;;  %v2317_v24 = vmul.f32 0.6931472, %v3128_v52  ;;  %v2329_v44 = vmul.f32 %v4935_v34, %v2328_v51 }
 0x3d6   :  { %v1934_v57 = vsub.f32 10.0, %v1902_v58  ;;  %v1848_v63 = vadd.f32 1.0, %v4951_v16  ;;  %v4956_v45 = vpop.eup %3131  ;;  %v1851_v42 = vmul.f32 -0.5, %v4951_v16  ;;  %v1357_v27 = vmul.f32 0.033333335, %v4739_v35 }
 0x3d7   :  { %3139 = vpow2.f32 %v2087_v15  ;;  %v2323_v12 = vsel %vm2322_vm15, %v2320_v21, %v2317_v24  ;;  %v1857_v19 = vadd.f32 1.0, %v4956_v45  ;;  %v1860_v9 = vmul.f32 -0.5, %v4956_v45 }
 0x3d8   :  { %v4959_v49 = vadd.f32 -0.1, %v1934_v57  ;;  %3141 = vpow2.f32 %v1585_v41  ;;  %v2411_v46 = vsel %vm2027_vm1, %v4851_v56, %v2323_v12  ;;  %v3134_v38 = vpop.eup %3133  ;;  %v1852_v7 = vadd.f32 1.0, %v1851_v42 }
 0x3d9   :  { %3143 = vlog2.f32 %v1848_v63  ;;  %v2443_v37 = vadd.f32 0.1, %v2411_v46  ;;  %v1841_v5 = vmul.f32 0.6931472, %v3134_v38  ;;  %v1854_v6 = vand.u32 2147483647, %v4951_v16 }
 0x3da   :  { %v1998_v8 = vmin.f32 %v4959_v49, 20.0  ;;  %3145 = vlog2.f32 %v1857_v19  ;;  %v1853_v23 = vmul.f32 %v4951_v16, %v1852_v7  ;;  %v1863_v15 = vand.u32 2147483647, %v4956_v45 }
 0x3db   :  { %v2478_v22 = vsel %vm2453_vm0, %v1419_v59, %v2443_v37  ;;  %v1847_v43 = vsel %vm1846_vm2, %v1844_v14, %v1841_v5  ;;  %vm1520_vm6 = vcmp.gt.f32.partialorder %v4904_v47, 20.0  ;;  %vm1855_vm7 = vcmp.lt.f32.partialorder %v1854_v6, 0.0004427343 }
 0x3dc   :  { %v2089_v25 = vmul.f32 1.442695, %v1998_v8  ;;  %2510 = vst [vmem:[#allocation7 + $0xc0] sm:$0xff] %v2478_v22  ;;  %v1903_v18 = vsel %vm1519_vm5, %v4866_v11, %v1847_v43  ;;  %v1358_v63 = vmul.f32 0.033333335, %v4812_v55  ;;  %vm1521_vm9 = vcmp.gt.f32.partialorder %v4908_v33, 20.0 }
 0x3dd   :  { %v3136_v56 = vpop.eup %3135  ;;  %v1935_v34 = vsub.f32 10.0, %v1903_v18  ;;  %vm1864_vm8 = vcmp.lt.f32.partialorder %v1863_v15, 0.0004427343  ;;  %vm1522_vm11 = vcmp.gt.f32.partialorder %v4926_v13, 20.0  ;;  %vm2029_vm12 = vcmp.gt.f32.partialorder %v4942_v29, 20.0 }
 0x3de   :  { %v3138_v39 = vpop.eup %3137  ;;  %v2326_v62 = vmul.f32 0.6931472, %v3136_v56  ;;  %3147 = vpow2.f32 %v2089_v25  ;;  %vm2030_vm15 = vcmp.gt.f32.partialorder %v4959_v49, 20.0 }
 0x3df   :  { %v1420_v53 = vmul.f32 30.0, %v3138_v39  ;;  %v4978_v4 = vadd.f32 -0.1, %v1935_v34 }
 0x3e0   :  { %v2332_v28 = vsel %vm2331_vm4, %v2329_v44, %v2326_v62 }
 0x3e1   :  { %v3140_v26 = vpop.eup %3139  ;;  %v2412_v54 = vsel %vm2028_vm3, %v4882_v0, %v2332_v28  ;;  %v1861_v0 = vadd.f32 1.0, %v1860_v9  ;;  %v1999_v35 = vmin.f32 %v4978_v4, 20.0  ;;  %vm2031_vm2 = vcmp.gt.f32.partialorder %v4978_v4, 20.0 }
 0x3e2   :  { %v3142_v32 = vpop.eup %3141  ;;  %v2444_v40 = vadd.f32 0.1, %v2412_v54  ;;  %v2333_v17 = vadd.f32 1.0, %v3140_v26  ;;  %v2336_v1 = vmul.f32 -0.5, %v3140_v26  ;;  %v2339_v37 = vand.u32 2147483647, %v3140_v26 }
 0x3e3   :  { %v3144_v20 = vpop.eup %3143  ;;  %v1866_v30 = vadd.f32 1.0, %v3142_v32  ;;  %v2091_v41 = vmul.f32 1.442695, %v1999_v35  ;;  %v1862_v57 = vmul.f32 %v4956_v45, %v1861_v0  ;;  %v1869_v59 = vmul.f32 -0.5, %v3142_v32 }
 0x3e4   :  { %v2479_v11 = vsel %vm2453_vm0, %v1420_v53, %v2444_v40  ;;  %3149 = vlog2.f32 %v2333_v17  ;;  %v1850_v52 = vmul.f32 0.6931472, %v3144_v20  ;;  %v3146_v58 = vpop.eup %3145  ;;  %v2337_v61 = vadd.f32 1.0, %v2336_v1 }
 0x3e5   :  { %2511 = vst [vmem:[#allocation7 + $0xc8] sm:$0xff] %v2479_v11  ;;  %3151 = vlog2.f32 %v1866_v30  ;;  %v1859_v21 = vmul.f32 0.6931472, %v3146_v58  ;;  %v1870_v19 = vadd.f32 1.0, %v1869_v59  ;;  %v1872_v50 = vand.u32 2147483647, %v3142_v32 }
 0x3e6   :  { %3153 = vtanh.f32 %v1357_v27  ;;  %v1856_v24 = vsel %vm1855_vm7, %v1853_v23, %v1850_v52  ;;  %v2338_v56 = vmul.f32 %v3140_v26, %v2337_v61  ;;  %vm2340_vm10 = vcmp.lt.f32.partialorder %v2339_v37, 0.0004427343 }
 0x3e7   :  { %v1904_v16 = vsel %vm1520_vm6, %v4904_v47, %v1856_v24  ;;  %3155 = vpow2.f32 %v2091_v41  ;;  %v1865_v36 = vsel %vm1864_vm8, %v1862_v57, %v1859_v21  ;;  %v1871_v62 = vmul.f32 %v3142_v32, %v1870_v19 }
 0x3e8   :  { %v3148_v10 = vpop.eup %3147  ;;  %v1936_v46 = vsub.f32 10.0, %v1904_v16  ;;  %v1905_v51 = vsel %vm1521_vm9, %v4908_v33, %v1865_v36  ;;  %vm1873_vm13 = vcmp.lt.f32.partialorder %v1872_v50, 0.0004427343  ;;  %v1359_v32 = vmul.f32 0.033333335, %v4845_v31 }
 0x3e9   :  { %v2342_v12 = vadd.f32 1.0, %v3148_v10  ;;  %v1937_v47 = vsub.f32 10.0, %v1905_v51  ;;  %v2345_v45 = vmul.f32 -0.5, %v3148_v10  ;;  %v2348_v27 = vand.u32 2147483647, %v3148_v10 }
 0x3ea   :  { %v4991_v8 = vadd.f32 -0.1, %v1936_v46  ;;  %v1360_v41 = vmul.f32 0.033333335, %v4887_v60 }
 0x3eb   :  { %3157 = vlog2.f32 %v2342_v12  ;;  %v4994_v22 = vadd.f32 -0.1, %v1937_v47  ;;  %v2346_v43 = vadd.f32 1.0, %v2345_v45  ;;  %vm2349_vm14 = vcmp.lt.f32.partialorder %v2348_v27, 0.0004427343 }
 0x3ec   :  { %3159 = vtanh.f32 %v1358_v63  ;;  %v2000_v38 = vmin.f32 %v4991_v8, 20.0  ;;  %vm2032_vm4 = vcmp.gt.f32.partialorder %v4991_v8, 20.0 }
 0x3ed   :  { %v2001_v14 = vmin.f32 %v4994_v22, 20.0  ;;  %v2347_v20 = vmul.f32 %v3148_v10, %v2346_v43  ;;  %vm2033_vm6 = vcmp.gt.f32.partialorder %v4994_v22, 20.0 }
 0x3ee   :  { %v3150_v55 = vpop.eup %3149  ;;  %v2093_v33 = vmul.f32 1.442695, %v2000_v38 }
 0x3ef   :  { %v3152_v25 = vpop.eup %3151  ;;  %v2335_v42 = vmul.f32 0.6931472, %v3150_v55  ;;  %v2095_v18 = vmul.f32 1.442695, %v2001_v14  ;;  %v1362_v55 = vmul.f32 0.033333335, %v4919_v3 }
 0x3f0   :  { %v3154_v5 = vpop.eup %3153  ;;  %v1868_v39 = vmul.f32 0.6931472, %v3152_v25  ;;  %3161 = vpow2.f32 %v2093_v33 }
 0x3f1   :  { %v2341_v44 = vsel %vm2340_vm10, %v2338_v56, %v2335_v42  ;;  %v3156_v9 = vpop.eup %3155  ;;  %v1421_v26 = vmul.f32 30.0, %v3154_v5  ;;  %3163 = vpow2.f32 %v2095_v18 }
 0x3f2   :  { %v2413_v28 = vsel %vm2029_vm12, %v4942_v29, %v2341_v44  ;;  %v1874_v7 = vsel %vm1873_vm13, %v1871_v62, %v1868_v39  ;;  %v2351_v53 = vadd.f32 1.0, %v3156_v9  ;;  %v2354_v23 = vmul.f32 -0.5, %v3156_v9 }
 0x3f3   :  { %v2445_v54 = vadd.f32 0.1, %v2413_v28  ;;  %v1906_v34 = vsel %vm1522_vm11, %v4926_v13, %v1874_v7  ;;  %v2357_v16 = vand.u32 2147483647, %v3156_v9 }
 0x3f4   :  { %v1938_v29 = vsub.f32 10.0, %v1906_v34  ;;  %3165 = vlog2.f32 %v2351_v53  ;;  %v2355_v24 = vadd.f32 1.0, %v2354_v23 }
 0x3f5   :  { %v3158_v40 = vpop.eup %3157  ;;  %v2480_v17 = vsel %vm2453_vm0, %v1421_v26, %v2445_v54  ;;  %3167 = vtanh.f32 %v1359_v32  ;;  %vm2358_vm1 = vcmp.lt.f32.partialorder %v2357_v16, 0.0004427343 }
 0x3f6   :  { %2512 = vst [vmem:[#allocation7 + $0xd0] sm:$0xff] %v2480_v17  ;;  %v2344_v6 = vmul.f32 0.6931472, %v3158_v40  ;;  %v3160_v30 = vpop.eup %3159  ;;  %v5006_v11 = vadd.f32 -0.1, %v1938_v29  ;;  %v2356_v12 = vmul.f32 %v3156_v9, %v2355_v24 }
 0x3f7   :  { %v1422_v35 = vmul.f32 30.0, %v3160_v30 }
 0x3f8   :  { %v2350_v13 = vsel %vm2349_vm14, %v2347_v20, %v2344_v6  ;;  %v2002_v0 = vmin.f32 %v5006_v11, 20.0  ;;  %vm2034_vm8 = vcmp.gt.f32.partialorder %v5006_v11, 20.0 }
 0x3f9   :  { %v2414_v31 = vsel %vm2030_vm15, %v4959_v49, %v2350_v13  ;;  %v1361_v49 = vmul.f32 0.033333335, %v4897_v48 }
 0x3fa   :  { %v2446_v52 = vadd.f32 0.1, %v2414_v31  ;;  %v2097_v15 = vmul.f32 1.442695, %v2002_v0  ;;  %v3162_v58 = vpop.eup %3161 }
 0x3fb   :  { %v2360_v21 = vadd.f32 1.0, %v3162_v58  ;;  %v3164_v10 = vpop.eup %3163  ;;  %v2363_v36 = vmul.f32 -0.5, %v3162_v58  ;;  %v2366_v50 = vand.u32 2147483647, %v3162_v58 }
 0x3fc   :  { %v2481_v1 = vsel %vm2453_vm0, %v1422_v35, %v2446_v52  ;;  %3169 = vpow2.f32 %v2097_v15  ;;  %v2369_v57 = vadd.f32 1.0, %v3164_v10  ;;  %v2372_v37 = vmul.f32 -0.5, %v3164_v10 }
 0x3fd   :  { %2513 = vst [vmem:[#allocation7 + $0xd8] sm:$0xff] %v2481_v1  ;;  %3171 = vlog2.f32 %v2360_v21  ;;  %v2364_v19 = vadd.f32 1.0, %v2363_v36  ;;  %v2375_v56 = vand.u32 2147483647, %v3164_v10  ;;  %vm2367_vm3 = vcmp.lt.f32.partialorder %v2366_v50, 0.0004427343 }
 0x3fe   :  { %v3166_v59 = vpop.eup %3165  ;;  %3173 = vtanh.f32 %v1360_v41  ;;  %v2373_v38 = vadd.f32 1.0, %v2372_v37 }
 0x3ff   :  { %v2353_v63 = vmul.f32 0.6931472, %v3166_v59  ;;  %3175 = vlog2.f32 %v2369_v57  ;;  %v3168_v46 = vpop.eup %3167  ;;  %v2365_v14 = vmul.f32 %v3162_v58, %v2364_v19  ;;  %vm2376_vm5 = vcmp.lt.f32.partialorder %v2375_v56, 0.0004427343 }
 0x400   :  { %3177 = vtanh.f32 %v1361_v49  ;;  %v1423_v51 = vmul.f32 30.0, %v3168_v46  ;;  %v2374_v44 = vmul.f32 %v3164_v10, %v2373_v38 }
 0x401   :  { %v2359_v60 = vsel %vm2358_vm1, %v2356_v12, %v2353_v63 }
 0x402   :  { %v2415_v61 = vsel %vm2031_vm2, %v4978_v4, %v2359_v60 }
 0x403   :  { %v2447_v47 = vadd.f32 0.1, %v2415_v61 }
 0x405   :  { %v2482_v45 = vsel %vm2453_vm0, %v1423_v51, %v2447_v47 }
 0x406   :  { %v3170_v48 = vpop.eup %3169  ;;  %2514 = vst [vmem:[#allocation7 + $0xe0] sm:$0xff] %v2482_v45 }
 0x407   :  { %v2378_v25 = vadd.f32 1.0, %v3170_v48  ;;  %v3172_v42 = vpop.eup %3171  ;;  %v2381_v28 = vmul.f32 -0.5, %v3170_v48 }
 0x408   :  { %v3174_v5 = vpop.eup %3173  ;;  %v2362_v33 = vmul.f32 0.6931472, %v3172_v42 }
 0x409   :  { %3179 = vlog2.f32 %v2378_v25  ;;  %v3176_v4 = vpop.eup %3175  ;;  %v1424_v18 = vmul.f32 30.0, %v3174_v5  ;;  %v2382_v32 = vadd.f32 1.0, %v2381_v28 }
 0x40a   :  { %3181 = vtanh.f32 %v1362_v55  ;;  %v2368_v39 = vsel %vm2367_vm3, %v2365_v14, %v2362_v33  ;;  %v2371_v62 = vmul.f32 0.6931472, %v3176_v4  ;;  %v3178_v43 = vpop.eup %3177 }
 0x40b   :  { %v2416_v3 = vsel %vm2032_vm4, %v4991_v8, %v2368_v39  ;;  %v1425_v27 = vmul.f32 30.0, %v3178_v43  ;;  %v2384_v8 = vand.u32 2147483647, %v3170_v48  ;;  %v2383_v6 = vmul.f32 %v3170_v48, %v2382_v32 }
 0x40c   :  { %v2448_v7 = vadd.f32 0.1, %v2416_v3  ;;  %v2377_v9 = vsel %vm2376_vm5, %v2374_v44, %v2371_v62 }
 0x40d   :  { %v2417_v26 = vsel %vm2033_vm6, %v4994_v22, %v2377_v9  ;;  %vm2385_vm7 = vcmp.lt.f32.partialorder %v2384_v8, 0.0004427343 }
 0x40e   :  { %v2483_v54 = vsel %vm2453_vm0, %v1424_v18, %v2448_v7  ;;  %v2449_v34 = vadd.f32 0.1, %v2417_v26 }
 0x40f   :  { %2515 = vst [vmem:[#allocation7 + $0xe8] sm:$0xff] %v2483_v54 }
 0x410   :  { %v2484_v53 = vsel %vm2453_vm0, %v1425_v27, %v2449_v34 }
 0x411   :  { %2516 = vst [vmem:[#allocation7 + $0xf0] sm:$0xff] %v2484_v53 }
 0x413   :  { %v3180_v40 = vpop.eup %3179 }
 0x414   :  { %v3182_v17 = vpop.eup %3181  ;;  %v2380_v29 = vmul.f32 0.6931472, %v3180_v40 }
 0x415   :  { %v1426_v30 = vmul.f32 30.0, %v3182_v17 }
 0x416   :  { %v2386_v22 = vsel %vm2385_vm7, %v2383_v6, %v2380_v29 }
 0x417   :  { %v2418_v20 = vsel %vm2034_vm8, %v5006_v11, %v2386_v22 }
 0x418   :  { %v2450_v13 = vadd.f32 0.1, %v2418_v20 }
 0x41a   :  { %v2485_v31 = vsel %vm2453_vm0, %v1426_v30, %v2450_v13 }
 0x41b   :  { %2517 = vst [vmem:[#allocation7 + $0xf8] sm:$0xff] %v2485_v31 }
 0x41c   :  { %3240 = shalt.err (!%p3237_p6)
}
 0x41d   :  { %s3241_s20 = scalar_lea.hbm %s5054_s7, 4096 }
 0x41e   :  { %p3242_p7 = scmp.ne.s32.totalorder %s5054_s7, %s3241_s20  ;;  %p3245_p8 = scmp.lt.u32.totalorder %s3241_s20, %s5054_s7 }
 0x420   :  { %p3247_p9 = pnand %p3245_p8, %p3242_p7 }
 0x422   :  { %3250 = shalt.err (!%p3247_p9)
}
 0x423   :  { %2529 = dma.vmem_to_hbm [thread:$0]  %s2524_s16, 4096, %s5054_s7, [#allocation4], %s3258_s11, %s3258_s11, %s3259_s12  }
 0x424   :  { %3255 = dma.done.wait [#allocation4], 4096  }
 0x425   :  { %3256 = vsyncadd [#allocation4], 4294963200 }
 0x426   :  { %2533 = vsyncpa [#allocation3], 1 }
 0x427   :  { %2534 = vsyncpa [#allocation6], 1 }
 0x428   :  { %2535 = vsyncpa [#allocation4], 1 }

</bundles_post_ra>
